<compile_context>
chip_gen: v6e
topology: v6e:2x2x1
jax: 0.10.0
libtpu: 0.0.40
codegen_flags: <defaults>
</compile_context>

<pallas_src>
import functools
import math

import jax
import jax.numpy as jnp
from jax.experimental import pallas as pl
from jax.experimental.pallas import tpu as pltpu

_GELU_K = math.sqrt(2.0 / math.pi)


def _block_kernel(nhead, approx_recip,
                  x_ref,                                  # (T, C) full batch row
                  g1_ref, b1_ref,
                  wq_ref, bq_ref, wk_ref, bk_ref, wv_ref, bv_ref,
                  wo_ref, bo_ref,
                  g2_ref, b2_ref,
                  wfc_ref, bfc_ref, wcp_ref, bcp_ref,
                  o_ref,                                  # (tile_t, C)
                  k_sc, v_sc, y_sc):                      # (T,C), (T,C), (tile_t,C)
    """One grid step = (one batch row, one tile of query positions).

    K/V for the row are produced once at t == 0 into persistent VMEM scratch
    (compute dtype) and reused for every query tile of that row.  Matmul
    operands use the packed weight dtype (bf16 on the fast path) with f32
    accumulation; LN stats, softmax and residual adds stay in f32.
    """
    T, C = x_ref.shape
    Tq = o_ref.shape[0]
    hd = C // nhead
    cd = wq_ref.dtype                 # matmul operand dtype (bf16 on fast path)
    f32 = jnp.float32
    t = pl.program_id(1)

    def layernorm(h, g_ref, b_ref):
        mu = jnp.mean(h, axis=-1, keepdims=True)
        var = jnp.mean((h - mu) ** 2, axis=-1, keepdims=True)
        return (h - mu) * jax.lax.rsqrt(var + 1e-5) * g_ref[...] + b_ref[...]

    # ----- K/V cache: computed once per batch row, reused for t > 0 -----------
    @pl.when(t == 0)
    def _():
        hkv = layernorm(x_ref[...].astype(f32), g1_ref, b1_ref).astype(cd)
        k_sc[...] = (jnp.dot(hkv, wk_ref[...], preferred_element_type=f32)
                     + bk_ref[...]).astype(cd)
        v_sc[...] = (jnp.dot(hkv, wv_ref[...], preferred_element_type=f32)
                     + bv_ref[...]).astype(cd)

    # ----- query tile (sliced out of the already-resident full-row block) -----
    qstart = pl.multiple_of(t * Tq, Tq)
    xq = x_ref[pl.ds(qstart, Tq), :].astype(f32)
    hq = layernorm(xq, g1_ref, b1_ref)
    # Fold the 1/sqrt(hd) softmax scale into q (removes a (Tq,T) VPU multiply/head).
    q = (jnp.dot(hq.astype(cd), wq_ref[...], preferred_element_type=f32)
         + bq_ref[...]) * (1.0 / math.sqrt(hd))
    q = q.astype(cd)

    # ----- attention (NON-causal, mask ignored -- matches the reference) ------
    for hh in range(nhead):
        sl = slice(hh * hd, (hh + 1) * hd)
        att = jax.lax.dot_general(q[:, sl], k_sc[:, sl],
                                  (((1,), (1,)), ((), ())),
                                  preferred_element_type=f32)        # (Tq, T)
        m = jnp.max(att, axis=-1, keepdims=True)
        e = jnp.exp(att - m)
        s = jnp.sum(e, axis=-1, keepdims=True)
        if approx_recip:
            p = e * pl.reciprocal(s, approx=True)      # EUP, bf16 fast path only
        else:
            p = e / s                                  # exact on f32 check path
        # attn_dropout: identity in eval mode
        y_sc[:, sl] = jnp.dot(p.astype(cd), v_sc[:, sl],
                              preferred_element_type=f32).astype(cd)

    y = jnp.dot(y_sc[...], wo_ref[...], preferred_element_type=f32) + bo_ref[...]
    # resid_dropout: identity in eval mode
    x1 = xq + y                                        # residual in f32

    # ----- MLP branch ----------------------------------------------------------
    h2 = layernorm(x1, g2_ref, b2_ref)
    u = jnp.dot(h2.astype(cd), wfc_ref[...], preferred_element_type=f32) + bfc_ref[...]
    # NewGELU (tanh approximation), f32
    u = 0.5 * u * (1.0 + jnp.tanh(_GELU_K * (u + 0.044715 * (u * u * u))))
    ff = jnp.dot(u.astype(cd), wcp_ref[...], preferred_element_type=f32) + bcp_ref[...]
    # mlp dropout: identity in eval mode
    o_ref[...] = (x1 + ff).astype(o_ref.dtype)


def pack_params(params, compute_dtype=jnp.bfloat16):
    """One-time weight packing: transpose PyTorch (out,in) weights to (in,out),
    split the fused qkv weight into Q / K / V parts, cast matmul weights to the
    MXU compute dtype; LN params and biases stay f32 (shaped (1, N))."""
    (g1, b1, w_attn, b_attn, w_proj, b_proj,
     g2, b2, w_fc, b_fc, w_cp, b_cp) = params
    C = g1.shape[0]
    r = lambda a: jnp.asarray(a, jnp.float32).reshape(1, -1)
    w = lambda a: jnp.asarray(a, jnp.float32).T.astype(compute_dtype)
    return (
        r(g1), r(b1),
        w(w_attn[:C]),        r(b_attn[:C]),          # wq (C,C),  bq
        w(w_attn[C:2 * C]),   r(b_attn[C:2 * C]),     # wk (C,C),  bk
        w(w_attn[2 * C:]),    r(b_attn[2 * C:]),      # wv (C,C),  bv
        w(w_proj),            r(b_proj),              # wo (C,C),  bo
        r(g2), r(b2),
        w(w_fc),              r(b_fc),                # wfc (C,4C), bfc
        w(w_cp),              r(b_cp),                # wcp (4C,C), bcp
    )


def _pick_tile_t(T, sub, target=256):
    """Largest divisor of T that is <= target, preferring multiples of 256, then
    128 (MXU-row friendly), then the dtype sublane multiple."""
    if T <= target:
        return T
    for pref in (256, 128, sub):
        cands = [t for t in range(pref, target + 1, pref) if T % t == 0]
        if cands:
            return max(cands)
    return T                                            # fall back to untiled


def _vmem_limit_bytes(T, tile_t, C, act_item, w_item):
    # Double-buffered pipeline blocks: weights/biases/LN params + full-row x + out tile.
    weights = 12 * C * C * w_item + 16 * C * 4
    x_row = T * C * act_item
    out_tl = tile_t * C * act_item
    # Persistent scratch (single copy): K/V cache + per-head context slab.
    scratch = (2 * T * C + tile_t * C) * w_item
    # Live f32 intermediates: LN'd row (t==0), q/x1/h2 tiles, scores+exp, MLP hidden.
    interm = 4 * (T * C + 6 * tile_t * C + 2 * tile_t * T + 8 * tile_t * C)
    est = 2 * (weights + x_row + out_tl) + scratch + interm
    est = int(est * 1.25)                               # modest margin for compiler temps
    try:
        cap = int(pltpu.get_tpu_info().vmem_capacity_bytes)
    except Exception:
        cap = 64 << 20                                  # v7x per-core VMEM (smallest)
    return max(16 << 20, min(est, int(cap * 0.9)))      # leave >=10% for compiler scratch


def transformer_block(x, packed, nhead, *, tile_t=None):
    B, T, C = x.shape
    (g1, b1, wq, bq, wk, bk, wv, bv, wo, bo,
     g2, b2, wfc, bfc, wcp, bcp) = packed
    assert C % nhead == 0
    cd = wq.dtype
    # (16,128) packing for sub-32-bit dtypes; (8,128) otherwise.
    sub = 16 if min(jnp.dtype(x.dtype).itemsize, jnp.dtype(cd).itemsize) < 4 else 8
    if tile_t is None:
        tile_t = _pick_tile_t(T, sub)
    assert T % tile_t == 0 and (tile_t == T or tile_t % sub == 0), \
        "tile_t must divide T and be a multiple of %d (dtype sublane packing)" % sub
    nt = T // tile_t
    approx_recip = jnp.dtype(cd) != jnp.dtype(jnp.float32)

    rep = lambda a: pl.BlockSpec(a.shape, lambda b, t: (0, 0))   # grid-invariant params
    kernel = functools.partial(_block_kernel, nhead, approx_recip)

    return pl.pallas_call(
        kernel,
        out_shape=jax.ShapeDtypeStruct((B, T, C), x.dtype),
        grid_spec=pltpu.PrefetchScalarGridSpec(
            num_scalar_prefetch=0,
            grid=(B, nt),
            in_specs=[
                # Full batch row: DMA'd once per b (block index constant over t);
                # the query tile is sliced out of it inside the kernel.
                pl.BlockSpec((None, T, C), lambda b, t: (b, 0, 0)),
                rep(g1), rep(b1),
                rep(wq), rep(bq), rep(wk), rep(bk), rep(wv), rep(bv),
                rep(wo), rep(bo),
                rep(g2), rep(b2),
                rep(wfc), rep(bfc), rep(wcp), rep(bcp),
            ],
            out_specs=pl.BlockSpec((None, tile_t, C), lambda b, t: (b, t, 0)),
            scratch_shapes=[
                pltpu.VMEM((T, C), cd),         # cached K (persists across t)
                pltpu.VMEM((T, C), cd),         # cached V (persists across t)
                pltpu.VMEM((tile_t, C), cd),    # per-head attention context slab
            ],
        ),
        compiler_params=pltpu.CompilerParams(
            # b parallel (megacore sharding), t arbitrary (carries the K/V cache).
            dimension_semantics=("parallel", "arbitrary"),
            vmem_limit_bytes=_vmem_limit_bytes(
                T, tile_t, C, jnp.dtype(x.dtype).itemsize, jnp.dtype(cd).itemsize),
        ),
    )(x, g1, b1, wq, bq, wk, bk, wv, bv, wo, bo, g2, b2, wfc, bfc, wcp, bcp)


def reference_block(x, params, nhead):
    """Pure-JAX (f32) mirror of the PyTorch forward (eval mode) for verification."""
    (g1, b1, w_attn, b_attn, w_proj, b_proj,
     g2, b2, w_fc, b_fc, w_cp, b_cp) = params
    B, T, C = x.shape
    hd = C // nhead

    def ln(h, g, b):
        mu = jnp.mean(h, -1, keepdims=True)
        var = jnp.mean((h - mu) ** 2, -1, keepdims=True)
        return (h - mu) / jnp.sqrt(var + 1e-5) * g + b

    h = ln(x, g1, b1)
    qkv = h @ w_attn.T + b_attn
    q, k, v = jnp.split(qkv, 3, axis=-1)
    q = q.reshape(B, T, nhead, hd).transpose(0, 2, 1, 3)
    k = k.reshape(B, T, nhead, hd).transpose(0, 2, 1, 3)
    v = v.reshape(B, T, nhead, hd).transpose(0, 2, 1, 3)
    att = (q @ jnp.swapaxes(k, -2, -1)) / math.sqrt(hd)
    att = jax.nn.softmax(att, axis=-1)
    y = (att @ v).transpose(0, 2, 1, 3).reshape(B, T, C)
    y = y @ w_proj.T + b_proj
    x1 = x + y
    h2 = ln(x1, g2, b2)
    u = h2 @ w_fc.T + b_fc
    u = 0.5 * u * (1.0 + jnp.tanh(math.sqrt(2.0 / math.pi) * (u + 0.044715 * u ** 3)))
    return x1 + u @ w_cp.T + b_cp


if __name__ == "__main__":
    # Small, lane-dense demo shapes (C multiple of 128; T a multiple of 16 so the
    # tiled runs use tile_t=16 and exercise the cached-K/V reuse across tiles).
    B, T, C, H = 2, 32, 128, 4
    key = jax.random.PRNGKey(0)
    ks = jax.random.split(key, 9)
    x = jax.random.normal(ks[0], (B, T, C), jnp.float32)

    def uinit(k, shape, fan_in):
        bound = 1.0 / math.sqrt(fan_in)
        return jax.random.uniform(k, shape, jnp.float32, -bound, bound)

    # LayerNorm params (PyTorch default init) and Linear params in (out, in) layout.
    g1 = jnp.ones((C,), jnp.float32); b1 = jnp.zeros((C,), jnp.float32)
    g2 = jnp.ones((C,), jnp.float32); b2 = jnp.zeros((C,), jnp.float32)
    w_attn = uinit(ks[1], (3 * C, C), C); b_attn = uinit(ks[2], (3 * C,), C)
    w_proj = uinit(ks[3], (C, C), C);     b_proj = uinit(ks[4], (C,), C)
    w_fc   = uinit(ks[5], (4 * C, C), C); b_fc   = uinit(ks[6], (4 * C,), C)
    w_cp   = uinit(ks[7], (C, 4 * C), 4 * C); b_cp = uinit(ks[8], (C,), 4 * C)
    params = (g1, b1, w_attn, b_attn, w_proj, b_proj,
              g2, b2, w_fc, b_fc, w_cp, b_cp)

    ref = reference_block(x, params, H)

    # 1) f32-packed, untiled (nt=1): tight check of kernel math (exact softmax divide).
    packed_f32 = pack_params(params, compute_dtype=jnp.float32)
    out_f32 = jax.jit(functools.partial(transformer_block, nhead=H))(x, packed_f32)
    jax.block_until_ready(out_f32)
    assert out_f32.shape == (B, T, C) and out_f32.dtype == x.dtype
    assert jnp.allclose(out_f32, ref, atol=2e-3, rtol=2e-3), \
        "f32 kernel mismatch: max|err|=%e" % float(jnp.max(jnp.abs(out_f32 - ref)))

    # 2) f32-packed, tile_t=16 (nt=2): exercises the once-per-row K/V cache being
    #    reused across query tiles with the t axis marked "arbitrary".
    out_f32_t = jax.jit(functools.partial(transformer_block, nhead=H, tile_t=16))(
        x, packed_f32)
    jax.block_until_ready(out_f32_t)
    assert jnp.allclose(out_f32_t, ref, atol=2e-3, rtol=2e-3), \
        "f32 tiled kernel mismatch: max|err|=%e" % float(jnp.max(jnp.abs(out_f32_t - ref)))

    # 3) bf16-packed fast path, tiled.  Looser tolerance: bf16 matmul operands vs.
    #    an all-f32 reference.
    packed_bf16 = pack_params(params, compute_dtype=jnp.bfloat16)
    out_bf16 = jax.jit(functools.partial(transformer_block, nhead=H, tile_t=16))(
        x, packed_bf16)
    jax.block_until_ready(out_bf16)
    assert out_bf16.shape == (B, T, C) and out_bf16.dtype == x.dtype
    assert jnp.allclose(out_bf16, ref, atol=5e-2, rtol=5e-2), \
        "bf16 kernel mismatch: max|err|=%e" % float(jnp.max(jnp.abs(out_bf16 - ref)))

    print("KERNEL_OK")
</pallas_src>

<mosaic_0001>
module attributes {stable_mosaic.version = 11 : i64} {
  func.func @_block_kernel(%arg0: i32, %arg1: i32, %arg2: memref<1x32x128xf32, #tpu.memory_space<vmem>>, %arg3: memref<1x128xf32, #tpu.memory_space<vmem>>, %arg4: memref<1x128xf32, #tpu.memory_space<vmem>>, %arg5: memref<128x128xf32, #tpu.memory_space<vmem>>, %arg6: memref<1x128xf32, #tpu.memory_space<vmem>>, %arg7: memref<128x128xf32, #tpu.memory_space<vmem>>, %arg8: memref<1x128xf32, #tpu.memory_space<vmem>>, %arg9: memref<128x128xf32, #tpu.memory_space<vmem>>, %arg10: memref<1x128xf32, #tpu.memory_space<vmem>>, %arg11: memref<128x128xf32, #tpu.memory_space<vmem>>, %arg12: memref<1x128xf32, #tpu.memory_space<vmem>>, %arg13: memref<1x128xf32, #tpu.memory_space<vmem>>, %arg14: memref<1x128xf32, #tpu.memory_space<vmem>>, %arg15: memref<128x512xf32, #tpu.memory_space<vmem>>, %arg16: memref<1x512xf32, #tpu.memory_space<vmem>>, %arg17: memref<512x128xf32, #tpu.memory_space<vmem>>, %arg18: memref<1x128xf32, #tpu.memory_space<vmem>>, %arg19: memref<1x32x128xf32, #tpu.memory_space<vmem>>, %arg20: memref<32x128xf32, #tpu.memory_space<vmem>>, %arg21: memref<32x128xf32, #tpu.memory_space<vmem>>, %arg22: memref<32x128xf32, #tpu.memory_space<vmem>>) attributes {dimension_semantics = [#tpu.dimension_semantics<parallel>, #tpu.dimension_semantics<arbitrary>], iteration_bounds = array<i64: 2, 1>, scalar_prefetch = 0 : i64, scratch_operands = 3 : i64, tpu.core_type = #tpu.core_type<tc>, window_params = [{transform_indices = @transform_0, window_bounds = array<i64: 1, 32, 128>}, {pipeline_mode = #tpu.pipeline_mode<synchronous>, transform_indices = @transform_1, window_bounds = array<i64: 1, 128>}, {pipeline_mode = #tpu.pipeline_mode<synchronous>, transform_indices = @transform_2, window_bounds = array<i64: 1, 128>}, {pipeline_mode = #tpu.pipeline_mode<synchronous>, transform_indices = @transform_3, window_bounds = array<i64: 128, 128>}, {pipeline_mode = #tpu.pipeline_mode<synchronous>, transform_indices = @transform_4, window_bounds = array<i64: 1, 128>}, {pipeline_mode = #tpu.pipeline_mode<synchronous>, transform_indices = @transform_5, window_bounds = array<i64: 128, 128>}, {pipeline_mode = #tpu.pipeline_mode<synchronous>, transform_indices = @transform_6, window_bounds = array<i64: 1, 128>}, {pipeline_mode = #tpu.pipeline_mode<synchronous>, transform_indices = @transform_7, window_bounds = array<i64: 128, 128>}, {pipeline_mode = #tpu.pipeline_mode<synchronous>, transform_indices = @transform_8, window_bounds = array<i64: 1, 128>}, {pipeline_mode = #tpu.pipeline_mode<synchronous>, transform_indices = @transform_9, window_bounds = array<i64: 128, 128>}, {pipeline_mode = #tpu.pipeline_mode<synchronous>, transform_indices = @transform_10, window_bounds = array<i64: 1, 128>}, {pipeline_mode = #tpu.pipeline_mode<synchronous>, transform_indices = @transform_11, window_bounds = array<i64: 1, 128>}, {pipeline_mode = #tpu.pipeline_mode<synchronous>, transform_indices = @transform_12, window_bounds = array<i64: 1, 128>}, {pipeline_mode = #tpu.pipeline_mode<synchronous>, transform_indices = @transform_13, window_bounds = array<i64: 128, 512>}, {pipeline_mode = #tpu.pipeline_mode<synchronous>, transform_indices = @transform_14, window_bounds = array<i64: 1, 512>}, {pipeline_mode = #tpu.pipeline_mode<synchronous>, transform_indices = @transform_15, window_bounds = array<i64: 512, 128>}, {pipeline_mode = #tpu.pipeline_mode<synchronous>, transform_indices = @transform_16, window_bounds = array<i64: 1, 128>}, {transform_indices = @transform_17, window_bounds = array<i64: 1, 32, 128>}]} {
    %c0_i32 = arith.constant 0 : i32
    %0 = arith.cmpi eq, %arg1, %c0_i32 : i32
    %1 = arith.extui %0 : i1 to i32
    %c0_i32_0 = arith.constant 0 : i32
    %2 = arith.cmpi ne, %1, %c0_i32_0 : i32
    scf.if %2 {
      %c0_86 = arith.constant 0 : index
      %c0_87 = arith.constant 0 : index
      %c0_88 = arith.constant 0 : index
      %157 = vector.load %arg2[%c0_86, %c0_87, %c0_88] : memref<1x32x128xf32, #tpu.memory_space<vmem>>, vector<1x32x128xf32>
      %158 = vector.shape_cast %157 : vector<1x32x128xf32> to vector<32x128xf32>
      %cst_89 = arith.constant dense<0.000000e+00> : vector<32xf32>
      %159 = vector.multi_reduction <add>, %158, %cst_89 [1] : vector<32x128xf32> to vector<32xf32>
      %160 = vector.shape_cast %159 : vector<32xf32> to vector<32x1xf32>
      %cst_90 = arith.constant 1.280000e+02 : f32
      %161 = vector.broadcast %cst_90 : f32 to vector<32x1xf32>
      %162 = arith.divf %160, %161 : vector<32x1xf32>
      %163 = vector.broadcast %162 : vector<32x1xf32> to vector<32x128xf32>
      %164 = arith.subf %158, %163 : vector<32x128xf32>
      %165 = arith.mulf %164, %164 : vector<32x128xf32>
      %cst_91 = arith.constant dense<0.000000e+00> : vector<32xf32>
      %166 = vector.multi_reduction <add>, %165, %cst_91 [1] : vector<32x128xf32> to vector<32xf32>
      %167 = vector.shape_cast %166 : vector<32xf32> to vector<32x1xf32>
      %cst_92 = arith.constant 1.280000e+02 : f32
      %168 = vector.broadcast %cst_92 : f32 to vector<32x1xf32>
      %169 = arith.divf %167, %168 : vector<32x1xf32>
      %170 = vector.broadcast %162 : vector<32x1xf32> to vector<32x128xf32>
      %171 = arith.subf %158, %170 : vector<32x128xf32>
      %cst_93 = arith.constant 9.99999974E-6 : f32
      %172 = vector.broadcast %cst_93 : f32 to vector<32x1xf32>
      %173 = arith.addf %169, %172 : vector<32x1xf32>
      %174 = math.rsqrt %173 : vector<32x1xf32>
      %175 = vector.broadcast %174 : vector<32x1xf32> to vector<32x128xf32>
      %176 = arith.mulf %171, %175 : vector<32x128xf32>
      %c0_94 = arith.constant 0 : index
      %c0_95 = arith.constant 0 : index
      %177 = vector.load %arg3[%c0_94, %c0_95] : memref<1x128xf32, #tpu.memory_space<vmem>>, vector<1x128xf32>
      %178 = vector.broadcast %177 : vector<1x128xf32> to vector<32x128xf32>
      %179 = arith.mulf %176, %178 : vector<32x128xf32>
      %c0_96 = arith.constant 0 : index
      %c0_97 = arith.constant 0 : index
      %180 = vector.load %arg4[%c0_96, %c0_97] : memref<1x128xf32, #tpu.memory_space<vmem>>, vector<1x128xf32>
      %181 = vector.broadcast %180 : vector<1x128xf32> to vector<32x128xf32>
      %182 = arith.addf %179, %181 : vector<32x128xf32>
      %c0_98 = arith.constant 0 : index
      %c0_99 = arith.constant 0 : index
      %183 = vector.load %arg7[%c0_98, %c0_99] : memref<128x128xf32, #tpu.memory_space<vmem>>, vector<128x128xf32>
      %cst_100 = arith.constant dense<0.000000e+00> : vector<32x128xf32>
      %184 = tpu.matmul %182, %183, %cst_100 {dimension_numbers = #tpu.dot_dimension_numbers<[1], [0], [0], [1], [0, 0, 1, 1], [], []>} : vector<32x128xf32>, vector<128x128xf32>, vector<32x128xf32> -> vector<32x128xf32>
      %c0_101 = arith.constant 0 : index
      %c0_102 = arith.constant 0 : index
      %185 = vector.load %arg8[%c0_101, %c0_102] : memref<1x128xf32, #tpu.memory_space<vmem>>, vector<1x128xf32>
      %186 = vector.broadcast %185 : vector<1x128xf32> to vector<32x128xf32>
      %187 = arith.addf %184, %186 : vector<32x128xf32>
      %c0_103 = arith.constant 0 : index
      %c0_104 = arith.constant 0 : index
      %188 = vector.load %arg20[%c0_103, %c0_104] : memref<32x128xf32, #tpu.memory_space<vmem>>, vector<32x128xf32>
      tpu.vector_store %arg20[%c0_103, %c0_104], %187 {strides = array<i32>} : memref<32x128xf32, #tpu.memory_space<vmem>>, vector<32x128xf32>,
      %c0_105 = arith.constant 0 : index
      %c0_106 = arith.constant 0 : index
      %189 = vector.load %arg9[%c0_105, %c0_106] : memref<128x128xf32, #tpu.memory_space<vmem>>, vector<128x128xf32>
      %cst_107 = arith.constant dense<0.000000e+00> : vector<32x128xf32>
      %190 = tpu.matmul %182, %189, %cst_107 {dimension_numbers = #tpu.dot_dimension_numbers<[1], [0], [0], [1], [0, 0, 1, 1], [], []>} : vector<32x128xf32>, vector<128x128xf32>, vector<32x128xf32> -> vector<32x128xf32>
      %c0_108 = arith.constant 0 : index
      %c0_109 = arith.constant 0 : index
      %191 = vector.load %arg10[%c0_108, %c0_109] : memref<1x128xf32, #tpu.memory_space<vmem>>, vector<1x128xf32>
      %192 = vector.broadcast %191 : vector<1x128xf32> to vector<32x128xf32>
      %193 = arith.addf %190, %192 : vector<32x128xf32>
      %c0_110 = arith.constant 0 : index
      %c0_111 = arith.constant 0 : index
      %194 = vector.load %arg21[%c0_110, %c0_111] : memref<32x128xf32, #tpu.memory_space<vmem>>, vector<32x128xf32>
      tpu.vector_store %arg21[%c0_110, %c0_111], %193 {strides = array<i32>} : memref<32x128xf32, #tpu.memory_space<vmem>>, vector<32x128xf32>,
    } else {
    }
    %c32_i32 = arith.constant 32 : i32
    %3 = arith.muli %arg1, %c32_i32 : i32
    %4 = tpu.assume_multiple %3, 32 : i32
    %c0 = arith.constant 0 : index
    %5 = arith.index_cast %4 : i32 to index
    %c0_1 = arith.constant 0 : index
    %6 = vector.load %arg2[%c0, %5, %c0_1] : memref<1x32x128xf32, #tpu.memory_space<vmem>>, vector<1x32x128xf32>
    %7 = vector.shape_cast %6 : vector<1x32x128xf32> to vector<32x128xf32>
    %cst = arith.constant dense<0.000000e+00> : vector<32xf32>
    %8 = vector.multi_reduction <add>, %7, %cst [1] : vector<32x128xf32> to vector<32xf32>
    %9 = vector.shape_cast %8 : vector<32xf32> to vector<32x1xf32>
    %cst_2 = arith.constant 1.280000e+02 : f32
    %10 = vector.broadcast %cst_2 : f32 to vector<32x1xf32>
    %11 = arith.divf %9, %10 : vector<32x1xf32>
    %12 = vector.broadcast %11 : vector<32x1xf32> to vector<32x128xf32>
    %13 = arith.subf %7, %12 : vector<32x128xf32>
    %14 = arith.mulf %13, %13 : vector<32x128xf32>
    %cst_3 = arith.constant dense<0.000000e+00> : vector<32xf32>
    %15 = vector.multi_reduction <add>, %14, %cst_3 [1] : vector<32x128xf32> to vector<32xf32>
    %16 = vector.shape_cast %15 : vector<32xf32> to vector<32x1xf32>
    %cst_4 = arith.constant 1.280000e+02 : f32
    %17 = vector.broadcast %cst_4 : f32 to vector<32x1xf32>
    %18 = arith.divf %16, %17 : vector<32x1xf32>
    %19 = vector.broadcast %11 : vector<32x1xf32> to vector<32x128xf32>
    %20 = arith.subf %7, %19 : vector<32x128xf32>
    %cst_5 = arith.constant 9.99999974E-6 : f32
    %21 = vector.broadcast %cst_5 : f32 to vector<32x1xf32>
    %22 = arith.addf %18, %21 : vector<32x1xf32>
    %23 = math.rsqrt %22 : vector<32x1xf32>
    %24 = vector.broadcast %23 : vector<32x1xf32> to vector<32x128xf32>
    %25 = arith.mulf %20, %24 : vector<32x128xf32>
    %c0_6 = arith.constant 0 : index
    %c0_7 = arith.constant 0 : index
    %26 = vector.load %arg3[%c0_6, %c0_7] : memref<1x128xf32, #tpu.memory_space<vmem>>, vector<1x128xf32>
    %27 = vector.broadcast %26 : vector<1x128xf32> to vector<32x128xf32>
    %28 = arith.mulf %25, %27 : vector<32x128xf32>
    %c0_8 = arith.constant 0 : index
    %c0_9 = arith.constant 0 : index
    %29 = vector.load %arg4[%c0_8, %c0_9] : memref<1x128xf32, #tpu.memory_space<vmem>>, vector<1x128xf32>
    %30 = vector.broadcast %29 : vector<1x128xf32> to vector<32x128xf32>
    %31 = arith.addf %28, %30 : vector<32x128xf32>
    %c0_10 = arith.constant 0 : index
    %c0_11 = arith.constant 0 : index
    %32 = vector.load %arg5[%c0_10, %c0_11] : memref<128x128xf32, #tpu.memory_space<vmem>>, vector<128x128xf32>
    %cst_12 = arith.constant dense<0.000000e+00> : vector<32x128xf32>
    %33 = tpu.matmul %31, %32, %cst_12 {dimension_numbers = #tpu.dot_dimension_numbers<[1], [0], [0], [1], [0, 0, 1, 1], [], []>} : vector<32x128xf32>, vector<128x128xf32>, vector<32x128xf32> -> vector<32x128xf32>
    %c0_13 = arith.constant 0 : index
    %c0_14 = arith.constant 0 : index
    %34 = vector.load %arg6[%c0_13, %c0_14] : memref<1x128xf32, #tpu.memory_space<vmem>>, vector<1x128xf32>
    %35 = vector.broadcast %34 : vector<1x128xf32> to vector<32x128xf32>
    %36 = arith.addf %33, %35 : vector<32x128xf32>
    %cst_15 = arith.constant 0.176776692 : f32
    %37 = vector.broadcast %cst_15 : f32 to vector<32x128xf32>
    %38 = arith.mulf %36, %37 : vector<32x128xf32>
    %39 = vector.extract_strided_slice %38 {offsets = [0, 0], sizes = [32, 32], strides = [1, 1]} : vector<32x128xf32> to vector<32x32xf32>
    %c0_16 = arith.constant 0 : index
    %c0_17 = arith.constant 0 : index
    %40 = vector.load %arg20[%c0_16, %c0_17] : memref<32x128xf32, #tpu.memory_space<vmem>>, vector<32x32xf32>
    %cst_18 = arith.constant dense<0.000000e+00> : vector<32x32xf32>
    %41 = tpu.matmul %39, %40, %cst_18 {dimension_numbers = #tpu.dot_dimension_numbers<[1], [1], [0], [0], [0, 0, 1, 0], [], []>} : vector<32x32xf32>, vector<32x32xf32>, vector<32x32xf32> -> vector<32x32xf32>
    %cst_19 = arith.constant dense<0xFF800000> : vector<32xf32>
    %42 = vector.multi_reduction <maximumf>, %41, %cst_19 [1] : vector<32x32xf32> to vector<32xf32>
    %43 = vector.shape_cast %42 : vector<32xf32> to vector<32x1xf32>
    %44 = vector.broadcast %43 : vector<32x1xf32> to vector<32x32xf32>
    %45 = arith.subf %41, %44 : vector<32x32xf32>
    %46 = math.exp %45 : vector<32x32xf32>
    %cst_20 = arith.constant dense<0.000000e+00> : vector<32xf32>
    %47 = vector.multi_reduction <add>, %46, %cst_20 [1] : vector<32x32xf32> to vector<32xf32>
    %48 = vector.shape_cast %47 : vector<32xf32> to vector<32x1xf32>
    %49 = vector.broadcast %48 : vector<32x1xf32> to vector<32x32xf32>
    %50 = arith.divf %46, %49 : vector<32x32xf32>
    %c0_21 = arith.constant 0 : index
    %c0_22 = arith.constant 0 : index
    %51 = vector.load %arg21[%c0_21, %c0_22] : memref<32x128xf32, #tpu.memory_space<vmem>>, vector<32x32xf32>
    %cst_23 = arith.constant dense<0.000000e+00> : vector<32x32xf32>
    %52 = tpu.matmul %50, %51, %cst_23 {dimension_numbers = #tpu.dot_dimension_numbers<[1], [0], [0], [1], [0, 0, 1, 1], [], []>} : vector<32x32xf32>, vector<32x32xf32>, vector<32x32xf32> -> vector<32x32xf32>
    %c0_24 = arith.constant 0 : index
    %c0_25 = arith.constant 0 : index
    %53 = vector.load %arg22[%c0_24, %c0_25] : memref<32x128xf32, #tpu.memory_space<vmem>>, vector<32x32xf32>
    tpu.vector_store %arg22[%c0_24, %c0_25], %52 {strides = array<i32>} : memref<32x128xf32, #tpu.memory_space<vmem>>, vector<32x32xf32>,
    %54 = vector.extract_strided_slice %38 {offsets = [0, 32], sizes = [32, 32], strides = [1, 1]} : vector<32x128xf32> to vector<32x32xf32>
    %c0_26 = arith.constant 0 : index
    %c32 = arith.constant 32 : index
    %55 = vector.load %arg20[%c0_26, %c32] : memref<32x128xf32, #tpu.memory_space<vmem>>, vector<32x32xf32>
    %cst_27 = arith.constant dense<0.000000e+00> : vector<32x32xf32>
    %56 = tpu.matmul %54, %55, %cst_27 {dimension_numbers = #tpu.dot_dimension_numbers<[1], [1], [0], [0], [0, 0, 1, 0], [], []>} : vector<32x32xf32>, vector<32x32xf32>, vector<32x32xf32> -> vector<32x32xf32>
    %cst_28 = arith.constant dense<0xFF800000> : vector<32xf32>
    %57 = vector.multi_reduction <maximumf>, %56, %cst_28 [1] : vector<32x32xf32> to vector<32xf32>
    %58 = vector.shape_cast %57 : vector<32xf32> to vector<32x1xf32>
    %59 = vector.broadcast %58 : vector<32x1xf32> to vector<32x32xf32>
    %60 = arith.subf %56, %59 : vector<32x32xf32>
    %61 = math.exp %60 : vector<32x32xf32>
    %cst_29 = arith.constant dense<0.000000e+00> : vector<32xf32>
    %62 = vector.multi_reduction <add>, %61, %cst_29 [1] : vector<32x32xf32> to vector<32xf32>
    %63 = vector.shape_cast %62 : vector<32xf32> to vector<32x1xf32>
    %64 = vector.broadcast %63 : vector<32x1xf32> to vector<32x32xf32>
    %65 = arith.divf %61, %64 : vector<32x32xf32>
    %c0_30 = arith.constant 0 : index
    %c32_31 = arith.constant 32 : index
    %66 = vector.load %arg21[%c0_30, %c32_31] : memref<32x128xf32, #tpu.memory_space<vmem>>, vector<32x32xf32>
    %cst_32 = arith.constant dense<0.000000e+00> : vector<32x32xf32>
    %67 = tpu.matmul %65, %66, %cst_32 {dimension_numbers = #tpu.dot_dimension_numbers<[1], [0], [0], [1], [0, 0, 1, 1], [], []>} : vector<32x32xf32>, vector<32x32xf32>, vector<32x32xf32> -> vector<32x32xf32>
    %c0_33 = arith.constant 0 : index
    %c32_34 = arith.constant 32 : index
    %68 = vector.load %arg22[%c0_33, %c32_34] : memref<32x128xf32, #tpu.memory_space<vmem>>, vector<32x32xf32>
    tpu.vector_store %arg22[%c0_33, %c32_34], %67 {strides = array<i32>} : memref<32x128xf32, #tpu.memory_space<vmem>>, vector<32x32xf32>,
    %69 = vector.extract_strided_slice %38 {offsets = [0, 64], sizes = [32, 32], strides = [1, 1]} : vector<32x128xf32> to vector<32x32xf32>
    %c0_35 = arith.constant 0 : index
    %c64 = arith.constant 64 : index
    %70 = vector.load %arg20[%c0_35, %c64] : memref<32x128xf32, #tpu.memory_space<vmem>>, vector<32x32xf32>
    %cst_36 = arith.constant dense<0.000000e+00> : vector<32x32xf32>
    %71 = tpu.matmul %69, %70, %cst_36 {dimension_numbers = #tpu.dot_dimension_numbers<[1], [1], [0], [0], [0, 0, 1, 0], [], []>} : vector<32x32xf32>, vector<32x32xf32>, vector<32x32xf32> -> vector<32x32xf32>
    %cst_37 = arith.constant dense<0xFF800000> : vector<32xf32>
    %72 = vector.multi_reduction <maximumf>, %71, %cst_37 [1] : vector<32x32xf32> to vector<32xf32>
    %73 = vector.shape_cast %72 : vector<32xf32> to vector<32x1xf32>
    %74 = vector.broadcast %73 : vector<32x1xf32> to vector<32x32xf32>
    %75 = arith.subf %71, %74 : vector<32x32xf32>
    %76 = math.exp %75 : vector<32x32xf32>
    %cst_38 = arith.constant dense<0.000000e+00> : vector<32xf32>
    %77 = vector.multi_reduction <add>, %76, %cst_38 [1] : vector<32x32xf32> to vector<32xf32>
    %78 = vector.shape_cast %77 : vector<32xf32> to vector<32x1xf32>
    %79 = vector.broadcast %78 : vector<32x1xf32> to vector<32x32xf32>
    %80 = arith.divf %76, %79 : vector<32x32xf32>
    %c0_39 = arith.constant 0 : index
    %c64_40 = arith.constant 64 : index
    %81 = vector.load %arg21[%c0_39, %c64_40] : memref<32x128xf32, #tpu.memory_space<vmem>>, vector<32x32xf32>
    %cst_41 = arith.constant dense<0.000000e+00> : vector<32x32xf32>
    %82 = tpu.matmul %80, %81, %cst_41 {dimension_numbers = #tpu.dot_dimension_numbers<[1], [0], [0], [1], [0, 0, 1, 1], [], []>} : vector<32x32xf32>, vector<32x32xf32>, vector<32x32xf32> -> vector<32x32xf32>
    %c0_42 = arith.constant 0 : index
    %c64_43 = arith.constant 64 : index
    %83 = vector.load %arg22[%c0_42, %c64_43] : memref<32x128xf32, #tpu.memory_space<vmem>>, vector<32x32xf32>
    tpu.vector_store %arg22[%c0_42, %c64_43], %82 {strides = array<i32>} : memref<32x128xf32, #tpu.memory_space<vmem>>, vector<32x32xf32>,
    %84 = vector.extract_strided_slice %38 {offsets = [0, 96], sizes = [32, 32], strides = [1, 1]} : vector<32x128xf32> to vector<32x32xf32>
    %c0_44 = arith.constant 0 : index
    %c96 = arith.constant 96 : index
    %85 = vector.load %arg20[%c0_44, %c96] : memref<32x128xf32, #tpu.memory_space<vmem>>, vector<32x32xf32>
    %cst_45 = arith.constant dense<0.000000e+00> : vector<32x32xf32>
    %86 = tpu.matmul %84, %85, %cst_45 {dimension_numbers = #tpu.dot_dimension_numbers<[1], [1], [0], [0], [0, 0, 1, 0], [], []>} : vector<32x32xf32>, vector<32x32xf32>, vector<32x32xf32> -> vector<32x32xf32>
    %cst_46 = arith.constant dense<0xFF800000> : vector<32xf32>
    %87 = vector.multi_reduction <maximumf>, %86, %cst_46 [1] : vector<32x32xf32> to vector<32xf32>
    %88 = vector.shape_cast %87 : vector<32xf32> to vector<32x1xf32>
    %89 = vector.broadcast %88 : vector<32x1xf32> to vector<32x32xf32>
    %90 = arith.subf %86, %89 : vector<32x32xf32>
    %91 = math.exp %90 : vector<32x32xf32>
    %cst_47 = arith.constant dense<0.000000e+00> : vector<32xf32>
    %92 = vector.multi_reduction <add>, %91, %cst_47 [1] : vector<32x32xf32> to vector<32xf32>
    %93 = vector.shape_cast %92 : vector<32xf32> to vector<32x1xf32>
    %94 = vector.broadcast %93 : vector<32x1xf32> to vector<32x32xf32>
    %95 = arith.divf %91, %94 : vector<32x32xf32>
    %c0_48 = arith.constant 0 : index
    %c96_49 = arith.constant 96 : index
    %96 = vector.load %arg21[%c0_48, %c96_49] : memref<32x128xf32, #tpu.memory_space<vmem>>, vector<32x32xf32>
    %cst_50 = arith.constant dense<0.000000e+00> : vector<32x32xf32>
    %97 = tpu.matmul %95, %96, %cst_50 {dimension_numbers = #tpu.dot_dimension_numbers<[1], [0], [0], [1], [0, 0, 1, 1], [], []>} : vector<32x32xf32>, vector<32x32xf32>, vector<32x32xf32> -> vector<32x32xf32>
    %c0_51 = arith.constant 0 : index
    %c96_52 = arith.constant 96 : index
    %98 = vector.load %arg22[%c0_51, %c96_52] : memref<32x128xf32, #tpu.memory_space<vmem>>, vector<32x32xf32>
    tpu.vector_store %arg22[%c0_51, %c96_52], %97 {strides = array<i32>} : memref<32x128xf32, #tpu.memory_space<vmem>>, vector<32x32xf32>,
    %c0_53 = arith.constant 0 : index
    %c0_54 = arith.constant 0 : index
    %99 = vector.load %arg22[%c0_53, %c0_54] : memref<32x128xf32, #tpu.memory_space<vmem>>, vector<32x128xf32>
    %c0_55 = arith.constant 0 : index
    %c0_56 = arith.constant 0 : index
    %100 = vector.load %arg11[%c0_55, %c0_56] : memref<128x128xf32, #tpu.memory_space<vmem>>, vector<128x128xf32>
    %cst_57 = arith.constant dense<0.000000e+00> : vector<32x128xf32>
    %101 = tpu.matmul %99, %100, %cst_57 {dimension_numbers = #tpu.dot_dimension_numbers<[1], [0], [0], [1], [0, 0, 1, 1], [], []>} : vector<32x128xf32>, vector<128x128xf32>, vector<32x128xf32> -> vector<32x128xf32>
    %c0_58 = arith.constant 0 : index
    %c0_59 = arith.constant 0 : index
    %102 = vector.load %arg12[%c0_58, %c0_59] : memref<1x128xf32, #tpu.memory_space<vmem>>, vector<1x128xf32>
    %103 = vector.broadcast %102 : vector<1x128xf32> to vector<32x128xf32>
    %104 = arith.addf %101, %103 : vector<32x128xf32>
    %105 = arith.addf %7, %104 : vector<32x128xf32>
    %cst_60 = arith.constant dense<0.000000e+00> : vector<32xf32>
    %106 = vector.multi_reduction <add>, %105, %cst_60 [1] : vector<32x128xf32> to vector<32xf32>
    %107 = vector.shape_cast %106 : vector<32xf32> to vector<32x1xf32>
    %cst_61 = arith.constant 1.280000e+02 : f32
    %108 = vector.broadcast %cst_61 : f32 to vector<32x1xf32>
    %109 = arith.divf %107, %108 : vector<32x1xf32>
    %110 = vector.broadcast %109 : vector<32x1xf32> to vector<32x128xf32>
    %111 = arith.subf %105, %110 : vector<32x128xf32>
    %112 = arith.mulf %111, %111 : vector<32x128xf32>
    %cst_62 = arith.constant dense<0.000000e+00> : vector<32xf32>
    %113 = vector.multi_reduction <add>, %112, %cst_62 [1] : vector<32x128xf32> to vector<32xf32>
    %114 = vector.shape_cast %113 : vector<32xf32> to vector<32x1xf32>
    %cst_63 = arith.constant 1.280000e+02 : f32
    %115 = vector.broadcast %cst_63 : f32 to vector<32x1xf32>
    %116 = arith.divf %114, %115 : vector<32x1xf32>
    %117 = vector.broadcast %109 : vector<32x1xf32> to vector<32x128xf32>
    %118 = arith.subf %105, %117 : vector<32x128xf32>
    %cst_64 = arith.constant 9.99999974E-6 : f32
    %119 = vector.broadcast %cst_64 : f32 to vector<32x1xf32>
    %120 = arith.addf %116, %119 : vector<32x1xf32>
    %121 = math.rsqrt %120 : vector<32x1xf32>
    %122 = vector.broadcast %121 : vector<32x1xf32> to vector<32x128xf32>
    %123 = arith.mulf %118, %122 : vector<32x128xf32>
    %c0_65 = arith.constant 0 : index
    %c0_66 = arith.constant 0 : index
    %124 = vector.load %arg13[%c0_65, %c0_66] : memref<1x128xf32, #tpu.memory_space<vmem>>, vector<1x128xf32>
    %125 = vector.broadcast %124 : vector<1x128xf32> to vector<32x128xf32>
    %126 = arith.mulf %123, %125 : vector<32x128xf32>
    %c0_67 = arith.constant 0 : index
    %c0_68 = arith.constant 0 : index
    %127 = vector.load %arg14[%c0_67, %c0_68] : memref<1x128xf32, #tpu.memory_space<vmem>>, vector<1x128xf32>
    %128 = vector.broadcast %127 : vector<1x128xf32> to vector<32x128xf32>
    %129 = arith.addf %126, %128 : vector<32x128xf32>
    %c0_69 = arith.constant 0 : index
    %c0_70 = arith.constant 0 : index
    %130 = vector.load %arg15[%c0_69, %c0_70] : memref<128x512xf32, #tpu.memory_space<vmem>>, vector<128x512xf32>
    %cst_71 = arith.constant dense<0.000000e+00> : vector<32x512xf32>
    %131 = tpu.matmul %129, %130, %cst_71 {dimension_numbers = #tpu.dot_dimension_numbers<[1], [0], [0], [1], [0, 0, 1, 1], [], []>} : vector<32x128xf32>, vector<128x512xf32>, vector<32x512xf32> -> vector<32x512xf32>
    %c0_72 = arith.constant 0 : index
    %c0_73 = arith.constant 0 : index
    %132 = vector.load %arg16[%c0_72, %c0_73] : memref<1x512xf32, #tpu.memory_space<vmem>>, vector<1x512xf32>
    %133 = vector.broadcast %132 : vector<1x512xf32> to vector<32x512xf32>
    %134 = arith.addf %131, %133 : vector<32x512xf32>
    %cst_74 = arith.constant 5.000000e-01 : f32
    %135 = vector.broadcast %cst_74 : f32 to vector<32x512xf32>
    %136 = arith.mulf %135, %134 : vector<32x512xf32>
    %137 = arith.mulf %134, %134 : vector<32x512xf32>
    %138 = arith.mulf %137, %134 : vector<32x512xf32>
    %cst_75 = arith.constant 4.471500e-02 : f32
    %139 = vector.broadcast %cst_75 : f32 to vector<32x512xf32>
    %140 = arith.mulf %139, %138 : vector<32x512xf32>
    %141 = arith.addf %134, %140 : vector<32x512xf32>
    %cst_76 = arith.constant 0.797884583 : f32
    %142 = vector.broadcast %cst_76 : f32 to vector<32x512xf32>
    %143 = arith.mulf %142, %141 : vector<32x512xf32>
    %144 = math.tanh %143 : vector<32x512xf32>
    %cst_77 = arith.constant 1.000000e+00 : f32
    %145 = vector.broadcast %cst_77 : f32 to vector<32x512xf32>
    %146 = arith.addf %145, %144 : vector<32x512xf32>
    %147 = arith.mulf %136, %146 : vector<32x512xf32>
    %c0_78 = arith.constant 0 : index
    %c0_79 = arith.constant 0 : index
    %148 = vector.load %arg17[%c0_78, %c0_79] : memref<512x128xf32, #tpu.memory_space<vmem>>, vector<512x128xf32>
    %cst_80 = arith.constant dense<0.000000e+00> : vector<32x128xf32>
    %149 = tpu.matmul %147, %148, %cst_80 {dimension_numbers = #tpu.dot_dimension_numbers<[1], [0], [0], [1], [0, 0, 1, 1], [], []>} : vector<32x512xf32>, vector<512x128xf32>, vector<32x128xf32> -> vector<32x128xf32>
    %c0_81 = arith.constant 0 : index
    %c0_82 = arith.constant 0 : index
    %150 = vector.load %arg18[%c0_81, %c0_82] : memref<1x128xf32, #tpu.memory_space<vmem>>, vector<1x128xf32>
    %151 = vector.broadcast %150 : vector<1x128xf32> to vector<32x128xf32>
    %152 = arith.addf %149, %151 : vector<32x128xf32>
    %153 = arith.addf %105, %152 : vector<32x128xf32>
    %c0_83 = arith.constant 0 : index
    %c0_84 = arith.constant 0 : index
    %c0_85 = arith.constant 0 : index
    %154 = vector.load %arg19[%c0_83, %c0_84, %c0_85] : memref<1x32x128xf32, #tpu.memory_space<vmem>>, vector<1x32x128xf32>
    %155 = vector.shape_cast %154 : vector<1x32x128xf32> to vector<32x128xf32>
    %156 = vector.shape_cast %153 : vector<32x128xf32> to vector<1x32x128xf32>
    tpu.vector_store %arg19[%c0_83, %c0_84, %c0_85], %156 {strides = array<i32>} : memref<1x32x128xf32, #tpu.memory_space<vmem>>, vector<1x32x128xf32>,
    return
  }
  func.func @transform_0(%arg0: i32, %arg1: i32) -> (i32, i32, i32) {
    %c0_i32 = arith.constant 0 : i32
    %c0_i32_0 = arith.constant 0 : i32
    %c0_i32_1 = arith.constant 0 : i32
    return %arg0, %c0_i32, %c0_i32_0 : i32, i32, i32
  }
  func.func @transform_1(%arg0: i32, %arg1: i32) -> (i32, i32) {
    %c0_i32 = arith.constant 0 : i32
    %c0_i32_0 = arith.constant 0 : i32
    %c0_i32_1 = arith.constant 0 : i32
    return %c0_i32, %c0_i32_0 : i32, i32
  }
  func.func @transform_2(%arg0: i32, %arg1: i32) -> (i32, i32) {
    %c0_i32 = arith.constant 0 : i32
    %c0_i32_0 = arith.constant 0 : i32
    %c0_i32_1 = arith.constant 0 : i32
    return %c0_i32, %c0_i32_0 : i32, i32
  }
  func.func @transform_3(%arg0: i32, %arg1: i32) -> (i32, i32) {
    %c0_i32 = arith.constant 0 : i32
    %c0_i32_0 = arith.constant 0 : i32
    %c0_i32_1 = arith.constant 0 : i32
    return %c0_i32, %c0_i32_0 : i32, i32
  }
  func.func @transform_4(%arg0: i32, %arg1: i32) -> (i32, i32) {
    %c0_i32 = arith.constant 0 : i32
    %c0_i32_0 = arith.constant 0 : i32
    %c0_i32_1 = arith.constant 0 : i32
    return %c0_i32, %c0_i32_0 : i32, i32
  }
  func.func @transform_5(%arg0: i32, %arg1: i32) -> (i32, i32) {
    %c0_i32 = arith.constant 0 : i32
    %c0_i32_0 = arith.constant 0 : i32
    %c0_i32_1 = arith.constant 0 : i32
    return %c0_i32, %c0_i32_0 : i32, i32
  }
  func.func @transform_6(%arg0: i32, %arg1: i32) -> (i32, i32) {
    %c0_i32 = arith.constant 0 : i32
    %c0_i32_0 = arith.constant 0 : i32
    %c0_i32_1 = arith.constant 0 : i32
    return %c0_i32, %c0_i32_0 : i32, i32
  }
  func.func @transform_7(%arg0: i32, %arg1: i32) -> (i32, i32) {
    %c0_i32 = arith.constant 0 : i32
    %c0_i32_0 = arith.constant 0 : i32
    %c0_i32_1 = arith.constant 0 : i32
    return %c0_i32, %c0_i32_0 : i32, i32
  }
  func.func @transform_8(%arg0: i32, %arg1: i32) -> (i32, i32) {
    %c0_i32 = arith.constant 0 : i32
    %c0_i32_0 = arith.constant 0 : i32
    %c0_i32_1 = arith.constant 0 : i32
    return %c0_i32, %c0_i32_0 : i32, i32
  }
  func.func @transform_9(%arg0: i32, %arg1: i32) -> (i32, i32) {
    %c0_i32 = arith.constant 0 : i32
    %c0_i32_0 = arith.constant 0 : i32
    %c0_i32_1 = arith.constant 0 : i32
    return %c0_i32, %c0_i32_0 : i32, i32
  }
  func.func @transform_10(%arg0: i32, %arg1: i32) -> (i32, i32) {
    %c0_i32 = arith.constant 0 : i32
    %c0_i32_0 = arith.constant 0 : i32
    %c0_i32_1 = arith.constant 0 : i32
    return %c0_i32, %c0_i32_0 : i32, i32
  }
  func.func @transform_11(%arg0: i32, %arg1: i32) -> (i32, i32) {
    %c0_i32 = arith.constant 0 : i32
    %c0_i32_0 = arith.constant 0 : i32
    %c0_i32_1 = arith.constant 0 : i32
    return %c0_i32, %c0_i32_0 : i32, i32
  }
  func.func @transform_12(%arg0: i32, %arg1: i32) -> (i32, i32) {
    %c0_i32 = arith.constant 0 : i32
    %c0_i32_0 = arith.constant 0 : i32
    %c0_i32_1 = arith.constant 0 : i32
    return %c0_i32, %c0_i32_0 : i32, i32
  }
  func.func @transform_13(%arg0: i32, %arg1: i32) -> (i32, i32) {
    %c0_i32 = arith.constant 0 : i32
    %c0_i32_0 = arith.constant 0 : i32
    %c0_i32_1 = arith.constant 0 : i32
    return %c0_i32, %c0_i32_0 : i32, i32
  }
  func.func @transform_14(%arg0: i32, %arg1: i32) -> (i32, i32) {
    %c0_i32 = arith.constant 0 : i32
    %c0_i32_0 = arith.constant 0 : i32
    %c0_i32_1 = arith.constant 0 : i32
    return %c0_i32, %c0_i32_0 : i32, i32
  }
  func.func @transform_15(%arg0: i32, %arg1: i32) -> (i32, i32) {
    %c0_i32 = arith.constant 0 : i32
    %c0_i32_0 = arith.constant 0 : i32
    %c0_i32_1 = arith.constant 0 : i32
    return %c0_i32, %c0_i32_0 : i32, i32
  }
  func.func @transform_16(%arg0: i32, %arg1: i32) -> (i32, i32) {
    %c0_i32 = arith.constant 0 : i32
    %c0_i32_0 = arith.constant 0 : i32
    %c0_i32_1 = arith.constant 0 : i32
    return %c0_i32, %c0_i32_0 : i32, i32
  }
  func.func @transform_17(%arg0: i32, %arg1: i32) -> (i32, i32, i32) {
    %c0_i32 = arith.constant 0 : i32
    %c0_i32_0 = arith.constant 0 : i32
    return %arg0, %arg1, %c0_i32 : i32, i32, i32
  }
}

</mosaic_0001>

<bundles_post_ra>
// kernel: transformer_block.1
= control target key start
LH: loop header
LB: loop body
LE: loop exit
PB: predicated region body
PF: predicated region fallthrough
CT: control target
= control target key end

     0   :  { %s5364_s0 = inlined_call_operand.hbm [shape: f32[2,32,128], index: 0, kind: input, shape index: {}]   ;;  %s5365_s1 = inlined_call_operand.vmem [shape: f32[1,128], index: 1, kind: input, shape index: {}]   ;;  %s5366_s2 = inlined_call_operand.vmem [shape: f32[1,128], index: 2, kind: input, shape index: {}]   ;;  %s5367_s3 = inlined_call_operand.hbm [shape: f32[128,128], index: 3, kind: input, shape index: {}]   ;;  %s5368_s4 = inlined_call_operand.vmem [shape: f32[1,128], index: 4, kind: input, shape index: {}]   ;;  %s5369_s5 = inlined_call_operand.hbm [shape: f32[128,128], index: 5, kind: input, shape index: {}]   ;;  %s5370_s6 = inlined_call_operand.vmem [shape: f32[1,128], index: 6, kind: input, shape index: {}]   ;;  %s5371_s7 = inlined_call_operand.hbm [shape: f32[128,128], index: 7, kind: input, shape index: {}]   ;;  %s5372_s8 = inlined_call_operand.vmem [shape: f32[1,128], index: 8, kind: input, shape index: {}]   ;;  %s5373_s9 = inlined_call_operand.hbm [shape: f32[128,128], index: 9, kind: input, shape index: {}]   ;;  %s5374_s10 = inlined_call_operand.vmem [shape: f32[1,128], index: 10, kind: input, shape index: {}]   ;;  %s5375_s11 = inlined_call_operand.vmem [shape: f32[1,128], index: 11, kind: input, shape index: {}]   ;;  %s5376_s12 = inlined_call_operand.vmem [shape: f32[1,128], index: 12, kind: input, shape index: {}]   ;;  %s5377_s13 = inlined_call_operand.hbm [shape: f32[128,512], index: 13, kind: input, shape index: {}]   ;;  %s5378_s14 = inlined_call_operand.vmem [shape: f32[1,512], index: 14, kind: input, shape index: {}]   ;;  %s5379_s15 = inlined_call_operand.hbm [shape: f32[512,128], index: 15, kind: input, shape index: {}]   ;;  %s5380_s16 = inlined_call_operand.vmem [shape: f32[1,128], index: 16, kind: input, shape index: {}]   ;;  %s5381_s17 = inlined_call_operand.hbm [shape: f32[2,32,128], index: 17, kind: output, shape index: {}]  }
   0x1   :  { %5391 = sst [smem:[#allocation28_spill]] %s5364_s0 }
   0x2   :  { %5392 = sst [smem:[#allocation29_spill]] %s5365_s1 }
   0x3   :  { %5393 = sst [smem:[#allocation30_spill]] %s5367_s3 }
   0x4   :  { %5394 = sst [smem:[#allocation31_spill]] %s5369_s5 }
   0x5   :  { %5395 = sst [smem:[#allocation32_spill]] %s5371_s7 }
   0x6   :  { %5396 = sst [smem:[#allocation33_spill]] %s5373_s9 }
   0x7   :  { %5397 = sst [smem:[#allocation34_spill]] %s5376_s12 }
   0x8   :  { %5398 = sst [smem:[#allocation35_spill]] %s5377_s13 }
   0x9   :  { %5399 = sst [smem:[#allocation36_spill]] %s5378_s14 }
   0xa   :  { %5400 = sst [smem:[#allocation37_spill]] %s5379_s15 }
   0xb   :  { %5401 = sst [smem:[#allocation38_spill]] %s5380_s16 }
   0xc   :  { %5402 = sst [smem:[#allocation39_spill]] %s5381_s17 }
   0xd   :  { %22 = vsyncpa [#allocation6], 0 }
   0xe   :  { %24 = vsyncpa [#allocation6 + $0x1], 0 }
   0xf   :  { %25 = vsyncpa [#allocation9], 0 }
  0x10   :  { %26 = vsyncpa [#allocation12], 0 }
  0x11   :  { %27 = vsyncpa [#allocation15], 0 }
  0x12   :  { %28 = vsyncpa [#allocation7], 0 }
  0x13   :  { %30 = vsyncpa [#allocation7 + $0x1], 0  ;;  %s4562_s24 = smov 0   ;;  %s4564_s25 = smov 0  }
  0x14   :  { %s4566_s26 = smov 0   ;;  %s4568_s27 = smov 0  }
  0x15   :  { %s4570_s28 = smov 0   ;;  %s4572_s29 = smov 0  }
  0x16 LB: > { %5403 = sst [smem:[#allocation23_spill]] %s4432_s24  ;;  %s5382_s0 = sadd.s32 4294967295, %s4452_s29   ;;  %s4452_s29 = sphi %s4572_s29, %s36_s29   ;;  %s4448_s28 = sphi %s4570_s28, %s5438_s28   ;;  %s4444_s27 = sphi %s4568_s27, %s5437_s27   ;;  %s4440_s26 = sphi %s4566_s26, %s5441_s26   ;;  %s4436_s25 = sphi %s4564_s25, %s5440_s25   ;;  %s4432_s24 = sphi %s4562_s24, %s5439_s24  }
  0x17   : > { %5404 = sst [smem:[#allocation24_spill]] %s4444_s27  ;;  %p3337_p0 = scmp.ge.s32.totalorder %s4452_s29, 1 }
  0x18   : > { %5405 = sst [smem:[#allocation25_spill]] %s4448_s28  ;;  %p4596_p1 = scmp.eq.s32.totalorder %s5382_s0, 0 }
  0x19   : > { %p443_p2 = scmp.lt.s32.totalorder %s4452_s29, 3  ;;  %s4454_s19 = smov [#allocation8]  }
  0x1a   : > { %s461_s1 = sshll.u32 %s4454_s19, 4  ;;  %s4455_s21 = smov [#allocation11]   ;;  %s462_s1 = int_to_ptr.vmem [resolvable:$true] %s461_s1 }
  0x1b   : > { %p4601_p3 = pnand %p3337_p0, %p443_p2  ;;  %s493_s22 = sshll.u32 %s4455_s21, 4  ;;  %s494_s22 = int_to_ptr.vmem [resolvable:$true] %s493_s22 }
  0x1c   : > { %s4456_s23 = smov [#allocation14]   ;;  %s4187_s19 = scalar_lea.vmem %s462_s1, 2048 }
  0x1d   : > { %p3947_p4 = pneg %p4601_p3  ;;  %s531_s0 = sshll.u32 %s4456_s23, 4  ;;  %s532_s0 = int_to_ptr.vmem [resolvable:$true] %s531_s0 }
  0x1e   : > { %p4188_p8 = scmp.ne.s32.totalorder %s462_s1, %s4187_s19  ;;  %p4195_p11 = scmp.lt.s32.totalorder %s462_s1, %s462_s1 }
  0x1f   : > { %p4610_p6 = pnand %p3947_p4, %p4596_p1  ;;  %p4196_p12 = scmp.lt.s32.totalorder %s4187_s19, %s4187_s19 }
  0x21   : > { %p4616_p7 = pneg %p4610_p6  ;;  %p4197_p13 = por %p4196_p12, %p4195_p11 }
  0x23   : > { %p4190_p9 = pnand %p4188_p8, %p4616_p7 }
  0x25   : > { %p4191_p10 = pneg %p4190_p9 }
  0x27   : > { %p4198_p0 = pnand %p4197_p13, %p4191_p10 }
  0x29   : > { %4201 = shalt.err (!%p4198_p0)
}
  0x2a   : > { %s5384_s21 = smov 128   ;;  %s5386_s23 = smov 8  }
  0x2b   : > { %s5410_s3 = sld [smem:[#allocation30_spill]]  ;;  %s4213_s14 = scalar_lea.vmem %s494_s22, 2048 }
  0x2c   : > { %p4214_p2 = scmp.ne.s32.totalorder %s494_s22, %s4213_s14  ;;  %p4221_p9 = scmp.lt.s32.totalorder %s494_s22, %s494_s22 }
  0x2d   : > { %p4222_p10 = scmp.lt.s32.totalorder %s4213_s14, %s4213_s14 }
  0x2e   : > { %p4216_p4 = pnand %p4214_p2, %p4616_p7 }
  0x2f   : > { %p4223_p11 = por %p4222_p10, %p4221_p9 }
  0x30   : > { %p4217_p8 = pneg %p4216_p4 }
  0x31   : > { %3950 = dma.hbm_to_vmem [thread:$0]  (!%p4610_p6), %s5410_s3, 2048, %s462_s1, [#allocation9], %s5384_s21, %s5384_s21, %s5386_s23  }
  0x32   : > { %p4224_p12 = pnand %p4223_p11, %p4217_p8 }
  0x34   : > { %4227 = shalt.err (!%p4224_p12)
}
  0x35   : > { %s5411_s7 = sld [smem:[#allocation32_spill]]  ;;  %s4239_s16 = scalar_lea.vmem %s532_s0, 8192 }
  0x36   : > { %p4240_p13 = scmp.ne.s32.totalorder %s532_s0, %s4239_s16  ;;  %p4247_p4 = scmp.lt.s32.totalorder %s532_s0, %s532_s0 }
  0x37   : > { %p4248_p9 = scmp.lt.s32.totalorder %s4239_s16, %s4239_s16 }
  0x38   : > { %p4242_p0 = pnand %p4240_p13, %p4616_p7 }
  0x39   : > { %p4249_p8 = por %p4248_p9, %p4247_p4 }
  0x3a   : > { %p4243_p2 = pneg %p4242_p0 }
  0x3b   : > { %3956 = dma.hbm_to_vmem [thread:$0]  (!%p4610_p6), %s5411_s7, 2048, %s494_s22, [#allocation12], %s5384_s21, %s5384_s21, %s5386_s23  }
  0x3c   : > { %p4250_p10 = pnand %p4249_p8, %p4243_p2 }
  0x3e   : > { %4253 = shalt.err (!%p4250_p10)
}
  0x3f   : > { %s4459_s14 = smov 512   ;;  %s4460_s27 = smov 32  }
  0x40   : > { %s5412_s13 = sld [smem:[#allocation35_spill]]  ;;  %s4461_s22 = smov [#allocation10]  }
  0x41   : > { %s477_s19 = sshll.u32 %s4461_s22, 4  ;;  %s4462_s21 = smov [#allocation13]   ;;  %s478_s19 = int_to_ptr.vmem [resolvable:$true] %s477_s19 }
  0x42   : > { %s509_s23 = sshll.u32 %s4462_s21, 4  ;;  %s4265_s3 = scalar_lea.vmem %s478_s19, 2048  ;;  %s510_s23 = int_to_ptr.vmem [resolvable:$true] %s509_s23 }
  0x43   : > { %p4266_p11 = scmp.ne.s32.totalorder %s478_s19, %s4265_s3  ;;  %p4273_p0 = scmp.lt.s32.totalorder %s478_s19, %s478_s19 }
  0x44   : > { %p4274_p2 = scmp.lt.s32.totalorder %s4265_s3, %s4265_s3 }
  0x45   : > { %p4268_p12 = pnand %p4266_p11, %p4616_p7 }
  0x46   : > { %3962 = dma.hbm_to_vmem [thread:$0]  (!%p4610_p6), %s5412_s13, 8192, %s532_s0, [#allocation15], %s4459_s14, %s4459_s14, %s4460_s27  }
  0x47   : > { %p4269_p13 = pneg %p4268_p12  ;;  %p4275_p4 = por %p4274_p2, %p4273_p0 }
  0x49   : > { %p4276_p9 = pnand %p4275_p4, %p4269_p13 }
  0x4b   : > { %4279 = shalt.err (!%p4276_p9)
}
  0x4c   : > { %s5413_s16 = smov 8   ;;  %s5414_s1 = smov 128  }
  0x4d   : > { %s5415_s5 = sld [smem:[#allocation31_spill]]  ;;  %s4291_s21 = scalar_lea.vmem %s510_s23, 2048 }
  0x4e   : > { %p4292_p8 = scmp.ne.s32.totalorder %s510_s23, %s4291_s21  ;;  %p4299_p12 = scmp.lt.s32.totalorder %s510_s23, %s510_s23 }
  0x4f   : > { %p4300_p0 = scmp.lt.s32.totalorder %s4291_s21, %s4291_s21 }
  0x50   : > { %p4294_p10 = pnand %p4292_p8, %p4616_p7 }
  0x51   : > { %p4301_p13 = por %p4300_p0, %p4299_p12 }
  0x52   : > { %p4295_p11 = pneg %p4294_p10 }
  0x53   : > { %3953 = dma.hbm_to_vmem [thread:$0]  (!%p4610_p6), %s5415_s5, 2048, %s478_s19, [#allocation9], %s5414_s1, %s5414_s1, %s5413_s16  }
  0x54   : > { %p4302_p2 = pnand %p4301_p13, %p4295_p11 }
  0x56   : > { %4305 = shalt.err (!%p4302_p2)
}
  0x57   : > { %s5416_s9 = sld [smem:[#allocation33_spill]]  ;;  %s4463_s12 = smov [#allocation16]  }
  0x58   : > { %s547_s22 = sshll.u32 %s4463_s12, 4  ;;  %s548_s22 = int_to_ptr.vmem [resolvable:$true] %s547_s22 }
  0x59   : > { %s4317_s19 = scalar_lea.vmem %s548_s22, 8192  ;;  %p4325_p10 = scmp.lt.s32.totalorder %s548_s22, %s548_s22 }
  0x5a   : > { %p4318_p4 = scmp.ne.s32.totalorder %s548_s22, %s4317_s19  ;;  %p4326_p11 = scmp.lt.s32.totalorder %s4317_s19, %s4317_s19 }
  0x5c   : > { %p4320_p9 = pnand %p4318_p4, %p4616_p7  ;;  %p4327_p12 = por %p4326_p11, %p4325_p10 }
  0x5d   : > { %3959 = dma.hbm_to_vmem [thread:$0]  (!%p4610_p6), %s5416_s9, 2048, %s510_s23, [#allocation12], %s5414_s1, %s5414_s1, %s5413_s16  }
  0x5e   : > { %p4321_p8 = pneg %p4320_p9 }
  0x60   : > { %p4328_p0 = pnand %p4327_p12, %p4321_p8 }
  0x62   : > { %4331 = shalt.err (!%p4328_p0)
}
  0x63   : > { %s5417_s15 = sld [smem:[#allocation37_spill]]  ;;  %s3336_s17 = sadd.s32 4294967294, %s4452_s29  }
  0x64   : > { %s48_s20 = sadd.s32 1, %s4448_s28  ;;  %s55_s14 = sadd.s32 1, %s4440_s26 }
  0x65   : > { %p50_p7 = scmp.ge.s32.totalorder %s48_s20, 2  ;;  %p62_p13 = scmp.ne.s32.totalorder %s4440_s26, %s4436_s25 }
  0x66   : > { %p63_p2 = scmp.eq.s32.totalorder %s4452_s29, 0  ;;  %p68_p9 = scmp.ne.s32.totalorder %s4436_s25, %s4432_s24 }
  0x67   : > { %s5443_s20 = smov (%p50_p7, %s48_s20), 0  ;;  %s5420_s27 = sadd.s32 4294967295, %s4452_s29  }
  0x68   : > { %5418 = sst [smem:[#allocation26_spill]] %s5443_s20  ;;  %p4685_p4 = por %p63_p2, %p62_p13 }
  0x69   : > { %3965 = dma.hbm_to_vmem [thread:$0]  (!%p4610_p6), %s5417_s15, 8192, %s548_s22, [#allocation15], %s5414_s1, %s5414_s1, %s5413_s16  }
  0x6a   : > { %s52_s3 = ssub.s32 %s4448_s28, %s5443_s20  ;;  %p430_p6 = scmp.eq.s32.totalorder %s5420_s27, 1 }
  0x6b   : > { %p53_p8 = scmp.eq.s32.totalorder %s52_s3, 0  ;;  %p4697_p10 = por %p4596_p1, %p68_p9 }
  0x6c   : > { %p4701_p11 = por %p430_p6, %p62_p13  ;;  %p436_p12 = scmp.eq.s32.totalorder %s3336_s17, 1 }
  0x6d   : > { %s4706_s19 = scalar_select %p53_p8, %s4440_s26, %s55_s14  }
  0x6e   : > { %p4708_p0 = por %p436_p12, %p68_p9  ;;  %p3980_p7 = scmp.lt.s32.totalorder %s4452_s29, 2 }
  0x6f   : > { %5423 = sst [smem:[#allocation27_spill]] %s4706_s19  ;;  %s564_s23 = sand.u32 1, %s4440_s26  }
  0x70   : > { %s5424_s0 = scalar_select %p4708_p0, 1, 0 }
  0x71   : > { %s3421_s27 = sshll.u32 %s4448_s28, 9  ;;  %s3345_s3 = sshll.u32 %s564_s23, 5 }
  0x72   : > { %s5425_s9 = sld [smem:[#allocation28_spill]]  ;;  %s568_s15 = scalar_lea.vmem [#allocation5], %s3345_s3 }
  0x73   : > { %s575_s20 = sshll.u32 %s568_s15, 4  ;;  %p4720_p13 = pnand %p3980_p7, %p4685_p4  ;;  %s576_s20 = int_to_ptr.vmem [resolvable:$true] %s575_s20 }
  0x74   : > { %s565_s17 = scalar_lea.sflag [#allocation6], %s564_s23  ;;  %s4345_s14 = scalar_lea.vmem %s576_s20, 512 }
  0x75   : > { %p4334_p2 = pneg %p4720_p13  ;;  %p4346_p9 = scmp.ne.s32.totalorder %s576_s20, %s4345_s14 }
  0x76   : > { %s4464_s28 = smov [#allocation5]  }
  0x77   : > { %p4348_p6 = pnand %p4346_p9, %p4334_p2  ;;  %s4350_s19 = sshll.u32 %s4464_s28, 4  ;;  %s4351_s19 = int_to_ptr.vmem [resolvable:$false] %s4350_s19 }
  0x78   : > { %s574_s13 = scalar_lea.hbm %s5425_s9, %s3421_s27  ;;  %s4352_s5 = scalar_lea.vmem %s4351_s19, 1024 }
  0x79   : > { %p4349_p8 = pneg %p4348_p6  ;;  %p4353_p12 = scmp.lt.s32.totalorder %s576_s20, %s4351_s19 }
  0x7a   : > { %p4354_p5 = scmp.lt.s32.totalorder %s4352_s5, %s4345_s14 }
  0x7c   : > { %p4355_p0 = por %p4354_p5, %p4353_p12 }
  0x7e   : > { %p4356_p4 = pnand %p4355_p0, %p4349_p8 }
  0x80   : > { %4359 = shalt.err (!%p4356_p4)
}
  0x81   : > { %3969 = dma.hbm_to_vmem [thread:$0]  (!%p4720_p13), %s574_s13, 512, %s576_s20, %s565_s17, %s5414_s1, %s5414_s1, %s5413_s16  }
  0x82   : > { %587 = sbr.rel (%p4601_p3) target bundleno = 3631 (0xe2f), region = 88  ;;  %s4734_s7 = sand.u32 (!%p4601_p3), 1, %s4436_s25  }
  0x83   : > { %s3349_s9 = sshll.u32 (!%p4601_p3), %s4734_s7, 5  ;;  %s590_s15 = scalar_lea.sflag (!%p4601_p3), [#allocation6], %s4734_s7 }
  0x84   : > { %s4740_s28 = scalar_lea.vmem (!%p4601_p3), [#allocation5], %s3349_s9 }
  0x87   : > { %4411 = dma.done.wait (%p4697_p10), %s590_s15, 512  }
  0x88   : > { %4413 = vsyncadd (%p4697_p10), %s590_s15, 4294966784 }
  0x89   : > { %4415 = dma.done.wait (%p4596_p1), [#allocation9], 4096  }
  0x8a   : > { %4417 = vsyncadd (%p4596_p1), [#allocation9], 4294963200 }
  0x8b   : > { %4419 = dma.done.wait (%p4596_p1), [#allocation12], 4096  }
  0x8c   : > { %4421 = vsyncadd (%p4596_p1), [#allocation12], 4294963200 }
  0x8d   : > { %4423 = dma.done.wait (%p4596_p1), [#allocation15], 16384  }
  0x8e   : > { %4425 = vsyncadd (%p4596_p1), [#allocation15], 4294950912  ;;  %v673_v0 = vld [vmem:[%s4740_s28] sm:$0xff]  ;;  %v675_v1 = vld [vmem:[%s4740_s28 + $0x10] sm:$0xff]  ;;  %s5427_s30 = sld [smem:[#allocation29_spill]]  ;;  %vm1157_vm0 = vcmask 261120  }
  0x8f   : > { %677 = vadd.xlane.f32.xlu0 %v673_v0  ;;  %681 = vadd.xlane.f32.xlu1 %v675_v1  ;;  %v674_v2 = vld [vmem:[%s4740_s28 + $0x8] sm:$0xff]  ;;  %v676_v3 = vld [vmem:[%s4740_s28 + $0x18] sm:$0xff]  ;;  %v758_v6 = vld [vmem:[#allocation10 + $0x70] sm:$0xff]  ;;  %s4465_s27 = smov 96   ;;  %s4466_s3 = smov 64   ;;  %vm1718_vm1 = vcmask 523520  }
  0x90   : > { %v759_v4 = vld [vmem:[#allocation10 + $0x78] sm:$0xff]  ;;  %v870_v7 = vld [vmem:[#allocation11 + $0x70] sm:$0xff]  ;;  %v757_v8 = vld [vmem:[#allocation10 + $0x68] sm:$0xff]  ;;  %s4467_s17 = smov 32   ;;  %vm2025_vm2 = vcmask 785920   ;;  %vm2332_vm3 = vcmask 1048320  }
  0x91   : > { %v871_v5 = vld [vmem:[#allocation11 + $0x78] sm:$0xff]  ;;  %3655 = vmatprep.subr.mxu0 %v759_v4  ;;  %v869_v39 = vld [vmem:[#allocation11 + $0x68] sm:$0xff]  ;;  %v756_v41 = vld [vmem:[#allocation10 + $0x60] sm:$0xff]  ;;  %s5429_s1 = sld [smem:[#allocation36_spill]]  ;;  %s667_s19 = scalar_lea.vmem [#allocation17], %s3349_s9 }
  0x92   : > { %3693 = vmatprep.subr.mxu1 %v871_v5  ;;  %3656 = vmatpush3.msra.mxu0 %v759_v4  ;;  %v868_v42 = vld [vmem:[#allocation11 + $0x60] sm:$0xff]  ;;  %v755_v44 = vld [vmem:[#allocation10 + $0x58] sm:$0xff]  ;;  %v754_v46 = vld [vmem:[#allocation10 + $0x50] sm:$0xff]  ;;  %s5430_s12 = sld [smem:[#allocation38_spill]]  ;;  %s3192_s9 = sshll.u32 %s667_s19, 4  ;;  %s5310_s9 = int_to_ptr.vmem [resolvable:$true] %s3192_s9 }
  0x93   : > { %679 = vadd.xlane.f32.xlu0 %v674_v2  ;;  %683 = vadd.xlane.f32.xlu1 %v676_v3  ;;  %v867_v45 = vld [vmem:[#allocation11 + $0x58] sm:$0xff]  ;;  %v866_v47 = vld [vmem:[#allocation11 + $0x50] sm:$0xff]  ;;  %v753_v48 = vld [vmem:[#allocation10 + $0x48] sm:$0xff]  ;;  %s5431_s23 = sld [smem:[#allocation24_spill]]  ;;  %s3177_s15 = scalar_lea.sflag [#allocation7], %s4734_s7 }
  0x94   : > { %3694 = vmatpush3.msra.mxu1 %v871_v5  ;;  %3657 = vmatprep.subr.mxu0 %v758_v6  ;;  %v865_v49 = vld [vmem:[#allocation11 + $0x48] sm:$0xff]  ;;  %v752_v50 = vld [vmem:[#allocation10 + $0x40] sm:$0xff]  ;;  %v751_v52 = vld [vmem:[#allocation10 + $0x38] sm:$0xff]  ;;  %s5432_s14 = sld [smem:[#allocation39_spill]]  ;;  %s4469_s13 = smov [#allocation17]  }
  0x95   : > { %3695 = vmatprep.subr.mxu1 %v870_v7  ;;  %3658 = vmatpush3.msra.mxu0 %v758_v6  ;;  %v864_v51 = vld [vmem:[#allocation11 + $0x40] sm:$0xff]  ;;  %v863_v53 = vld [vmem:[#allocation11 + $0x38] sm:$0xff]  ;;  %v750_v54 = vld [vmem:[#allocation10 + $0x30] sm:$0xff]  ;;  %s4364_s24 = sshll.u32 %s4469_s13, 4  ;;  %s4365_s24 = int_to_ptr.vmem [resolvable:$false] %s4364_s24 }
  0x96   : > { %3696 = vmatpush3.msra.mxu1 %v870_v7  ;;  %3659 = vmatprep.subr.mxu0 %v757_v8  ;;  %v862_v55 = vld [vmem:[#allocation11 + $0x30] sm:$0xff]  ;;  %v749_v56 = vld [vmem:[#allocation10 + $0x28] sm:$0xff]  ;;  %v748_v58 = vld [vmem:[#allocation10 + $0x20] sm:$0xff]  ;;  %p4367_p10 = scmp.lt.s32.totalorder %s5310_s9, %s4365_s24 }
  0x97   : > { %974 = vadd.xlane.f32.xlu0 %v673_v0  ;;  %976 = vadd.xlane.f32.xlu1 %v674_v2  ;;  %v861_v57 = vld [vmem:[#allocation11 + $0x28] sm:$0xff]  ;;  %v860_v59 = vld [vmem:[#allocation11 + $0x20] sm:$0xff]  ;;  %v747_v60 = vld [vmem:[#allocation10 + $0x18] sm:$0xff] }
  0x98   : > { %3660 = vmatpush3.msra.mxu0 %v757_v8  ;;  %3697 = vmatprep.subr.mxu1 %v869_v39  ;;  %v859_v61 = vld [vmem:[#allocation11 + $0x18] sm:$0xff]  ;;  %v746_v62 = vld [vmem:[#allocation10 + $0x10] sm:$0xff] }
  0x99   : > { %3661 = vmatprep.subr.mxu0 %v756_v41  ;;  %3698 = vmatpush3.msra.mxu1 %v869_v39  ;;  %v858_v63 = vld [vmem:[#allocation11 + $0x10] sm:$0xff]  ;;  %v1056_v4 = vld [vmem:[#allocation8 + $0x78] sm:$0xff] }
  0x9a   : > { %3662 = vmatpush3.msra.mxu0 %v756_v41  ;;  %3699 = vmatprep.subr.mxu1 %v868_v42 }
  0x9b   : > { %978 = vadd.xlane.f32.xlu0 %v675_v1  ;;  %980 = vadd.xlane.f32.xlu1 %v676_v3 }
  0x9c   : > { %3663 = vmatprep.subr.mxu0 %v755_v44  ;;  %3700 = vmatpush3.msra.mxu1 %v868_v42 }
  0x9d   : > { %3664 = vmatpush3.msra.mxu0 %v755_v44  ;;  %3701 = vmatprep.subr.mxu1 %v867_v45 }
  0x9e   : > { %3665 = vmatprep.subr.mxu0 %v754_v46  ;;  %3702 = vmatpush3.msra.mxu1 %v867_v45 }
  0x9f   : > { %3666 = vmatpush3.msra.mxu0 %v754_v46  ;;  %3703 = vmatprep.subr.mxu1 %v866_v47 }
  0xa0   : > { %3667 = vmatprep.subr.mxu0 %v753_v48  ;;  %3704 = vmatpush3.msra.mxu1 %v866_v47 }
  0xa1   : > { %3668 = vmatpush3.msra.mxu0 %v753_v48  ;;  %3705 = vmatprep.subr.mxu1 %v865_v49  ;;  %v1055_v48 = vld [vmem:[#allocation8 + $0x70] sm:$0xff] }
  0xa2   : > { %3669 = vmatprep.subr.mxu0 %v752_v50  ;;  %3706 = vmatpush3.msra.mxu1 %v865_v49 }
  0xa3   : > { %3670 = vmatpush3.msra.mxu0 %v752_v50  ;;  %3707 = vmatprep.subr.mxu1 %v864_v51  ;;  %v1054_v50 = vld [vmem:[#allocation8 + $0x68] sm:$0xff] }
  0xa4   : > { %3671 = vmatprep.subr.mxu0 %v751_v52  ;;  %3708 = vmatpush3.msra.mxu1 %v864_v51 }
  0xa5   : > { %3672 = vmatpush3.msra.mxu0 %v751_v52  ;;  %3709 = vmatprep.subr.mxu1 %v863_v53 }
  0xa6   : > { %3673 = vmatprep.subr.mxu0 %v750_v54  ;;  %3710 = vmatpush3.msra.mxu1 %v863_v53 }
  0xa7   : > { %3674 = vmatpush3.msra.mxu0 %v750_v54  ;;  %3711 = vmatprep.subr.mxu1 %v862_v55 }
  0xa8   : > { %3675 = vmatprep.subr.mxu0 %v749_v56  ;;  %3712 = vmatpush3.msra.mxu1 %v862_v55  ;;  %v1053_v55 = vld [vmem:[#allocation8 + $0x60] sm:$0xff] }
  0xa9   : > { %3676 = vmatpush3.msra.mxu0 %v749_v56  ;;  %3713 = vmatprep.subr.mxu1 %v861_v57  ;;  %v1052_v56 = vld [vmem:[#allocation8 + $0x58] sm:$0xff] }
  0xaa   : > { %3677 = vmatprep.subr.mxu0 %v748_v58  ;;  %3714 = vmatpush3.msra.mxu1 %v861_v57 }
  0xab   : > { %3678 = vmatpush3.msra.mxu0 %v748_v58  ;;  %3715 = vmatprep.subr.mxu1 %v860_v59  ;;  %v1051_v58 = vld [vmem:[#allocation8 + $0x50] sm:$0xff] }
  0xac   : > { %3679 = vmatprep.subr.mxu0 %v747_v60  ;;  %3716 = vmatpush3.msra.mxu1 %v860_v59  ;;  %v1050_v59 = vld [vmem:[#allocation8 + $0x48] sm:$0xff] }
  0xad   : > { %3680 = vmatpush3.msra.mxu0 %v747_v60  ;;  %3717 = vmatprep.subr.mxu1 %v859_v61  ;;  %v1049_v60 = vld [vmem:[#allocation8 + $0x40] sm:$0xff] }
  0xae   : > { %3681 = vmatprep.subr.mxu0 %v746_v62  ;;  %3718 = vmatpush3.msra.mxu1 %v859_v61  ;;  %v1048_v61 = vld [vmem:[#allocation8 + $0x38] sm:$0xff] }
  0xaf   : > { %3682 = vmatpush3.msra.mxu0 %v746_v62  ;;  %3719 = vmatprep.subr.mxu1 %v858_v63  ;;  %v1047_v62 = vld [vmem:[#allocation8 + $0x30] sm:$0xff] }
  0xb0   : > { %3720 = vmatpush3.msra.mxu1 %v858_v63  ;;  %v1046_v63 = vld [vmem:[#allocation8 + $0x28] sm:$0xff] }
 0x118   : > { %v678_v9 = vpop.xlane.xlu0 %677  ;;  %v682_v10 = vpop.xlane.xlu1 %681 }
 0x119   : > { %v686_v11 = vmul.f32 0.0078125, %v678_v9  ;;  %v688_v12 = vmul.f32 0.0078125, %v682_v10 }
 0x11b   : > { %v4762_v13 = vsub.f32 %v673_v0, %v686_v11  ;;  %v4764_v14 = vsub.f32 %v675_v1, %v688_v12 }
 0x11c   : > { %v680_v15 = vpop.xlane.xlu0 %679  ;;  %v684_v16 = vpop.xlane.xlu1 %683 }
 0x11d   : > { %v687_v17 = vmul.f32 0.0078125, %v680_v15  ;;  %v694_v18 = vmul.f32 %v4762_v13, %v4762_v13  ;;  %v689_v19 = vmul.f32 0.0078125, %v684_v16  ;;  %v696_v20 = vmul.f32 %v4764_v14, %v4764_v14 }
 0x11f   : > { %698 = vadd.xlane.f32.xlu0 %v694_v18  ;;  %v4770_v21 = vsub.f32 %v674_v2, %v687_v17  ;;  %v4772_v22 = vsub.f32 %v676_v3, %v689_v19 }
 0x120   : > { %v975_v23 = vpop.xlane.xlu0 %974  ;;  %v977_v24 = vpop.xlane.xlu1 %976 }
 0x121   : > { %v983_v25 = vmul.f32 0.0078125, %v975_v23  ;;  %v695_v26 = vmul.f32 %v4770_v21, %v4770_v21  ;;  %v984_v27 = vmul.f32 0.0078125, %v977_v24  ;;  %v697_v28 = vmul.f32 %v4772_v22, %v4772_v22 }
 0x123   : > { %702 = vadd.xlane.f32.xlu0 %v696_v20  ;;  %700 = vadd.xlane.f32.xlu1 %v695_v26  ;;  %v4778_v29 = vsub.f32 %v673_v0, %v983_v25  ;;  %v4780_v30 = vsub.f32 %v674_v2, %v984_v27  ;;  %v745_v0 = vld [vmem:[#allocation10 + $0x8] sm:$0xff]  ;;  %v744_v2 = vld [vmem:[#allocation10] sm:$0xff] }
 0x124   : > { %v979_v31 = vpop.xlane.xlu0 %978  ;;  %v981_v32 = vpop.xlane.xlu1 %980  ;;  %3683 = vmatprep.subr.mxu0 %v745_v0  ;;  %v4797_v25 = vld [vmem:[%s5427_s30] ss:$0 sm:$0xff]  ;;  %s5428_s30 = sld [smem:[#allocation34_spill]] }
 0x125   : > { %v985_v33 = vmul.f32 0.0078125, %v979_v31  ;;  %v991_v34 = vmul.f32 %v4778_v29, %v4778_v29  ;;  %v986_v35 = vmul.f32 0.0078125, %v981_v32  ;;  %v992_v38 = vmul.f32 %v4780_v30, %v4780_v30  ;;  %3684 = vmatpush3.msra.mxu0 %v745_v0  ;;  %v4803_v27 = vld [vmem:[%s5366_s2] ss:$0 sm:$0xff] }
 0x126   : > { %3685 = vmatprep.subr.mxu0 %v744_v2 }
 0x127   : > { %v4784_v36 = vsub.f32 %v675_v1, %v985_v33  ;;  %704 = vadd.xlane.f32.xlu1 %v697_v28  ;;  %995 = vadd.xlane.f32.xlu0 %v991_v34  ;;  %v4786_v37 = vsub.f32 %v676_v3, %v986_v35  ;;  %v857_v1 = vld [vmem:[#allocation11 + $0x8] sm:$0xff]  ;;  %v856_v3 = vld [vmem:[#allocation11] sm:$0xff] }
 0x128   : > { %3721 = vmatprep.subr.mxu1 %v857_v1  ;;  %3686 = vmatpush3.msra.mxu0 %v744_v2 }
 0x129   : > { %v993_v40 = vmul.f32 %v4784_v36, %v4784_v36  ;;  %v994_v43 = vmul.f32 %v4786_v37, %v4786_v37  ;;  %3722 = vmatpush3.msra.mxu1 %v857_v1  ;;  %3731 = vmatprep.subr.mxu0 %v1056_v4  ;;  %v1045_v1 = vld [vmem:[#allocation8 + $0x20] sm:$0xff] }
 0x12a   : > { %3723 = vmatprep.subr.mxu1 %v856_v3 }
 0x12b   : > { %997 = vadd.xlane.f32.xlu1 %v992_v38  ;;  %999 = vadd.xlane.f32.xlu0 %v993_v40 }
 0x12c   : > { %3724 = vmatpush3.msra.mxu1 %v856_v3  ;;  %v1044_v3 = vld [vmem:[#allocation8 + $0x18] sm:$0xff] }
 0x12f   : > { %1001 = vadd.xlane.f32.xlu1 %v994_v43 }
 0x1a8   : > { %v699_v5 = vpop.xlane.xlu0 %698 }
 0x1a9   : > { %v706_v6 = vmul.f32 0.0078125, %v699_v5 }
 0x1ab   : > { %v710_v7 = vadd.f32 1e-05, %v706_v6  ;;  %v1043_v6 = vld [vmem:[#allocation8 + $0x10] sm:$0xff] }
 0x1ac   : > { %v701_v8 = vpop.xlane.xlu1 %700  ;;  %v703_v9 = vpop.xlane.xlu0 %702 }
 0x1ad   : > { %4052 = vrsqrt.f32 %v710_v7  ;;  %v707_v10 = vmul.f32 0.0078125, %v701_v8  ;;  %v708_v11 = vmul.f32 0.0078125, %v703_v9  ;;  %v1042_v8 = vld [vmem:[#allocation8 + $0x8] sm:$0xff] }
 0x1af   : > { %v711_v12 = vadd.f32 1e-05, %v707_v10  ;;  %v712_v15 = vadd.f32 1e-05, %v708_v11  ;;  %v1041_v11 = vld [vmem:[#allocation8] sm:$0xff] }
 0x1b0   : > { %v705_v16 = vpop.xlane.xlu1 %704  ;;  %v996_v17 = vpop.xlane.xlu0 %995 }
 0x1b1   : > { %4054 = vrsqrt.f32 %v711_v12  ;;  %v709_v18 = vmul.f32 0.0078125, %v705_v16  ;;  %v1003_v19 = vmul.f32 0.0078125, %v996_v17 }
 0x1b2   : > { %4056 = vrsqrt.f32 %v712_v15 }
 0x1b3   : > { %v713_v20 = vadd.f32 1e-05, %v709_v18  ;;  %v1007_v23 = vadd.f32 1e-05, %v1003_v19  ;;  %v3359_v18 = vld [vmem:[%s5370_s6] ss:$0 sm:$0xff] }
 0x1b4   : > { %v998_v32 = vpop.xlane.xlu1 %997  ;;  %v1000_v39 = vpop.xlane.xlu0 %999 }
 0x1b5   : > { %4058 = vrsqrt.f32 %v713_v20  ;;  %v1004_v43 = vmul.f32 0.0078125, %v998_v32  ;;  %v1005_v46 = vmul.f32 0.0078125, %v1000_v39  ;;  %v3360_v32 = vld [vmem:[%s5372_s8] ss:$0 sm:$0xff] }
 0x1b6   : > { %4060 = vrsqrt.f32 %v1007_v23 }
 0x1b7   : > { %v1008_v52 = vadd.f32 1e-05, %v1004_v43  ;;  %v1009_v54 = vadd.f32 1e-05, %v1005_v46 }
 0x1b8   : > { %v1002_v47 = vpop.xlane.xlu1 %1001 }
 0x1b9   : > { %v1006_v53 = vmul.f32 0.0078125, %v1002_v47  ;;  %4062 = vrsqrt.f32 %v1008_v52 }
 0x1ba   : > { %v4053_v24 = vpop.eup %4052  ;;  %4064 = vrsqrt.f32 %v1009_v54 }
 0x1bb   : > { %v718_v26 = vmul.f32 %v4053_v24, %v4762_v13  ;;  %v1010_v57 = vadd.f32 1e-05, %v1006_v53 }
 0x1bd   : > { %v729_v28 = vmul.f32 %v4797_v25, %v718_v26  ;;  %4066 = vrsqrt.f32 %v1010_v57 }
 0x1be   : > { %v4055_v31 = vpop.eup %4054 }
 0x1bf   : > { %v4057_v33 = vpop.eup %4056  ;;  %v740_v34 = vadd.f32 %v4803_v27, %v729_v28  ;;  %v719_v35 = vmul.f32 %v4055_v31, %v4770_v21 }
 0x1c0   : > { %v720_v38 = vmul.f32 %v4057_v33, %v4764_v14 }
 0x1c1   : > { %3687 = vmatprep.mubr.f32.mxu0 %v740_v34  ;;  %3725 = vmatprep.mubr.f32.mxu1 %v740_v34  ;;  %v730_v13 = vmul.f32 %v4797_v25, %v719_v35  ;;  %v3363_v34 = vld [vmem:[%s5368_s4] ss:$0 sm:$0xff] }
 0x1c2   : > { %v4059_v40 = vpop.eup %4058  ;;  %v731_v41 = vmul.f32 %v4797_v25, %v720_v38 }
 0x1c3   : > { %v4061_v42 = vpop.eup %4060  ;;  %v741_v44 = vadd.f32 %v4803_v27, %v730_v13  ;;  %v721_v45 = vmul.f32 %v4059_v40, %v4772_v22 }
 0x1c4   : > { %v742_v21 = vadd.f32 %v4803_v27, %v731_v41  ;;  %v1015_v14 = vmul.f32 %v4061_v42, %v4778_v29 }
 0x1c5   : > { %3688 = vmatmul.mubr.f32.vlgmr.msra.gmra.mxu0 %v741_v44  ;;  %3726 = vmatmul.mubr.f32.vlgmr.msra.gmra.mxu1 %v741_v44  ;;  %v732_v49 = vmul.f32 %v4797_v25, %v721_v45 }
 0x1c6   : > { %3732 = vmatpush3.msra.mxu0 %v1056_v4  ;;  %3690 = vmatprep.mubr.f32.mxu0 %v742_v21  ;;  %v1026_v51 = vmul.f32 %v4797_v25, %v1015_v14  ;;  %v4063_v0 = vpop.eup %4062 }
 0x1c7   : > { %3728 = vmatprep.mubr.f32.mxu1 %v742_v21  ;;  %3733 = vmatprep.subr.mxu0 %v1055_v48  ;;  %v743_v22 = vadd.f32 %v4803_v27, %v732_v49  ;;  %v4065_v2 = vpop.eup %4064  ;;  %v1016_v4 = vmul.f32 %v4063_v0, %v4780_v30 }
 0x1c8   : > { %3734 = vmatpush3.msra.mxu0 %v1055_v48  ;;  %v1037_v29 = vadd.f32 %v4803_v27, %v1026_v51  ;;  %v1017_v7 = vmul.f32 %v4065_v2, %v4784_v36 }
 0x1c9   : > { %3735 = vmatprep.subr.mxu0 %v1054_v50  ;;  %3691 = vmatmul.mubr.f32.gmra.mxu0 %v743_v22  ;;  %v1027_v9 = vmul.f32 %v4797_v25, %v1016_v4 }
 0x1ca   : > { %3729 = vmatmul.mubr.f32.gmra.mxu1 %v743_v22  ;;  %3736 = vmatpush3.msra.mxu0 %v1054_v50  ;;  %v4067_v5 = vpop.eup %4066  ;;  %v1028_v12 = vmul.f32 %v4797_v25, %v1017_v7 }
 0x1cb   : > { %3737 = vmatprep.subr.mxu0 %v1053_v55  ;;  %3763 = vmatprep.mubr.f32.mxu0 %v1037_v29  ;;  %v1018_v10 = vmul.f32 %v4067_v5, %v4786_v37  ;;  %v1038_v30 = vadd.f32 %v4803_v27, %v1027_v9 }
 0x1cc   : > { %3738 = vmatpush3.msra.mxu0 %v1053_v55  ;;  %v1039_v36 = vadd.f32 %v4803_v27, %v1028_v12 }
 0x1cd   : > { %3739 = vmatprep.subr.mxu0 %v1052_v56  ;;  %v1029_v15 = vmul.f32 %v4797_v25, %v1018_v10 }
 0x1ce   : > { %3740 = vmatpush3.msra.mxu0 %v1052_v56 }
 0x1cf   : > { %3741 = vmatprep.subr.mxu0 %v1051_v58  ;;  %v1040_v16 = vadd.f32 %v4803_v27, %v1029_v15 }
 0x1d0   : > { %3742 = vmatpush3.msra.mxu0 %v1051_v58 }
 0x1d1   : > { %3743 = vmatprep.subr.mxu0 %v1050_v59 }
 0x1d2   : > { %3744 = vmatpush3.msra.mxu0 %v1050_v59 }
 0x1d3   : > { %3745 = vmatprep.subr.mxu0 %v1049_v60 }
 0x1d4   : > { %3746 = vmatpush3.msra.mxu0 %v1049_v60 }
 0x1d5   : > { %3747 = vmatprep.subr.mxu0 %v1048_v61 }
 0x1d6   : > { %3748 = vmatpush3.msra.mxu0 %v1048_v61 }
 0x1d7   : > { %3749 = vmatprep.subr.mxu0 %v1047_v62 }
 0x1d8   : > { %3750 = vmatpush3.msra.mxu0 %v1047_v62 }
 0x1d9   : > { %3751 = vmatprep.subr.mxu0 %v1046_v63 }
 0x1da   : > { %3752 = vmatpush3.msra.mxu0 %v1046_v63 }
 0x1db   : > { %3753 = vmatprep.subr.mxu0 %v1045_v1 }
 0x1dc   : > { %3754 = vmatpush3.msra.mxu0 %v1045_v1 }
 0x1dd   : > { %3755 = vmatprep.subr.mxu0 %v1044_v3 }
 0x1de   : > { %3756 = vmatpush3.msra.mxu0 %v1044_v3 }
 0x1df   : > { %3757 = vmatprep.subr.mxu0 %v1043_v6 }
 0x1e0   : > { %3758 = vmatpush3.msra.mxu0 %v1043_v6 }
 0x1e1   : > { %3759 = vmatprep.subr.mxu0 %v1042_v8 }
 0x1e2   : > { %3760 = vmatpush3.msra.mxu0 %v1042_v8 }
 0x1e3   : > { %3761 = vmatprep.subr.mxu0 %v1041_v11 }
 0x1e4   : > { %3762 = vmatpush3.msra.mxu0 %v1041_v11 }
 0x1e5   : > { %3764 = vmatmul.mubr.f32.vlgmr.msra.gmra.mxu0 %v1038_v30 }
 0x1e6   : > { %3766 = vmatprep.mubr.f32.mxu0 %v1039_v36 }
 0x1e9   : > { %3767 = vmatmul.mubr.f32.gmra.mxu0 %v1040_v16 }
 0x285   : > { %v3689_v37 = vpop.f32.mrf.mxu0  ;;  %v3727_v25 = vpop.f32.mrf.mxu1 }
 0x286   : > { %v4841_v26 = vadd.f32 %v3689_v37, %v3359_v18  ;;  %v4877_v48 = vadd.f32 %v3727_v25, %v3360_v32 }
 0x287   : > { %v833_v17 = vpop.f32.mrf.mxu0  ;;  %v945_v27 = vpop.f32.mrf.mxu1 }
 0x288   : > { %v4847_v28 = vadd.f32 %v3359_v18, %v833_v17  ;;  %v4885_v49 = vadd.f32 %v3360_v32, %v945_v27 }
 0x289   : > { %v3692_v19 = vpop.f32.mrf.mxu0 }
 0x28a   : > { %v4831_v20 = vadd.f32 %v3692_v19, %v3359_v18  ;;  %v3730_v31 = vpop.f32.mrf.mxu1 }
 0x28b   : > { %v843_v23 = vpop.f32.mrf.mxu0  ;;  %v4856_v33 = vadd.f32 %v3730_v31, %v3360_v32 }
 0x28c   : > { %v4833_v24 = vadd.f32 %v3359_v18, %v843_v23  ;;  %3769 = vmatprep.subr.msk.mxu1 %vm1157_vm0, %v4831_v20  ;;  %v955_v41 = vpop.f32.mrf.mxu1 }
 0x28d   : > { %3770 = vmatpush3.xpose.msk.msra.mxu1 %vm1157_vm0, %v4831_v20  ;;  %v4870_v47 = vadd.f32 %v3360_v32, %v955_v41 }
 0x28e   : > { %3771 = vmatprep.subr.msk.mxu1 %vm1157_vm0, %v4833_v24 }
 0x291   : > { %3772 = vmatpush3.xpose.msk.msra.mxu1 %vm1157_vm0, %v4833_v24 }
 0x292   : > { %3773 = vmatprep.subr.msk.mxu1 %vm1157_vm0, %v4841_v26 }
 0x295   : > { %3774 = vmatpush3.xpose.msk.msra.mxu1 %vm1157_vm0, %v4841_v26 }
 0x296   : > { %3775 = vmatprep.subr.msk.mxu1 %vm1157_vm0, %v4847_v28 }
 0x299   : > { %3776 = vmatpush3.xpose.msk.msra.mxu1 %vm1157_vm0, %v4847_v28 }
 0x29a   : > { %3783 = vmatprep.subr.mxu1 %v4856_v33 }
 0x2a5   : > { %v3765_v35 = vpop.f32.mrf.mxu0 }
 0x2a6   : > { %v1136_v38 = vadd.f32 %v3765_v35, %v3363_v34 }
 0x2a7   : > { %v1130_v39 = vpop.f32.mrf.mxu0 }
 0x2a8   : > { %v1131_v13 = vadd.f32 %v3363_v34, %v1130_v39  ;;  %v4866_v43 = vmul.f32 0.17677669, %v1136_v38 }
 0x2a9   : > { %v3768_v40 = vpop.f32.mrf.mxu0 }
 0x2aa   : > { %v4864_v42 = vmul.f32 0.17677669, %v1131_v13  ;;  %v1146_v44 = vadd.f32 %v3768_v40, %v3363_v34 }
 0x2ab   : > { %v1140_v45 = vpop.f32.mrf.mxu0 }
 0x2ac   : > { %v1141_v46 = vadd.f32 %v3363_v34, %v1140_v45  ;;  %3777 = vmatprep.mubr.msk.f32.mxu1 %vm1157_vm0, %v4864_v42  ;;  %v4879_v14 = vmul.f32 0.17677669, %v1146_v44 }
 0x2ad   : > { %3778 = vmatmul.mubr.msk.f32.vlgmr.msra.gmra.mxu1 %vm1157_vm0, %v4866_v43 }
 0x2ae   : > { %v4874_v21 = vmul.f32 0.17677669, %v1141_v46  ;;  %3784 = vmatpush3.msra.mxu1 %v4856_v33 }
 0x2af   : > { %3785 = vmatprep.subr.mxu1 %v4870_v47 }
 0x2b0   : > { %3786 = vmatpush3.msra.mxu1 %v4870_v47  ;;  %3780 = vmatprep.mubr.msk.f32.mxu1 %vm1157_vm0, %v4874_v21 }
 0x2b1   : > { %3787 = vmatprep.subr.mxu1 %v4877_v48  ;;  %3781 = vmatmul.mubr.msk.f32.gmra.mxu1 %vm1157_vm0, %v4879_v14 }
 0x2b2   : > { %3788 = vmatpush3.msra.mxu1 %v4877_v48 }
 0x2b3   : > { %3789 = vmatprep.subr.mxu1 %v4885_v49 }
 0x2b4   : > { %3790 = vmatpush3.msra.mxu1 %v4885_v49 }
 0x36d   : > { %v3779_v50 = vpop.f32.mrf.mxu1 }
 0x36e   : > { %v1270_v51 = vsel %vm1157_vm0, %v3779_v50, -inf }
 0x36f   : > { %1271 = vmax.xlane.f32.xlu1 %v1270_v51  ;;  %v1248_v52 = vpop.f32.mrf.mxu1 }
 0x370   : > { %v1267_v53 = vsel %vm1157_vm0, %v1248_v52, -inf }
 0x371   : > { %1268 = vmax.xlane.f32.xlu0 %v1267_v53  ;;  %v3782_v22 = vpop.f32.mrf.mxu1 }
 0x372   : > { %v1276_v54 = vsel %vm1157_vm0, %v3782_v22, -inf }
 0x373   : > { %1277 = vmax.xlane.f32.xlu1 %v1276_v54  ;;  %v1258_v55 = vpop.f32.mrf.mxu1 }
 0x374   : > { %v1273_v29 = vsel %vm1157_vm0, %v1258_v55, -inf }
 0x375   : > { %1274 = vmax.xlane.f32.xlu0 %v1273_v29 }
 0x3f8   : > { %v1272_v56 = vpop.xlane.xlu1 %1271 }
 0x3f9   : > { %v1280_v57 = vsub.f32 %v3779_v50, %v1272_v56 }
 0x3fa   : > { %v1269_v58 = vpop.xlane.xlu0 %1268 }
 0x3fb   : > { %v1285_v59 = vmul.f32 1.442695, %v1280_v57  ;;  %v1279_v60 = vsub.f32 %v1248_v52, %v1269_v58 }
 0x3fc   : > { %v1278_v4 = vpop.xlane.xlu1 %1277 }
 0x3fd   : > { %4068 = vpow2.f32 %v1285_v59  ;;  %v1283_v61 = vmul.f32 1.442695, %v1279_v60  ;;  %v1282_v6 = vsub.f32 %v3782_v22, %v1278_v4 }
 0x3fe   : > { %v1275_v2 = vpop.xlane.xlu0 %1274 }
 0x3ff   : > { %4070 = vpow2.f32 %v1283_v61  ;;  %v1281_v3 = vsub.f32 %v1258_v55, %v1275_v2  ;;  %v1289_v7 = vmul.f32 1.442695, %v1282_v6 }
 0x401   : > { %v1287_v5 = vmul.f32 1.442695, %v1281_v3 }
 0x403   : > { %4072 = vpow2.f32 %v1287_v5 }
 0x404   : > { %4074 = vpow2.f32 %v1289_v7 }
 0x40a   : > { %v4069_v62 = vpop.eup %4068 }
 0x40b   : > { %v1294_v63 = vsel %vm1157_vm0, %v4069_v62, 0.0 }
 0x40c   : > { %v4071_v0 = vpop.eup %4070  ;;  %1295 = vadd.xlane.f32.xlu1 %v1294_v63 }
 0x40d   : > { %v1291_v1 = vsel %vm1157_vm0, %v4071_v0, 0.0 }
 0x40e   : > { %1292 = vadd.xlane.f32.xlu0 %v1291_v1 }
 0x410   : > { %v4073_v8 = vpop.eup %4072 }
 0x411   : > { %v1297_v9 = vsel %vm1157_vm0, %v4073_v8, 0.0  ;;  %v4075_v10 = vpop.eup %4074 }
 0x412   : > { %v1300_v11 = vsel %vm1157_vm0, %v4075_v10, 0.0 }
 0x41d   : > { %1436 = vrot.lane.b32.xlu1 %v4833_v24, %s4465_s27 }
 0x421   : > { %1434 = vrot.lane.b32.xlu1 %v4841_v26, %s4465_s27 }
 0x424   : > { %1438 = vrot.lane.b32.xlu0 %v4831_v20, %s4465_s27 }
 0x425   : > { %1432 = vrot.lane.b32.xlu1 %v4847_v28, %s4465_s27 }
 0x443   : > { %1298 = vadd.xlane.f32.xlu0 %v1297_v9 }
 0x449   : > { %1301 = vadd.xlane.f32.xlu1 %v1300_v11 }
 0x459   : > { %1420 = vrot.lane.b32.xlu0 %v4864_v42, %s4465_s27 }
 0x45a   : > { %1745 = vrot.lane.b32.xlu1 %v4831_v20, %s4466_s3 }
 0x45d   : > { %1422 = vrot.lane.b32.xlu0 %v4866_v43, %s4465_s27 }
 0x45e   : > { %1743 = vrot.lane.b32.xlu1 %v4833_v24, %s4466_s3 }
 0x461   : > { %1741 = vrot.lane.b32.xlu0 %v4841_v26, %s4466_s3 }
 0x462   : > { %1424 = vrot.lane.b32.xlu1 %v4874_v21, %s4465_s27 }
 0x465   : > { %1426 = vrot.lane.b32.xlu0 %v4879_v14, %s4465_s27 }
 0x466   : > { %1739 = vrot.lane.b32.xlu1 %v4847_v28, %s4466_s3 }
 0x469   : > { %1727 = vrot.lane.b32.xlu0 %v4864_v42, %s4466_s3 }
 0x46a   : > { %1729 = vrot.lane.b32.xlu1 %v4866_v43, %s4466_s3 }
 0x46d   : > { %1731 = vrot.lane.b32.xlu0 %v4874_v21, %s4466_s3 }
 0x46e   : > { %1733 = vrot.lane.b32.xlu1 %v4879_v14, %s4466_s3 }
 0x495   : > { %v1296_v12 = vpop.xlane.xlu1 %1295 }
 0x496   : > { %4076 = vrcp.f32 %v1296_v12 }
 0x497   : > { %v1293_v30 = vpop.xlane.xlu0 %1292 }
 0x498   : > { %4078 = vrcp.f32 %v1293_v30 }
 0x499   : > { %v1437_v37 = vpop.permute.xlu1 %1436 }
 0x49b   : > { %v1439_v15 = vpop.permute.xlu0 %1438 }
 0x49c   : > { %3797 = vmatprep.subr.msk.mxu1 %vm1157_vm0, %v1439_v15 }
 0x49d   : > { %v1435_v19 = vpop.permute.xlu1 %1434 }
 0x4a1   : > { %v1433_v23 = vpop.permute.xlu1 %1432 }
 0x4a3   : > { %v4077_v36 = vpop.eup %4076 }
 0x4a4   : > { %v1306_v18 = vmul.f32 %v4077_v36, %v4069_v62 }
 0x4a5   : > { %v4079_v16 = vpop.eup %4078 }
 0x4a6   : > { %v1304_v17 = vmul.f32 %v4079_v16, %v4071_v0 }
 0x4a8   : > { %3791 = vmatprep.mubr.msk.f32.mxu1 %vm1157_vm0, %v1304_v17 }
 0x4a9   : > { %3792 = vmatmul.mubr.msk.f32.vlgmr.msra.gmra.mxu1 %vm1157_vm0, %v1306_v18 }
 0x4aa   : > { %3798 = vmatpush3.xpose.msk.msra.mxu1 %vm1157_vm0, %v1439_v15 }
 0x4ab   : > { %3799 = vmatprep.subr.msk.mxu1 %vm1157_vm0, %v1437_v37 }
 0x4ae   : > { %3800 = vmatpush3.xpose.msk.msra.mxu1 %vm1157_vm0, %v1437_v37 }
 0x4af   : > { %3801 = vmatprep.subr.msk.mxu1 %vm1157_vm0, %v1435_v19 }
 0x4b2   : > { %3802 = vmatpush3.xpose.msk.msra.mxu1 %vm1157_vm0, %v1435_v19 }
 0x4b3   : > { %3803 = vmatprep.subr.msk.mxu1 %vm1157_vm0, %v1433_v23 }
 0x4b6   : > { %3804 = vmatpush3.xpose.msk.msra.mxu1 %vm1157_vm0, %v1433_v23 }
 0x4cc   : > { %v1299_v25 = vpop.xlane.xlu0 %1298 }
 0x4cd   : > { %4080 = vrcp.f32 %v1299_v25 }
 0x4d0   : > { %v1421_v31 = vpop.permute.xlu0 %1420 }
 0x4d2   : > { %v1302_v27 = vpop.xlane.xlu1 %1301 }
 0x4d3   : > { %4082 = vrcp.f32 %v1302_v27 }
 0x4d4   : > { %v1423_v34 = vpop.permute.xlu0 %1422 }
 0x4d6   : > { %v1746_v32 = vpop.permute.xlu1 %1745 }
 0x4d7   : > { %3825 = vmatprep.subr.msk.mxu1 %vm1157_vm0, %v1746_v32 }
 0x4d8   : > { %v1742_v39 = vpop.permute.xlu0 %1741 }
 0x4da   : > { %v4081_v35 = vpop.eup %4080  ;;  %v1744_v40 = vpop.permute.xlu1 %1743 }
 0x4db   : > { %v1308_v38 = vmul.f32 %v4081_v35, %v4073_v8 }
 0x4dc   : > { %v1427_v44 = vpop.permute.xlu0 %1426 }
 0x4dd   : > { %3794 = vmatprep.mubr.msk.f32.mxu1 %vm1157_vm0, %v1308_v38 }
 0x4de   : > { %v1425_v45 = vpop.permute.xlu1 %1424 }
 0x4e0   : > { %v4083_v13 = vpop.eup %4082  ;;  %v1728_v46 = vpop.permute.xlu0 %1727 }
 0x4e1   : > { %v1310_v41 = vmul.f32 %v4083_v13, %v4075_v10 }
 0x4e2   : > { %v1740_v50 = vpop.permute.xlu1 %1739 }
 0x4e3   : > { %3795 = vmatmul.mubr.msk.f32.gmra.mxu1 %vm1157_vm0, %v1310_v41 }
 0x4e4   : > { %3805 = vmatprep.mubr.msk.f32.mxu1 %vm1157_vm0, %v1421_v31  ;;  %v1732_v52 = vpop.permute.xlu0 %1731 }
 0x4e6   : > { %v1730_v51 = vpop.permute.xlu1 %1729 }
 0x4e7   : > { %3806 = vmatmul.mubr.msk.f32.vlgmr.msra.gmra.mxu1 %vm1157_vm0, %v1423_v34 }
 0x4e8   : > { %3826 = vmatpush3.xpose.msk.msra.mxu1 %vm1157_vm0, %v1746_v32  ;;  %3808 = vmatprep.mubr.msk.f32.mxu1 %vm1157_vm0, %v1425_v45 }
 0x4e9   : > { %3827 = vmatprep.subr.msk.mxu1 %vm1157_vm0, %v1744_v40 }
 0x4ea   : > { %v1734_v53 = vpop.permute.xlu1 %1733 }
 0x4eb   : > { %3809 = vmatmul.mubr.msk.f32.gmra.mxu1 %vm1157_vm0, %v1427_v44 }
 0x4ec   : > { %3828 = vmatpush3.xpose.msk.msra.mxu1 %vm1157_vm0, %v1744_v40  ;;  %3833 = vmatprep.mubr.msk.f32.mxu1 %vm1157_vm0, %v1728_v46 }
 0x4ed   : > { %3829 = vmatprep.subr.msk.mxu1 %vm1157_vm0, %v1742_v39 }
 0x4f0   : > { %3830 = vmatpush3.xpose.msk.msra.mxu1 %vm1157_vm0, %v1742_v39 }
 0x4f1   : > { %3831 = vmatprep.subr.msk.mxu1 %vm1157_vm0, %v1740_v50 }
 0x4f4   : > { %3832 = vmatpush3.xpose.msk.msra.mxu1 %vm1157_vm0, %v1740_v50 }
 0x4f7   : > { %3834 = vmatmul.mubr.msk.f32.vlgmr.msra.gmra.mxu1 %vm1157_vm0, %v1730_v51 }
 0x4f8   : > { %3836 = vmatprep.mubr.msk.f32.mxu1 %vm1157_vm0, %v1732_v52 }
 0x4fb   : > { %3837 = vmatmul.mubr.msk.f32.gmra.mxu1 %vm1157_vm0, %v1734_v53 }
 0x569   : > { %v3793_v22 = vpop.f32.mrf.mxu1 }
 0x56a   : > { %1413 = vst.msk [vmem:[#allocation4 + $0x8] sm:$0xff] %vm1157_vm0, %v3793_v22 }
 0x56b   : > { %v1393_v54 = vpop.f32.mrf.mxu1 }
 0x56c   : > { %1412 = vst.msk [vmem:[#allocation4] sm:$0xff] %vm1157_vm0, %v1393_v54 }
 0x5a3   : > { %v3796_v55 = vpop.f32.mrf.mxu1 }
 0x5a4   : > { %1415 = vst.msk [vmem:[#allocation4 + $0x18] sm:$0xff] %vm1157_vm0, %v3796_v55 }
 0x5a5   : > { %v1403_v29 = vpop.f32.mrf.mxu1 }
 0x5a6   : > { %1414 = vst.msk [vmem:[#allocation4 + $0x10] sm:$0xff] %vm1157_vm0, %v1403_v29 }
 0x5a7   : > { %v4965_v56 = vpop.f32.mrf.mxu1 }
 0x5a9   : > { %v4967_v57 = vpop.f32.mrf.mxu1 }
 0x5ab   : > { %v4969_v58 = vpop.f32.mrf.mxu1 }
 0x5ad   : > { %v4971_v59 = vpop.f32.mrf.mxu1 }
 0x5b7   : > { %v3835_v60 = vpop.f32.mrf.mxu1 }
 0x5b8   : > { %v1851_v61 = vsel %vm1157_vm0, %v3835_v60, -inf }
 0x5b9   : > { %1852 = vmax.xlane.f32.xlu1 %v1851_v61  ;;  %v1829_v62 = vpop.f32.mrf.mxu1 }
 0x5ba   : > { %v1848_v63 = vsel %vm1157_vm0, %v1829_v62, -inf }
 0x5bb   : > { %1849 = vmax.xlane.f32.xlu0 %v1848_v63  ;;  %v3838_v0 = vpop.f32.mrf.mxu1 }
 0x5bc   : > { %v1857_v1 = vsel %vm1157_vm0, %v3838_v0, -inf }
 0x5bd   : > { %v1839_v2 = vpop.f32.mrf.mxu1 }
 0x5be   : > { %v1854_v3 = vsel %vm1157_vm0, %v1839_v2, -inf }
 0x5bf   : > { %1858 = vmax.xlane.f32.xlu0 %v1857_v1 }
 0x5c3   : > { %1855 = vmax.xlane.f32.xlu0 %v1854_v3 }
 0x5ca   : > { %1904 = vrot.lane.b32.xlu1 %v4870_v47, %s4466_s3 }
 0x5ce   : > { %1902 = vrot.lane.b32.xlu1 %v4877_v48, %s4466_s3 }
 0x5d2   : > { %1900 = vrot.lane.b32.xlu1 %v4885_v49, %s4466_s3 }
 0x5d9   : > { %1906 = vrot.lane.b32.xlu0 %v4856_v33, %s4466_s3 }
 0x642   : > { %v1853_v4 = vpop.xlane.xlu1 %1852 }
 0x643   : > { %v1861_v5 = vsub.f32 %v3835_v60, %v1853_v4 }
 0x644   : > { %v1850_v6 = vpop.xlane.xlu0 %1849 }
 0x645   : > { %v1866_v7 = vmul.f32 1.442695, %v1861_v5  ;;  %v1860_v8 = vsub.f32 %v1829_v62, %v1850_v6 }
 0x646   : > { %v1905_v11 = vpop.permute.xlu1 %1904 }
 0x647   : > { %4084 = vpow2.f32 %v1866_v7  ;;  %v1864_v9 = vmul.f32 1.442695, %v1860_v8 }
 0x648   : > { %v1859_v10 = vpop.xlane.xlu0 %1858 }
 0x649   : > { %4086 = vpow2.f32 %v1864_v9  ;;  %v1863_v19 = vsub.f32 %v3838_v0, %v1859_v10 }
 0x64a   : > { %v1903_v30 = vpop.permute.xlu1 %1902 }
 0x64b   : > { %v1870_v25 = vmul.f32 1.442695, %v1863_v19 }
 0x64c   : > { %v1856_v12 = vpop.xlane.xlu0 %1855 }
 0x64d   : > { %v1862_v23 = vsub.f32 %v1839_v2, %v1856_v12  ;;  %4088 = vpow2.f32 %v1870_v25 }
 0x64e   : > { %v1901_v17 = vpop.permute.xlu1 %1900 }
 0x64f   : > { %v1868_v27 = vmul.f32 1.442695, %v1862_v23 }
 0x650   : > { %v1907_v15 = vpop.permute.xlu0 %1906 }
 0x651   : > { %3839 = vmatprep.subr.mxu1 %v1907_v15  ;;  %4090 = vpow2.f32 %v1868_v27 }
 0x652   : > { %3840 = vmatpush3.msra.mxu1 %v1907_v15 }
 0x653   : > { %3841 = vmatprep.subr.mxu1 %v1905_v11 }
 0x654   : > { %v4085_v36 = vpop.eup %4084  ;;  %3842 = vmatpush3.msra.mxu1 %v1905_v11 }
 0x655   : > { %3843 = vmatprep.subr.mxu1 %v1903_v30  ;;  %v1875_v16 = vsel %vm1157_vm0, %v4085_v36, 0.0 }
 0x656   : > { %v4087_v37 = vpop.eup %4086  ;;  %1876 = vadd.xlane.f32.xlu1 %v1875_v16  ;;  %3844 = vmatpush3.msra.mxu1 %v1903_v30 }
 0x657   : > { %3845 = vmatprep.subr.mxu1 %v1901_v17  ;;  %v1872_v18 = vsel %vm1157_vm0, %v4087_v37, 0.0 }
 0x658   : > { %1873 = vadd.xlane.f32.xlu0 %v1872_v18  ;;  %3846 = vmatpush3.msra.mxu1 %v1901_v17 }
 0x65a   : > { %v4089_v31 = vpop.eup %4088 }
 0x65b   : > { %v1881_v34 = vsel %vm1157_vm0, %v4089_v31, 0.0 }
 0x65e   : > { %v4091_v32 = vpop.eup %4090 }
 0x65f   : > { %v1878_v35 = vsel %vm1157_vm0, %v4091_v32, 0.0 }
 0x667   : > { %2050 = vrot.lane.b32.xlu1 %v4833_v24, %s4467_s17  ;;  %v1541_v24 = vsel %vm1157_vm0, %v4967_v57, -inf }
 0x66e   : > { %2052 = vrot.lane.b32.xlu0 %v4831_v20, %s4467_s17  ;;  %v1544_v20 = vsel %vm1157_vm0, %v4965_v56, -inf }
 0x68b   : > { %1882 = vadd.xlane.f32.xlu1 %v1881_v34 }
 0x68d   : > { %1879 = vadd.xlane.f32.xlu0 %v1878_v35 }
 0x69c   : > { %2046 = vrot.lane.b32.xlu1 %v4847_v28, %s4467_s17  ;;  %v1550_v28 = vsel %vm1157_vm0, %v4969_v58, -inf }
 0x6a0   : > { %2036 = vrot.lane.b32.xlu1 %v4866_v43, %s4467_s17 }
 0x6a3   : > { %2048 = vrot.lane.b32.xlu0 %v4841_v26, %s4467_s17  ;;  %v1547_v26 = vsel %vm1157_vm0, %v4971_v59, -inf }
 0x6a4   : > { %2040 = vrot.lane.b32.xlu1 %v4879_v14, %s4467_s17 }
 0x6a7   : > { %2034 = vrot.lane.b32.xlu0 %v4864_v42, %s4467_s17 }
 0x6ab   : > { %2038 = vrot.lane.b32.xlu0 %v4874_v21, %s4467_s17 }
 0x6c8   : > { %1545 = vmax.xlane.f32.xlu1 %v1544_v20 }
 0x6ca   : > { %1542 = vmax.xlane.f32.xlu0 %v1541_v24 }
 0x6ce   : > { %1548 = vmax.xlane.f32.xlu0 %v1547_v26 }
 0x6d2   : > { %1551 = vmax.xlane.f32.xlu0 %v1550_v28 }
 0x6df   : > { %v1877_v42 = vpop.xlane.xlu1 %1876 }
 0x6e0   : > { %4092 = vrcp.f32 %v1877_v42 }
 0x6e1   : > { %v1874_v43 = vpop.xlane.xlu0 %1873 }
 0x6e2   : > { %4094 = vrcp.f32 %v1874_v43 }
 0x6e3   : > { %v2051_v40 = vpop.permute.xlu1 %2050 }
 0x6e5   : > { %v2053_v21 = vpop.permute.xlu0 %2052 }
 0x6e6   : > { %3853 = vmatprep.subr.msk.mxu1 %vm1157_vm0, %v2053_v21 }
 0x6ed   : > { %v4093_v14 = vpop.eup %4092 }
 0x6ee   : > { %v1887_v13 = vmul.f32 %v4093_v14, %v4085_v36 }
 0x6ef   : > { %v4095_v38 = vpop.eup %4094 }
 0x6f0   : > { %v1885_v39 = vmul.f32 %v4095_v38, %v4087_v37 }
 0x6f2   : > { %3847 = vmatprep.mubr.msk.f32.mxu1 %vm1157_vm0, %v1885_v39 }
 0x6f3   : > { %3848 = vmatmul.mubr.msk.f32.vlgmr.msra.gmra.mxu1 %vm1157_vm0, %v1887_v13 }
 0x6f4   : > { %3854 = vmatpush3.xpose.msk.msra.mxu1 %vm1157_vm0, %v2053_v21 }
 0x6f5   : > { %3855 = vmatprep.subr.msk.mxu1 %vm1157_vm0, %v2051_v40 }
 0x6f8   : > { %3856 = vmatpush3.xpose.msk.msra.mxu1 %vm1157_vm0, %v2051_v40 }
 0x714   : > { %v1883_v41 = vpop.xlane.xlu1 %1882 }
 0x715   : > { %4096 = vrcp.f32 %v1883_v41 }
 0x716   : > { %v1880_v44 = vpop.xlane.xlu0 %1879 }
 0x717   : > { %4098 = vrcp.f32 %v1880_v44 }
 0x718   : > { %v2047_v46 = vpop.permute.xlu1 %2046 }
 0x71a   : > { %v2049_v45 = vpop.permute.xlu0 %2048 }
 0x71b   : > { %3857 = vmatprep.subr.msk.mxu1 %vm1157_vm0, %v2049_v45 }
 0x71c   : > { %3858 = vmatpush3.xpose.msk.msra.mxu1 %vm1157_vm0, %v2049_v45  ;;  %v2037_v54 = vpop.permute.xlu1 %2036 }
 0x71d   : > { %3859 = vmatprep.subr.msk.mxu1 %vm1157_vm0, %v2047_v46 }
 0x71e   : > { %v2035_v53 = vpop.permute.xlu0 %2034 }
 0x720   : > { %3860 = vmatpush3.xpose.msk.msra.mxu1 %vm1157_vm0, %v2047_v46  ;;  %v2041_v29 = vpop.permute.xlu1 %2040 }
 0x722   : > { %v4097_v50 = vpop.eup %4096  ;;  %v2039_v55 = vpop.permute.xlu0 %2038 }
 0x723   : > { %v1891_v22 = vmul.f32 %v4097_v50, %v4089_v31 }
 0x724   : > { %v4099_v51 = vpop.eup %4098 }
 0x725   : > { %v1889_v52 = vmul.f32 %v4099_v51, %v4091_v32 }
 0x727   : > { %3850 = vmatprep.mubr.msk.f32.mxu1 %vm1157_vm0, %v1889_v52 }
 0x728   : > { %3851 = vmatmul.mubr.msk.f32.gmra.mxu1 %vm1157_vm0, %v1891_v22 }
 0x729   : > { %3861 = vmatprep.mubr.msk.f32.mxu1 %vm1157_vm0, %v2035_v53 }
 0x72c   : > { %3862 = vmatmul.mubr.msk.f32.vlgmr.msra.gmra.mxu1 %vm1157_vm0, %v2037_v54 }
 0x72d   : > { %3864 = vmatprep.mubr.msk.f32.mxu1 %vm1157_vm0, %v2039_v55 }
 0x730   : > { %3865 = vmatmul.mubr.msk.f32.gmra.mxu1 %vm1157_vm0, %v2041_v29 }
 0x751   : > { %v1546_v62 = vpop.xlane.xlu1 %1545 }
 0x752   : > { %v1554_v63 = vsub.f32 %v4965_v56, %v1546_v62 }
 0x753   : > { %v1543_v60 = vpop.xlane.xlu0 %1542 }
 0x754   : > { %v1553_v1 = vsub.f32 %v4967_v57, %v1543_v60  ;;  %v1559_v2 = vmul.f32 1.442695, %v1554_v63 }
 0x756   : > { %v1557_v5 = vmul.f32 1.442695, %v1553_v1  ;;  %4100 = vpow2.f32 %v1559_v2 }
 0x757   : > { %v1549_v61 = vpop.xlane.xlu0 %1548 }
 0x758   : > { %v1555_v6 = vsub.f32 %v4971_v59, %v1549_v61  ;;  %4102 = vpow2.f32 %v1557_v5 }
 0x75a   : > { %v1561_v9 = vmul.f32 1.442695, %v1555_v6 }
 0x75b   : > { %v1552_v0 = vpop.xlane.xlu0 %1551 }
 0x75c   : > { %v1556_v3 = vsub.f32 %v4969_v58, %v1552_v0 }
 0x75e   : > { %v1563_v7 = vmul.f32 1.442695, %v1556_v3 }
 0x760   : > { %4104 = vpow2.f32 %v1563_v7 }
 0x761   : > { %4106 = vpow2.f32 %v1561_v9 }
 0x763   : > { %v5044_v15 = vpop.eup %4100 }
 0x764   : > { %v1568_v17 = vsel %vm1157_vm0, %v5044_v15, 0.0 }
 0x765   : > { %v5047_v37 = vpop.eup %4102 }
 0x766   : > { %v1565_v19 = vsel %vm1157_vm0, %v5047_v37, 0.0 }
 0x76d   : > { %v5051_v18 = vpop.eup %4104 }
 0x76e   : > { %v5055_v23 = vpop.eup %4106  ;;  %v1574_v25 = vsel %vm1157_vm0, %v5051_v18, 0.0 }
 0x76f   : > { %v1571_v27 = vsel %vm1157_vm0, %v5055_v23, 0.0 }
 0x7b3   : > { %v5032_v4 = vpop.f32.mrf.mxu1 }
 0x7b5   : > { %v5035_v8 = vpop.f32.mrf.mxu1 }
 0x7e8   : > { %v5037_v10 = vpop.f32.mrf.mxu1 }
 0x7ea   : > { %v5039_v56 = vpop.f32.mrf.mxu1 }
 0x7ec   : > { %v3863_v57 = vpop.f32.mrf.mxu1 }
 0x7ed   : > { %v2158_v58 = vsel %vm1157_vm0, %v3863_v57, -inf }
 0x7ee   : > { %2159 = vmax.xlane.f32.xlu1 %v2158_v58  ;;  %v2136_v11 = vpop.f32.mrf.mxu1 }
 0x7ef   : > { %v2155_v12 = vsel %vm1157_vm0, %v2136_v11, -inf }
 0x7f0   : > { %2156 = vmax.xlane.f32.xlu0 %v2155_v12  ;;  %v3866_v59 = vpop.f32.mrf.mxu1 }
 0x7f1   : > { %v2164_v30 = vsel %vm1157_vm0, %v3866_v59, -inf }
 0x7f2   : > { %2165 = vmax.xlane.f32.xlu1 %v2164_v30  ;;  %v2146_v36 = vpop.f32.mrf.mxu1 }
 0x7f3   : > { %v2161_v16 = vsel %vm1157_vm0, %v2146_v36, -inf }
 0x7f4   : > { %2162 = vmax.xlane.f32.xlu0 %v2161_v16 }
 0x7f6   : > { %1569 = vadd.xlane.f32.xlu1 %v1568_v17 }
 0x7f8   : > { %1566 = vadd.xlane.f32.xlu0 %v1565_v19  ;;  %v2356_v19 = vld [vmem:[#allocation13 + $0x78] sm:$0xff] }
 0x7fa   : > { %1575 = vadd.xlane.f32.xlu1 %v1574_v25  ;;  %v2354_v25 = vld [vmem:[#allocation13 + $0x68] sm:$0xff] }
 0x7fc   : > { %1572 = vadd.xlane.f32.xlu0 %v1571_v27  ;;  %v2353_v27 = vld [vmem:[#allocation13 + $0x60] sm:$0xff] }
 0x80b   : > { %1597 = vrot.lane.b32.xlu1 %v4870_v47, %s4465_s27 }
 0x80f   : > { %1595 = vrot.lane.b32.xlu1 %v4877_v48, %s4465_s27 }
 0x812   : > { %1599 = vrot.lane.b32.xlu0 %v4856_v33, %s4465_s27 }
 0x813   : > { %1593 = vrot.lane.b32.xlu1 %v4885_v49, %s4465_s27 }
 0x816   : > { %2213 = vrot.lane.b32.xlu0 %v4856_v33, %s4467_s17 }
 0x817   : > { %2211 = vrot.lane.b32.xlu1 %v4870_v47, %s4467_s17 }
 0x877   : > { %v2160_v31 = vpop.xlane.xlu1 %2159 }
 0x878   : > { %v2168_v32 = vsub.f32 %v3863_v57, %v2160_v31  ;;  %v2351_v31 = vld [vmem:[#allocation13 + $0x50] sm:$0xff] }
 0x879   : > { %v2157_v34 = vpop.xlane.xlu0 %2156 }
 0x87a   : > { %v2173_v35 = vmul.f32 1.442695, %v2168_v32  ;;  %v2167_v20 = vsub.f32 %v2136_v11, %v2157_v34  ;;  %v2349_v32 = vld [vmem:[#allocation13 + $0x40] sm:$0xff]  ;;  %v2348_v34 = vld [vmem:[#allocation13 + $0x38] sm:$0xff] }
 0x87b   : > { %v2166_v24 = vpop.xlane.xlu1 %2165 }
 0x87c   : > { %4108 = vpow2.f32 %v2173_v35  ;;  %v2171_v26 = vmul.f32 1.442695, %v2167_v20  ;;  %v2170_v28 = vsub.f32 %v3866_v59, %v2166_v24  ;;  %v2347_v35 = vld [vmem:[#allocation13 + $0x30] sm:$0xff]  ;;  %v2346_v20 = vld [vmem:[#allocation13 + $0x28] sm:$0xff] }
 0x87d   : > { %v2163_v42 = vpop.xlane.xlu0 %2162 }
 0x87e   : > { %4110 = vpow2.f32 %v2171_v26  ;;  %v2177_v43 = vmul.f32 1.442695, %v2170_v28  ;;  %v2169_v21 = vsub.f32 %v2146_v36, %v2163_v42 }
 0x87f   : > { %v1570_v14 = vpop.xlane.xlu1 %1569 }
 0x880   : > { %4112 = vpow2.f32 %v2177_v43  ;;  %v2175_v38 = vmul.f32 1.442695, %v2169_v21 }
 0x881   : > { %4114 = vrcp.f32 %v1570_v14  ;;  %v1567_v33 = vpop.xlane.xlu0 %1566  ;;  %v2345_v14 = vld [vmem:[#allocation13 + $0x20] sm:$0xff] }
 0x882   : > { %4116 = vpow2.f32 %v2175_v38  ;;  %v2344_v38 = vld [vmem:[#allocation13 + $0x18] sm:$0xff] }
 0x883   : > { %4118 = vrcp.f32 %v1567_v33  ;;  %v1576_v47 = vpop.xlane.xlu1 %1575  ;;  %v2343_v33 = vld [vmem:[#allocation13 + $0x10] sm:$0xff] }
 0x884   : > { %4120 = vrcp.f32 %v1576_v47  ;;  %v2342_v47 = vld [vmem:[#allocation13 + $0x8] sm:$0xff] }
 0x885   : > { %v1573_v39 = vpop.xlane.xlu0 %1572 }
 0x886   : > { %4122 = vrcp.f32 %v1573_v39  ;;  %v2341_v39 = vld [vmem:[#allocation13] sm:$0xff] }
 0x887   : > { %v1598_v13 = vpop.permute.xlu1 %1597 }
 0x889   : > { %v4109_v40 = vpop.eup %4108  ;;  %v1600_v41 = vpop.permute.xlu0 %1599 }
 0x88a   : > { %3811 = vmatprep.subr.mxu0 %v1600_v41  ;;  %v2182_v44 = vsel %vm1157_vm0, %v4109_v40, 0.0 }
 0x88b   : > { %v4111_v45 = vpop.eup %4110  ;;  %2183 = vadd.xlane.f32.xlu1 %v2182_v44  ;;  %v1596_v46 = vpop.permute.xlu1 %1595  ;;  %3812 = vmatpush3.msra.mxu0 %v1600_v41 }
 0x88c   : > { %3813 = vmatprep.subr.mxu0 %v1598_v13  ;;  %v2179_v50 = vsel %vm1157_vm0, %v4111_v45, 0.0 }
 0x88d   : > { %v4113_v51 = vpop.eup %4112  ;;  %2180 = vadd.xlane.f32.xlu0 %v2179_v50  ;;  %3814 = vmatpush3.msra.mxu0 %v1598_v13  ;;  %v2214_v60 = vpop.permute.xlu0 %2213 }
 0x88e   : > { %v4115_v52 = vpop.eup %4114  ;;  %3815 = vmatprep.subr.mxu0 %v1596_v46  ;;  %v2188_v53 = vsel %vm1157_vm0, %v4113_v51, 0.0 }
 0x88f   : > { %v4117_v22 = vpop.eup %4116  ;;  %2189 = vadd.xlane.f32.xlu1 %v2188_v53  ;;  %v1594_v54 = vpop.permute.xlu1 %1593  ;;  %3816 = vmatpush3.msra.mxu0 %v1596_v46  ;;  %v1580_v63 = vmul.f32 %v4115_v52, %v5044_v15 }
 0x890   : > { %v4119_v55 = vpop.eup %4118  ;;  %3817 = vmatprep.subr.mxu0 %v1594_v54  ;;  %v2185_v29 = vsel %vm1157_vm0, %v4117_v22, 0.0 }
 0x891   : > { %2186 = vadd.xlane.f32.xlu0 %v2185_v29  ;;  %3818 = vmatpush3.msra.mxu0 %v1594_v54  ;;  %v1578_v61 = vmul.f32 %v4119_v55, %v5047_v37  ;;  %v4121_v62 = vpop.eup %4120  ;;  %v3412_v55 = vld [vmem:[%s5374_s10] ss:$0 sm:$0xff] }
 0x892   : > { %3867 = vmatprep.subr.mxu0 %v2214_v60  ;;  %v1584_v3 = vmul.f32 %v4121_v62, %v5051_v18  ;;  %v4172_v62 = vld [vmem:[%s4740_s28 + $0x8] sm:$0xff] }
 0x893   : > { %v4123_v0 = vpop.eup %4122  ;;  %3819 = vmatprep.mubr.msk.f32.mxu0 %vm1157_vm0, %v1578_v61  ;;  %v2212_v1 = vpop.permute.xlu1 %2211 }
 0x894   : > { %3820 = vmatmul.mubr.msk.f32.vlgmr.msra.gmra.mxu0 %vm1157_vm0, %v1580_v63  ;;  %v1582_v2 = vmul.f32 %v4123_v0, %v5055_v23  ;;  %v2355_v23 = vld [vmem:[#allocation13 + $0x70] sm:$0xff] }
 0x895   : > { %3868 = vmatpush3.msra.mxu0 %v2214_v60 }
 0x896   : > { %3869 = vmatprep.subr.mxu0 %v2212_v1  ;;  %3822 = vmatprep.mubr.msk.f32.mxu0 %vm1157_vm0, %v1582_v2 }
 0x897   : > { %3870 = vmatpush3.msra.mxu0 %v2212_v1  ;;  %v4173_v1 = vld [vmem:[%s4740_s28] sm:$0xff] }
 0x898   : > { %3823 = vmatmul.mubr.msk.f32.gmra.mxu0 %vm1157_vm0, %v1584_v3 }
 0x8a0   : > { %2207 = vrot.lane.b32.xlu1 %v4885_v49, %s4467_s17 }
 0x8a7   : > { %2209 = vrot.lane.b32.xlu0 %v4877_v48, %s4467_s17 }
 0x914   : > { %v2184_v5 = vpop.xlane.xlu1 %2183 }
 0x915   : > { %4124 = vrcp.f32 %v2184_v5 }
 0x916   : > { %v2181_v6 = vpop.xlane.xlu0 %2180 }
 0x917   : > { %4126 = vrcp.f32 %v2181_v6 }
 0x918   : > { %v2190_v7 = vpop.xlane.xlu1 %2189 }
 0x919   : > { %4128 = vrcp.f32 %v2190_v7 }
 0x91a   : > { %v2187_v9 = vpop.xlane.xlu0 %2186 }
 0x91b   : > { %4130 = vrcp.f32 %v2187_v9  ;;  %v4174_v9 = vld [vmem:[%s4740_s28 + $0x10] sm:$0xff] }
 0x91c   : > { %v2208_v58 = vpop.permute.xlu1 %2207 }
 0x91e   : > { %v2210_v57 = vpop.permute.xlu0 %2209 }
 0x91f   : > { %3871 = vmatprep.subr.mxu0 %v2210_v57 }
 0x920   : > { %3872 = vmatpush3.msra.mxu0 %v2210_v57 }
 0x921   : > { %3873 = vmatprep.subr.mxu0 %v2208_v58 }
 0x922   : > { %3874 = vmatpush3.msra.mxu0 %v2208_v58  ;;  %v4125_v11 = vpop.eup %4124  ;;  %v4175_v58 = vld [vmem:[%s4740_s28 + $0x18] sm:$0xff]  ;;  %s4360_s28 = scalar_lea.vmem %s5310_s9, 512 }
 0x923   : > { %v2194_v59 = vmul.f32 %v4125_v11, %v4109_v40  ;;  %3881 = vmatprep.subr.mxu0 %v2356_v19  ;;  %p4361_p1 = scmp.ne.s32.totalorder %s5310_s9, %s4360_s28 }
 0x924   : > { %v4127_v12 = vpop.eup %4126 }
 0x925   : > { %v2192_v49 = vmul.f32 %v4127_v12, %v4111_v45  ;;  %v2580_v12 = vld [vmem:[#allocation14 + $0x1e8] sm:$0xff]  ;;  %p4362_p3 = pnand %p4361_p1, %p4701_p11 }
 0x926   : > { %v4129_v30 = vpop.eup %4128  ;;  %2605 = vmatprep.subr.mxu1 %v2580_v12  ;;  %v2536_v12 = vld [vmem:[#allocation14 + $0x88] sm:$0xff] }
 0x927   : > { %3875 = vmatprep.mubr.msk.f32.mxu0 %vm1157_vm0, %v2192_v49  ;;  %v2198_v36 = vmul.f32 %v4129_v30, %v4113_v51  ;;  %v2582_v49 = vld [vmem:[#allocation14 + $0x1f8] sm:$0xff]  ;;  %v2581_v30 = vld [vmem:[#allocation14 + $0x1f0] sm:$0xff]  ;;  %p4363_p5 = pneg %p4362_p3 }
 0x928   : > { %v4131_v48 = vpop.eup %4130  ;;  %3876 = vmatmul.mubr.msk.f32.vlgmr.msra.gmra.mxu0 %vm1157_vm0, %v2194_v59  ;;  %v2579_v59 = vld [vmem:[#allocation14 + $0x1e0] sm:$0xff] }
 0x929   : > { %v2196_v15 = vmul.f32 %v4131_v48, %v4117_v22  ;;  %3882 = vmatpush3.msra.mxu0 %v2356_v19  ;;  %v2576_v48 = vld [vmem:[#allocation14 + $0x1c8] sm:$0xff]  ;;  %2606 = vmatpush1.msra.mxu1 %v2579_v59  ;;  %v2573_v19 = vld [vmem:[#allocation14 + $0x1b0] sm:$0xff]  ;;  %v2535_v59 = vld [vmem:[#allocation14 + $0x80] sm:$0xff] }
 0x92a   : > { %3883 = vmatprep.subr.mxu0 %v2355_v23  ;;  %2607 = vmatprep.subr.mxu1 %v2576_v48  ;;  %v2532_v48 = vld [vmem:[#allocation14 + $0x68] sm:$0xff] }
 0x92b   : > { %3878 = vmatprep.mubr.msk.f32.mxu0 %vm1157_vm0, %v2196_v15  ;;  %3884 = vmatpush3.msra.mxu0 %v2355_v23  ;;  %v2578_v15 = vld [vmem:[#allocation14 + $0x1d8] sm:$0xff] }
 0x92c   : > { %3879 = vmatmul.mubr.msk.f32.gmra.mxu0 %vm1157_vm0, %v2198_v36  ;;  %3885 = vmatprep.subr.mxu0 %v2354_v25  ;;  %v2575_v36 = vld [vmem:[#allocation14 + $0x1c0] sm:$0xff] }
 0x92d   : > { %3886 = vmatpush3.msra.mxu0 %v2354_v25  ;;  %2608 = vmatpush1.msra.mxu1 %v2575_v36  ;;  %v2531_v36 = vld [vmem:[#allocation14 + $0x60] sm:$0xff] }
 0x92e   : > { %3887 = vmatprep.subr.mxu0 %v2353_v27 }
 0x92f   : > { %3888 = vmatpush3.msra.mxu0 %v2353_v27 }
 0x954   : > { %v3821_v16 = vpop.f32.mrf.mxu0 }
 0x955   : > { %1708 = vrot.lane.b32.xlu1 %v3821_v16, %s4467_s17  ;;  %v2577_v16 = vld [vmem:[#allocation14 + $0x1d0] sm:$0xff] }
 0x956   : > { %v1683_v37 = vpop.f32.mrf.mxu0 }
 0x957   : > { %1706 = vrot.lane.b32.xlu0 %v1683_v37, %s4467_s17  ;;  %v2572_v37 = vld [vmem:[#allocation14 + $0x1a8] sm:$0xff] }
 0x958   : > { %v3824_v17 = vpop.f32.mrf.mxu0  ;;  %2609 = vmatprep.subr.mxu1 %v2572_v37  ;;  %v2528_v37 = vld [vmem:[#allocation14 + $0x48] sm:$0xff] }
 0x959   : > { %2015 = vrot.lane.b32.xlu1 %v5032_v4, %s4466_s3  ;;  %v2352_v4 = vld [vmem:[#allocation13 + $0x58] sm:$0xff] }
 0x95a   : > { %v1693_v18 = vpop.f32.mrf.mxu0  ;;  %3889 = vmatprep.subr.mxu0 %v2352_v4 }
 0x95b   : > { %2013 = vrot.lane.b32.xlu0 %v5035_v8, %s4466_s3  ;;  %3890 = vmatpush3.msra.mxu0 %v2352_v4  ;;  %v2350_v8 = vld [vmem:[#allocation13 + $0x48] sm:$0xff] }
 0x95c   : > { %3891 = vmatprep.subr.mxu0 %v2351_v31 }
 0x95d   : > { %1712 = vrot.lane.b32.xlu1 %v3824_v17, %s4467_s17  ;;  %3892 = vmatpush3.msra.mxu0 %v2351_v31  ;;  %v2574_v17 = vld [vmem:[#allocation14 + $0x1b8] sm:$0xff] }
 0x95e   : > { %3893 = vmatprep.subr.mxu0 %v2350_v8 }
 0x95f   : > { %1710 = vrot.lane.b32.xlu0 %v1693_v18, %s4467_s17  ;;  %3894 = vmatpush3.msra.mxu0 %v2350_v8  ;;  %v2571_v18 = vld [vmem:[#allocation14 + $0x1a0] sm:$0xff] }
 0x960   : > { %3895 = vmatprep.subr.mxu0 %v2349_v32  ;;  %2610 = vmatpush1.msra.mxu1 %v2571_v18  ;;  %v2527_v18 = vld [vmem:[#allocation14 + $0x40] sm:$0xff] }
 0x961   : > { %3896 = vmatpush3.msra.mxu0 %v2349_v32 }
 0x962   : > { %3897 = vmatprep.subr.mxu0 %v2348_v34 }
 0x963   : > { %3898 = vmatpush3.msra.mxu0 %v2348_v34 }
 0x964   : > { %3899 = vmatprep.subr.mxu0 %v2347_v35 }
 0x965   : > { %3900 = vmatpush3.msra.mxu0 %v2347_v35 }
 0x966   : > { %3901 = vmatprep.subr.mxu0 %v2346_v20 }
 0x967   : > { %3902 = vmatpush3.msra.mxu0 %v2346_v20 }
 0x968   : > { %3903 = vmatprep.subr.mxu0 %v2345_v14 }
 0x969   : > { %3904 = vmatpush3.msra.mxu0 %v2345_v14  ;;  %v2570_v14 = vld [vmem:[#allocation14 + $0x198] sm:$0xff] }
 0x96a   : > { %3905 = vmatprep.subr.mxu0 %v2344_v38 }
 0x96b   : > { %3906 = vmatpush3.msra.mxu0 %v2344_v38 }
 0x96c   : > { %3907 = vmatprep.subr.mxu0 %v2343_v33 }
 0x96d   : > { %3908 = vmatpush3.msra.mxu0 %v2343_v33  ;;  %v2567_v33 = vld [vmem:[#allocation14 + $0x180] sm:$0xff] }
 0x96e   : > { %3909 = vmatprep.subr.mxu0 %v2342_v47 }
 0x96f   : > { %3910 = vmatpush3.msra.mxu0 %v2342_v47  ;;  %v2569_v47 = vld [vmem:[#allocation14 + $0x190] sm:$0xff] }
 0x970   : > { %3911 = vmatprep.subr.mxu0 %v2341_v39 }
 0x971   : > { %3912 = vmatpush3.msra.mxu0 %v2341_v39  ;;  %v2564_v39 = vld [vmem:[#allocation14 + $0x168] sm:$0xff] }
 0x972   : > { %2694 = vmatprep.subr.mxu0 %v2582_v49  ;;  %v2538_v49 = vld [vmem:[#allocation14 + $0x98] sm:$0xff] }
 0x9c7   : > { %v1709_v24 = vpop.permute.xlu1 %1708 }
 0x9c8   : > { %1720 = vst.msk [vmem:[#allocation4 + $0x8] sm:$0xff] %vm1718_vm1, %v1709_v24 }
 0x9c9   : > { %v1707_v26 = vpop.permute.xlu0 %1706 }
 0x9ca   : > { %1719 = vst.msk [vmem:[#allocation4] sm:$0xff] %vm1718_vm1, %v1707_v26 }
 0x9cb   : > { %v2016_v28 = vpop.permute.xlu1 %2015 }
 0x9cc   : > { %2027 = vst.msk [vmem:[#allocation4 + $0x8] sm:$0xff] %vm2025_vm2, %v2016_v28 }
 0x9cd   : > { %v2014_v42 = vpop.permute.xlu0 %2013 }
 0x9ce   : > { %2026 = vst.msk [vmem:[#allocation4] sm:$0xff] %vm2025_vm2, %v2014_v42 }
 0x9cf   : > { %v1713_v43 = vpop.permute.xlu1 %1712 }
 0x9d0   : > { %1722 = vst.msk [vmem:[#allocation4 + $0x18] sm:$0xff] %vm1718_vm1, %v1713_v43 }
 0x9d1   : > { %v1711_v21 = vpop.permute.xlu0 %1710 }
 0x9d2   : > { %1721 = vst.msk [vmem:[#allocation4 + $0x10] sm:$0xff] %vm1718_vm1, %v1711_v21  ;;  %v2568_v21 = vld [vmem:[#allocation14 + $0x188] sm:$0xff] }
 0x9d3   : > { %2611 = vmatprep.subr.mxu1 %v2568_v21 }
 0x9d4   : > { %2612 = vmatpush1.msra.mxu1 %v2567_v33 }
 0x9d5   : > { %2613 = vmatprep.subr.mxu1 %v2564_v39 }
 0x9e8   : > { %v3877_v13 = vpop.f32.mrf.mxu0 }
 0x9e9   : > { %2322 = vrot.lane.b32.xlu1 %v3877_v13, %s4465_s27  ;;  %v2566_v13 = vld [vmem:[#allocation14 + $0x178] sm:$0xff] }
 0x9ea   : > { %v2297_v40 = vpop.f32.mrf.mxu0 }
 0x9eb   : > { %2320 = vrot.lane.b32.xlu0 %v2297_v40, %s4465_s27  ;;  %v2563_v40 = vld [vmem:[#allocation14 + $0x160] sm:$0xff] }
 0x9ec   : > { %v3880_v41 = vpop.f32.mrf.mxu0  ;;  %2614 = vmatpush1.msra.mxu1 %v2563_v40 }
 0x9ed   : > { %2019 = vrot.lane.b32.xlu1 %v5037_v10, %s4466_s3 }
 0x9ee   : > { %v2307_v44 = vpop.f32.mrf.mxu0 }
 0x9ef   : > { %2017 = vrot.lane.b32.xlu0 %v5039_v56, %s4466_s3 }
 0x9f1   : > { %2326 = vrot.lane.b32.xlu1 %v3880_v41, %s4465_s27  ;;  %v2565_v41 = vld [vmem:[#allocation14 + $0x170] sm:$0xff] }
 0x9f3   : > { %2324 = vrot.lane.b32.xlu0 %v2307_v44, %s4465_s27  ;;  %v2560_v44 = vld [vmem:[#allocation14 + $0x148] sm:$0xff]  ;;  %s3422_s27 = sshll.u32 %s5431_s23, 9 }
 0x9f4   : > { %2615 = vmatprep.subr.mxu1 %v2560_v44  ;;  %s5315_s5 = scalar_lea.hbm %s5432_s14, %s3422_s27 }
 0xa5b   : > { %v2323_v45 = vpop.permute.xlu1 %2322 }
 0xa5c   : > { %2334 = vst.msk [vmem:[#allocation4 + $0x8] sm:$0xff] %vm2332_vm3, %v2323_v45  ;;  %v2562_v45 = vld [vmem:[#allocation14 + $0x158] sm:$0xff] }
 0xa5d   : > { %v2321_v46 = vpop.permute.xlu0 %2320 }
 0xa5e   : > { %2333 = vst.msk [vmem:[#allocation4] sm:$0xff] %vm2332_vm3, %v2321_v46  ;;  %v2559_v46 = vld [vmem:[#allocation14 + $0x140] sm:$0xff] }
 0xa5f   : > { %v2020_v50 = vpop.permute.xlu1 %2019  ;;  %2616 = vmatpush1.msra.mxu1 %v2559_v46 }
 0xa60   : > { %2029 = vst.msk [vmem:[#allocation4 + $0x18] sm:$0xff] %vm2025_vm2, %v2020_v50  ;;  %v2561_v50 = vld [vmem:[#allocation14 + $0x150] sm:$0xff] }
 0xa61   : > { %v2018_v51 = vpop.permute.xlu0 %2017 }
 0xa62   : > { %2028 = vst.msk [vmem:[#allocation4 + $0x10] sm:$0xff] %vm2025_vm2, %v2018_v51  ;;  %v2556_v51 = vld [vmem:[#allocation14 + $0x128] sm:$0xff] }
 0xa63   : > { %v2327_v10 = vpop.permute.xlu1 %2326  ;;  %v2338_v53 = vld [vmem:[#allocation4 + $0x8] sm:$0xff]  ;;  %2617 = vmatprep.subr.mxu1 %v2556_v51 }
 0xa64   : > { %2336 = vst.msk [vmem:[#allocation4 + $0x18] sm:$0xff] %vm2332_vm3, %v2327_v10  ;;  %v2558_v10 = vld [vmem:[#allocation14 + $0x138] sm:$0xff] }
 0xa65   : > { %v2325_v56 = vpop.permute.xlu0 %2324  ;;  %v2337_v52 = vld [vmem:[#allocation4] sm:$0xff] }
 0xa66   : > { %2335 = vst.msk [vmem:[#allocation4 + $0x10] sm:$0xff] %vm2332_vm3, %v2325_v56  ;;  %3913 = vmatprep.mubr.f32.mxu0 %v2337_v52  ;;  %v2555_v56 = vld [vmem:[#allocation14 + $0x120] sm:$0xff]  ;;  %v2557_v52 = vld [vmem:[#allocation14 + $0x130] sm:$0xff] }
 0xa67   : > { %3914 = vmatmul.mubr.f32.vlgmr.msra.gmra.mxu0 %v2338_v53  ;;  %2618 = vmatpush1.msra.mxu1 %v2555_v56  ;;  %v2552_v53 = vld [vmem:[#allocation14 + $0x108] sm:$0xff] }
 0xa68   : > { %2695 = vmatpush1.msra.mxu0 %v2581_v30  ;;  %2619 = vmatprep.subr.mxu1 %v2552_v53  ;;  %v2537_v30 = vld [vmem:[#allocation14 + $0x90] sm:$0xff] }
 0xa69   : > { %2696 = vmatprep.subr.mxu0 %v2578_v15  ;;  %v2534_v15 = vld [vmem:[#allocation14 + $0x78] sm:$0xff] }
 0xa6a   : > { %2697 = vmatpush1.msra.mxu0 %v2577_v16  ;;  %v2533_v16 = vld [vmem:[#allocation14 + $0x70] sm:$0xff] }
 0xa6b   : > { %v2340_v54 = vld [vmem:[#allocation4 + $0x18] sm:$0xff]  ;;  %2698 = vmatprep.subr.mxu0 %v2574_v17 }
 0xa6c   : > { %2699 = vmatpush1.msra.mxu0 %v2573_v19  ;;  %v2530_v17 = vld [vmem:[#allocation14 + $0x58] sm:$0xff]  ;;  %v2529_v19 = vld [vmem:[#allocation14 + $0x50] sm:$0xff] }
 0xa6d   : > { %v2339_v22 = vld [vmem:[#allocation4 + $0x10] sm:$0xff]  ;;  %2700 = vmatprep.subr.mxu0 %v2570_v14 }
 0xa6e   : > { %3916 = vmatprep.mubr.f32.mxu0 %v2339_v22  ;;  %2701 = vmatpush1.msra.mxu0 %v2569_v47  ;;  %v2554_v22 = vld [vmem:[#allocation14 + $0x118] sm:$0xff] }
 0xa6f   : > { %3917 = vmatmul.mubr.f32.gmra.mxu0 %v2340_v54  ;;  %2702 = vmatprep.subr.mxu0 %v2566_v13  ;;  %v2551_v54 = vld [vmem:[#allocation14 + $0x100] sm:$0xff] }
 0xa70   : > { %2703 = vmatpush1.msra.mxu0 %v2565_v41  ;;  %2620 = vmatpush1.msra.mxu1 %v2551_v54 }
 0xa71   : > { %2704 = vmatprep.subr.mxu0 %v2562_v45 }
 0xa72   : > { %2705 = vmatpush1.msra.mxu0 %v2561_v50 }
 0xa73   : > { %2706 = vmatprep.subr.mxu0 %v2558_v10  ;;  %v3413_v10 = vld [vmem:[%s5375_s11] ss:$0 sm:$0xff] }
 0xa74   : > { %2707 = vmatpush1.msra.mxu0 %v2557_v52  ;;  %v3414_v52 = vld [vmem:[%s5428_s30] ss:$0 sm:$0xff]  ;;  %s4366_s30 = scalar_lea.vmem %s4365_s24, 1024 }
 0xa75   : > { %2708 = vmatprep.subr.mxu0 %v2554_v22  ;;  %p4368_p0 = scmp.lt.s32.totalorder %s4366_s30, %s4360_s28 }
 0xa77   : > { %p4369_p7 = por %p4368_p0, %p4367_p10 }
 0xa79   : > { %p4370_p13 = pnand %p4369_p7, %p4363_p5 }
 0xb27   : > { %v3915_v29 = vpop.f32.mrf.mxu0 }
 0xb28   : > { %v2436_v60 = vadd.f32 %v3915_v29, %v3412_v55  ;;  %v2548_v29 = vld [vmem:[#allocation14 + $0xe8] sm:$0xff] }
 0xb29   : > { %v2430_v61 = vpop.f32.mrf.mxu0  ;;  %2621 = vmatprep.subr.mxu1 %v2548_v29 }
 0xb2a   : > { %v5117_v63 = vadd.f32 %v4172_v62, %v2436_v60  ;;  %v2431_v0 = vadd.f32 %v3412_v55, %v2430_v61  ;;  %v2550_v60 = vld [vmem:[#allocation14 + $0xf8] sm:$0xff]  ;;  %v2547_v61 = vld [vmem:[#allocation14 + $0xe0] sm:$0xff]  ;;  %v2549_v62 = vld [vmem:[#allocation14 + $0xf0] sm:$0xff] }
 0xb2b   : > { %2622 = vmatpush1.msra.mxu1 %v2547_v61 }
 0xb2c   : > { %v5120_v2 = vadd.f32 %v4173_v1, %v2431_v0  ;;  %2455 = vadd.xlane.f32.xlu1 %v5117_v63  ;;  %v2544_v0 = vld [vmem:[#allocation14 + $0xc8] sm:$0xff]  ;;  %v2546_v1 = vld [vmem:[#allocation14 + $0xd8] sm:$0xff] }
 0xb2d   : > { %2623 = vmatprep.subr.mxu1 %v2544_v0 }
 0xb2e   : > { %2453 = vadd.xlane.f32.xlu0 %v5120_v2 }
 0xb2f   : > { %v3918_v3 = vpop.f32.mrf.mxu0 }
 0xb30   : > { %v2446_v7 = vadd.f32 %v3918_v3, %v3412_v55  ;;  %v2543_v3 = vld [vmem:[#allocation14 + $0xc0] sm:$0xff] }
 0xb31   : > { %v2440_v5 = vpop.f32.mrf.mxu0  ;;  %2624 = vmatpush1.msra.mxu1 %v2543_v3  ;;  %v2990_v3 = vld [vmem:[#allocation16 + $0x1f8] sm:$0xff] }
 0xb32   : > { %v2441_v6 = vadd.f32 %v3412_v55, %v2440_v5  ;;  %v5129_v11 = vadd.f32 %v4175_v58, %v2446_v7  ;;  %v2553_v55 = vld [vmem:[#allocation14 + $0x110] sm:$0xff]  ;;  %v2542_v7 = vld [vmem:[#allocation14 + $0xb8] sm:$0xff] }
 0xb33   : > { %2709 = vmatpush1.msra.mxu0 %v2553_v55  ;;  %v2545_v5 = vld [vmem:[#allocation14 + $0xd0] sm:$0xff] }
 0xb34   : > { %v5125_v57 = vadd.f32 %v4174_v9, %v2441_v6  ;;  %2710 = vmatprep.subr.mxu0 %v2550_v60  ;;  %v2540_v6 = vld [vmem:[#allocation14 + $0xa8] sm:$0xff]  ;;  %v2539_v9 = vld [vmem:[#allocation14 + $0xa0] sm:$0xff]  ;;  %v2541_v58 = vld [vmem:[#allocation14 + $0xb0] sm:$0xff] }
 0xb35   : > { %2711 = vmatpush1.msra.mxu0 %v2549_v62  ;;  %2625 = vmatprep.subr.mxu1 %v2540_v6  ;;  %v2957_v6 = vld [vmem:[#allocation16 + $0xf0] sm:$0xff] }
 0xb36   : > { %2457 = vadd.xlane.f32.xlu0 %v5125_v57  ;;  %2712 = vmatprep.subr.mxu0 %v2546_v1  ;;  %v2958_v1 = vld [vmem:[#allocation16 + $0xf8] sm:$0xff] }
 0xb37   : > { %2713 = vmatpush1.msra.mxu0 %v2545_v5  ;;  %2626 = vmatpush1.msra.mxu1 %v2539_v9  ;;  %v2974_v5 = vld [vmem:[#allocation16 + $0x178] sm:$0xff]  ;;  %v2973_v9 = vld [vmem:[#allocation16 + $0x170] sm:$0xff] }
 0xb38   : > { %2714 = vmatprep.subr.mxu0 %v2542_v7  ;;  %2627 = vmatprep.subr.mxu1 %v2536_v12  ;;  %v2989_v7 = vld [vmem:[#allocation16 + $0x1f0] sm:$0xff]  ;;  %v2988_v12 = vld [vmem:[#allocation16 + $0x1e8] sm:$0xff] }
 0xb39   : > { %2715 = vmatpush1.msra.mxu0 %v2541_v58  ;;  %2628 = vmatpush1.msra.mxu1 %v2535_v59  ;;  %v2956_v58 = vld [vmem:[#allocation16 + $0xe8] sm:$0xff] }
 0xb3a   : > { %2459 = vadd.xlane.f32.xlu0 %v5129_v11  ;;  %2716 = vmatprep.subr.mxu0 %v2538_v49  ;;  %v2940_v49 = vld [vmem:[#allocation16 + $0x68] sm:$0xff] }
 0xb3b   : > { %2717 = vmatpush1.msra.mxu0 %v2537_v30  ;;  %2629 = vmatprep.subr.mxu1 %v2532_v48  ;;  %v2972_v59 = vld [vmem:[#allocation16 + $0x168] sm:$0xff]  ;;  %v2955_v30 = vld [vmem:[#allocation16 + $0xe0] sm:$0xff] }
 0xb3c   : > { %2718 = vmatprep.subr.mxu0 %v2534_v15  ;;  %2630 = vmatpush1.msra.mxu1 %v2531_v36  ;;  %v2987_v48 = vld [vmem:[#allocation16 + $0x1e0] sm:$0xff] }
 0xb3d   : > { %2719 = vmatpush1.msra.mxu0 %v2533_v16  ;;  %2631 = vmatprep.subr.mxu1 %v2528_v37  ;;  %v2939_v15 = vld [vmem:[#allocation16 + $0x60] sm:$0xff]  ;;  %v2954_v16 = vld [vmem:[#allocation16 + $0xd8] sm:$0xff] }
 0xb3e   : > { %2720 = vmatprep.subr.mxu0 %v2530_v17  ;;  %2632 = vmatpush1.msra.mxu1 %v2527_v18  ;;  %v2971_v36 = vld [vmem:[#allocation16 + $0x160] sm:$0xff]  ;;  %v2986_v37 = vld [vmem:[#allocation16 + $0x1d8] sm:$0xff] }
 0xb3f   : > { %2721 = vmatpush1.msra.mxu0 %v2529_v19  ;;  %v2938_v17 = vld [vmem:[#allocation16 + $0x58] sm:$0xff]  ;;  %v2953_v19 = vld [vmem:[#allocation16 + $0xd0] sm:$0xff] }
 0xb40   : > { %v2970_v18 = vld [vmem:[#allocation16 + $0x158] sm:$0xff] }
 0xbb5   : > { %v2456_v23 = vpop.xlane.xlu1 %2455 }
 0xbb6   : > { %v2462_v25 = vmul.f32 0.0078125, %v2456_v23  ;;  %v2524_v23 = vld [vmem:[#allocation14 + $0x28] sm:$0xff] }
 0xbb7   : > { %v2454_v27 = vpop.xlane.xlu0 %2453  ;;  %2633 = vmatprep.subr.mxu1 %v2524_v23  ;;  %v2985_v23 = vld [vmem:[#allocation16 + $0x1d0] sm:$0xff] }
 0xbb8   : > { %v5133_v4 = vsub.f32 %v5117_v63, %v2462_v25  ;;  %v2461_v31 = vmul.f32 0.0078125, %v2454_v27  ;;  %v2526_v25 = vld [vmem:[#allocation14 + $0x38] sm:$0xff]  ;;  %v2523_v27 = vld [vmem:[#allocation14 + $0x20] sm:$0xff] }
 0xbb9   : > { %2722 = vmatprep.subr.mxu0 %v2526_v25  ;;  %2634 = vmatpush1.msra.mxu1 %v2523_v27  ;;  %v2937_v25 = vld [vmem:[#allocation16 + $0x50] sm:$0xff] }
 0xbba   : > { %v5136_v8 = vsub.f32 %v5120_v2, %v2461_v31  ;;  %v2470_v32 = vmul.f32 %v5133_v4, %v5133_v4  ;;  %v2525_v31 = vld [vmem:[#allocation14 + $0x30] sm:$0xff] }
 0xbbb   : > { %2723 = vmatpush1.msra.mxu0 %v2525_v31  ;;  %v2969_v27 = vld [vmem:[#allocation16 + $0x150] sm:$0xff]  ;;  %v2952_v31 = vld [vmem:[#allocation16 + $0xc8] sm:$0xff] }
 0xbbc   : > { %2475 = vadd.xlane.f32.xlu1 %v2470_v32  ;;  %v2469_v34 = vmul.f32 %v5136_v8, %v5136_v8  ;;  %v2520_v32 = vld [vmem:[#allocation14 + $0x8] sm:$0xff] }
 0xbbd   : > { %2635 = vmatprep.subr.mxu1 %v2520_v32  ;;  %v2984_v32 = vld [vmem:[#allocation16 + $0x1c8] sm:$0xff] }
 0xbbe   : > { %2473 = vadd.xlane.f32.xlu0 %v2469_v34  ;;  %v2522_v34 = vld [vmem:[#allocation14 + $0x18] sm:$0xff] }
 0xbbf   : > { %v2458_v35 = vpop.xlane.xlu0 %2457  ;;  %2724 = vmatprep.subr.mxu0 %v2522_v34  ;;  %v2936_v34 = vld [vmem:[#allocation16 + $0x48] sm:$0xff] }
 0xbc0   : > { %v2463_v20 = vmul.f32 0.0078125, %v2458_v35  ;;  %v2519_v35 = vld [vmem:[#allocation14] sm:$0xff] }
 0xbc1   : > { %2636 = vmatpush1.msra.mxu1 %v2519_v35  ;;  %v2968_v35 = vld [vmem:[#allocation16 + $0x148] sm:$0xff] }
 0xbc2   : > { %v5143_v24 = vsub.f32 %v5125_v57, %v2463_v20  ;;  %v2521_v20 = vld [vmem:[#allocation14 + $0x10] sm:$0xff]  ;;  %3567 = vmatprep.subr.mxu1 %v2958_v1  ;;  %v2943_v1 = vld [vmem:[#allocation16 + $0x80] sm:$0xff] }
 0xbc3   : > { %v2460_v26 = vpop.xlane.xlu0 %2459  ;;  %2725 = vmatpush1.msra.mxu0 %v2521_v20  ;;  %v2951_v20 = vld [vmem:[#allocation16 + $0xc0] sm:$0xff] }
 0xbc4   : > { %v2464_v28 = vmul.f32 0.0078125, %v2460_v26  ;;  %v2471_v42 = vmul.f32 %v5143_v24, %v5143_v24  ;;  %v4468_v26 = vmov 0.0   ;;  %3611 = vmatprep.subr.mxu0 %v2990_v3  ;;  %v2975_v3 = vld [vmem:[#allocation16 + $0x180] sm:$0xff] }
 0xbc5   : > { %2669 = vmatprep.mubr.f32.mxu1 %v4468_v26  ;;  %2758 = vmatprep.mubr.f32.mxu0 %v4468_v26 }
 0xbc6   : > { %v5148_v43 = vsub.f32 %v5129_v11, %v2464_v28  ;;  %2477 = vadd.xlane.f32.xlu0 %v2471_v42 }
 0xbc8   : > { %v2472_v38 = vmul.f32 %v5148_v43, %v5148_v43 }
 0xbca   : > { %2479 = vadd.xlane.f32.xlu1 %v2472_v38 }
 0xc45   : > { %v2476_v28 = vpop.xlane.xlu1 %2475 }
 0xc46   : > { %v2482_v42 = vmul.f32 0.0078125, %v2476_v28  ;;  %v2935_v28 = vld [vmem:[#allocation16 + $0x40] sm:$0xff] }
 0xc47   : > { %v2474_v21 = vpop.xlane.xlu0 %2473 }
 0xc48   : > { %v2486_v14 = vadd.f32 1e-05, %v2482_v42  ;;  %v2481_v38 = vmul.f32 0.0078125, %v2474_v21  ;;  %v2967_v42 = vld [vmem:[#allocation16 + $0x140] sm:$0xff]  ;;  %v2950_v21 = vld [vmem:[#allocation16 + $0xb8] sm:$0xff] }
 0xc4a   : > { %4132 = vrsqrt.f32 %v2486_v14  ;;  %v2485_v33 = vadd.f32 1e-05, %v2481_v38  ;;  %v2982_v14 = vld [vmem:[#allocation16 + $0x1b8] sm:$0xff] }
 0xc4b   : > { %v2934_v38 = vld [vmem:[#allocation16 + $0x38] sm:$0xff] }
 0xc4c   : > { %4134 = vrsqrt.f32 %v2485_v33  ;;  %v2966_v33 = vld [vmem:[#allocation16 + $0x138] sm:$0xff] }
 0xc4f   : > { %v2478_v47 = vpop.xlane.xlu0 %2477 }
 0xc50   : > { %v2483_v39 = vmul.f32 0.0078125, %v2478_v47  ;;  %v2949_v47 = vld [vmem:[#allocation16 + $0xb0] sm:$0xff] }
 0xc52   : > { %v2487_v13 = vadd.f32 1e-05, %v2483_v39  ;;  %v2981_v39 = vld [vmem:[#allocation16 + $0x1b0] sm:$0xff] }
 0xc53   : > { %v2480_v40 = vpop.xlane.xlu1 %2479 }
 0xc54   : > { %4136 = vrsqrt.f32 %v2487_v13  ;;  %v2484_v41 = vmul.f32 0.0078125, %v2480_v40  ;;  %v2933_v13 = vld [vmem:[#allocation16 + $0x30] sm:$0xff] }
 0xc55   : > { %v2965_v40 = vld [vmem:[#allocation16 + $0x130] sm:$0xff] }
 0xc56   : > { %v2488_v44 = vadd.f32 1e-05, %v2484_v41  ;;  %v2948_v41 = vld [vmem:[#allocation16 + $0xa8] sm:$0xff] }
 0xc57   : > { %v4133_v45 = vpop.eup %4132 }
 0xc58   : > { %4138 = vrsqrt.f32 %v2488_v44  ;;  %v2494_v51 = vmul.f32 %v4133_v45, %v5133_v4  ;;  %v2980_v44 = vld [vmem:[#allocation16 + $0x1a8] sm:$0xff] }
 0xc59   : > { %v4135_v46 = vpop.eup %4134  ;;  %v2932_v45 = vld [vmem:[#allocation16 + $0x28] sm:$0xff] }
 0xc5a   : > { %v2493_v50 = vmul.f32 %v4135_v46, %v5136_v8  ;;  %v2505_v22 = vmul.f32 %v3413_v10, %v2494_v51  ;;  %v2964_v46 = vld [vmem:[#allocation16 + $0x128] sm:$0xff]  ;;  %v2979_v51 = vld [vmem:[#allocation16 + $0x1a0] sm:$0xff] }
 0xc5c   : > { %v2504_v56 = vmul.f32 %v3413_v10, %v2493_v50  ;;  %v2516_v55 = vadd.f32 %v3414_v52, %v2505_v22  ;;  %v2947_v50 = vld [vmem:[#allocation16 + $0xa0] sm:$0xff]  ;;  %v2930_v22 = vld [vmem:[#allocation16 + $0x18] sm:$0xff] }
 0xc5e   : > { %v2515_v53 = vadd.f32 %v3414_v52, %v2504_v56  ;;  %v2963_v56 = vld [vmem:[#allocation16 + $0x120] sm:$0xff] }
 0xc60   : > { %2670 = vmatmul.mubr.f32.vlgmr.msra.gmra.mxu1 %v2515_v53  ;;  %2759 = vmatmul.mubr.f32.vlgmr.msra.gmra.mxu0 %v2515_v53  ;;  %v2978_v53 = vld [vmem:[#allocation16 + $0x198] sm:$0xff] }
 0xc61   : > { %v4137_v54 = vpop.eup %4136  ;;  %2675 = vmatprep.mubr.f32.mxu1 %v4468_v26  ;;  %2764 = vmatprep.mubr.f32.mxu0 %v4468_v26 }
 0xc62   : > { %v2495_v8 = vmul.f32 %v4137_v54, %v5143_v24  ;;  %v2942_v24 = vld [vmem:[#allocation16 + $0x78] sm:$0xff]  ;;  %3612 = vmatpush3.msra.mxu0 %v2974_v5  ;;  %v2959_v5 = vld [vmem:[#allocation16 + $0x100] sm:$0xff] }
 0xc63   : > { %3568 = vmatpush3.msra.mxu1 %v2942_v24  ;;  %3613 = vmatprep.subr.mxu0 %v2989_v7  ;;  %v2962_v54 = vld [vmem:[#allocation16 + $0x118] sm:$0xff]  ;;  %v2927_v24 = vld [vmem:[#allocation16] sm:$0xff] }
 0xc64   : > { %2676 = vmatmul.mubr.f32.gmra.mxu1 %v2516_v55  ;;  %2765 = vmatmul.mubr.f32.gmra.mxu0 %v2516_v55  ;;  %v2506_v4 = vmul.f32 %v3413_v10, %v2495_v8  ;;  %v2945_v55 = vld [vmem:[#allocation16 + $0x90] sm:$0xff] }
 0xc65   : > { %v4139_v29 = vpop.eup %4138  ;;  %2681 = vmatprep.mubr.f32.mxu1 %v4468_v26  ;;  %2770 = vmatprep.mubr.f32.mxu0 %v4468_v26  ;;  %v2977_v8 = vld [vmem:[#allocation16 + $0x190] sm:$0xff] }
 0xc66   : > { %v2517_v60 = vadd.f32 %v3414_v52, %v2506_v4  ;;  %v2496_v61 = vmul.f32 %v4139_v29, %v5148_v43  ;;  %3569 = vmatprep.subr.mxu1 %v2957_v6  ;;  %v2941_v43 = vld [vmem:[#allocation16 + $0x70] sm:$0xff]  ;;  %3614 = vmatpush3.msra.mxu0 %v2973_v9  ;;  %v2585_v6 = vlaneseq }
 0xc67   : > { %3570 = vmatpush3.msra.mxu1 %v2941_v43  ;;  %3615 = vmatprep.subr.mxu0 %v2988_v12  ;;  %v2929_v4 = vld [vmem:[#allocation16 + $0x10] sm:$0xff] }
 0xc68   : > { %2682 = vmatmul.mubr.f32.gmra.mxu1 %v2517_v60  ;;  %2771 = vmatmul.mubr.f32.gmra.mxu0 %v2517_v60  ;;  %v2507_v62 = vmul.f32 %v3413_v10, %v2496_v61  ;;  %v2931_v10 = vld [vmem:[#allocation16 + $0x20] sm:$0xff]  ;;  %v2961_v29 = vld [vmem:[#allocation16 + $0x110] sm:$0xff]  ;;  %v2944_v60 = vld [vmem:[#allocation16 + $0x88] sm:$0xff]  ;;  %v2586_v7 = vshrl.u32 %v2585_v6, 7 }
 0xc69   : > { %2687 = vmatprep.mubr.f32.mxu1 %v4468_v26  ;;  %2776 = vmatprep.mubr.f32.mxu0 %v4468_v26  ;;  %v2983_v26 = vld [vmem:[#allocation16 + $0x1c0] sm:$0xff]  ;;  %v2976_v61 = vld [vmem:[#allocation16 + $0x188] sm:$0xff] }
 0xc6a   : > { %v2518_v0 = vadd.f32 %v3414_v52, %v2507_v62  ;;  %3571 = vmatprep.subr.mxu1 %v2956_v58  ;;  %3616 = vmatpush3.msra.mxu0 %v2972_v59  ;;  %v2946_v52 = vld [vmem:[#allocation16 + $0x98] sm:$0xff]  ;;  %v2928_v62 = vld [vmem:[#allocation16 + $0x8] sm:$0xff]  ;;  %v2587_v43 = vsub.s32 0, %v2586_v7  ;;  %v2595_v9 = vsub.s32 2, %v2586_v7  ;;  %v2583_v58 = vld [vmem:[%s5429_s1] sm:$0xf] }
 0xc6b   : > { %3572 = vmatpush3.msra.mxu1 %v2940_v49  ;;  %3617 = vmatprep.subr.mxu0 %v2987_v48  ;;  %v2591_v12 = vsub.s32 1, %v2586_v7  ;;  %v2599_v49 = vsub.s32 3, %v2586_v7 }
 0xc6c   : > { %2688 = vmatmul.mubr.f32.gmra.mxu1 %v2518_v0  ;;  %2777 = vmatmul.mubr.f32.gmra.mxu0 %v2518_v0  ;;  %v2960_v0 = vld [vmem:[#allocation16 + $0x108] sm:$0xff]  ;;  %v5165_v59 = vrot.slane %v2583_v58, %v2587_v43 }
 0xc6d   : > { %3573 = vmatprep.subr.mxu1 %v2955_v30  ;;  %3618 = vmatpush3.msra.mxu0 %v2971_v36  ;;  %v5167_v30 = vrot.slane %v2583_v58, %v2595_v9  ;;  %v5169_v36 = vrot.slane %v2583_v58, %v2591_v12 }
 0xc6e   : > { %3574 = vmatpush3.msra.mxu1 %v2939_v15  ;;  %3619 = vmatprep.subr.mxu0 %v2986_v37 }
 0xc6f   : > { %3575 = vmatprep.subr.mxu1 %v2954_v16  ;;  %3620 = vmatpush3.msra.mxu0 %v2970_v18  ;;  %v5171_v16 = vrot.slane %v2583_v58, %v2599_v49 }
 0xc70   : > { %3576 = vmatpush3.msra.mxu1 %v2938_v17  ;;  %3621 = vmatprep.subr.mxu0 %v2985_v23 }
 0xc71   : > { %3577 = vmatprep.subr.mxu1 %v2953_v19  ;;  %3622 = vmatpush3.msra.mxu0 %v2969_v27 }
 0xc72   : > { %3578 = vmatpush3.msra.mxu1 %v2937_v25  ;;  %3623 = vmatprep.subr.mxu0 %v2984_v32 }
 0xc73   : > { %3579 = vmatprep.subr.mxu1 %v2952_v31  ;;  %3624 = vmatpush3.msra.mxu0 %v2968_v35 }
 0xc74   : > { %3580 = vmatpush3.msra.mxu1 %v2936_v34  ;;  %3625 = vmatprep.subr.mxu0 %v2983_v26 }
 0xc75   : > { %3581 = vmatprep.subr.mxu1 %v2951_v20  ;;  %3626 = vmatpush3.msra.mxu0 %v2967_v42 }
 0xc76   : > { %3582 = vmatpush3.msra.mxu1 %v2935_v28  ;;  %3627 = vmatprep.subr.mxu0 %v2982_v14 }
 0xc77   : > { %3583 = vmatprep.subr.mxu1 %v2950_v21  ;;  %3628 = vmatpush3.msra.mxu0 %v2966_v33 }
 0xc78   : > { %3584 = vmatpush3.msra.mxu1 %v2934_v38  ;;  %3629 = vmatprep.subr.mxu0 %v2981_v39 }
 0xc79   : > { %3585 = vmatprep.subr.mxu1 %v2949_v47  ;;  %3630 = vmatpush3.msra.mxu0 %v2965_v40 }
 0xc7a   : > { %3586 = vmatpush3.msra.mxu1 %v2933_v13  ;;  %3631 = vmatprep.subr.mxu0 %v2980_v44 }
 0xc7b   : > { %3587 = vmatprep.subr.mxu1 %v2948_v41  ;;  %3632 = vmatpush3.msra.mxu0 %v2964_v46 }
 0xc7c   : > { %3588 = vmatpush3.msra.mxu1 %v2932_v45  ;;  %3633 = vmatprep.subr.mxu0 %v2979_v51 }
 0xc7d   : > { %3589 = vmatprep.subr.mxu1 %v2947_v50  ;;  %3634 = vmatpush3.msra.mxu0 %v2963_v56 }
 0xc7e   : > { %3590 = vmatpush3.msra.mxu1 %v2931_v10  ;;  %3635 = vmatprep.subr.mxu0 %v2978_v53 }
 0xc7f   : > { %3591 = vmatprep.subr.mxu1 %v2946_v52  ;;  %3636 = vmatpush3.msra.mxu0 %v2962_v54 }
 0xc80   : > { %3592 = vmatpush3.msra.mxu1 %v2930_v22  ;;  %3637 = vmatprep.subr.mxu0 %v2977_v8 }
 0xc81   : > { %3593 = vmatprep.subr.mxu1 %v2945_v55  ;;  %3638 = vmatpush3.msra.mxu0 %v2961_v29 }
 0xc82   : > { %3594 = vmatpush3.msra.mxu1 %v2929_v4  ;;  %3639 = vmatprep.subr.mxu0 %v2976_v61 }
 0xc83   : > { %3595 = vmatprep.subr.mxu1 %v2944_v60  ;;  %3640 = vmatpush3.msra.mxu0 %v2960_v0 }
 0xc84   : > { %3596 = vmatpush3.msra.mxu1 %v2928_v62  ;;  %3641 = vmatprep.subr.mxu0 %v2975_v3 }
 0xc85   : > { %3597 = vmatprep.subr.mxu1 %v2943_v1  ;;  %3642 = vmatpush3.msra.mxu0 %v2959_v5 }
 0xc86   : > { %3598 = vmatpush3.msra.mxu1 %v2927_v24 }
 0xd20   : > { %v2671_v48 = vpop.f32.mrf.mxu1  ;;  %v2760_v15 = vpop.f32.mrf.mxu0 }
 0xd21   : > { %v5174_v37 = vadd.f32 %v2671_v48, %v5165_v59  ;;  %v5177_v17 = vadd.f32 %v2760_v15, %v5167_v30 }
 0xd22   : > { %v2673_v18 = vpop.f32.mrf.mxu1  ;;  %v2762_v19 = vpop.f32.mrf.mxu0 }
 0xd23   : > { %v2799_v23 = vmul.f32 %v5174_v37, %v5174_v37  ;;  %v2801_v25 = vmul.f32 %v5177_v17, %v5177_v17  ;;  %v5184_v27 = vadd.f32 %v2673_v18, %v5169_v36  ;;  %v5187_v31 = vadd.f32 %v2762_v19, %v5171_v16 }
 0xd24   : > { %v2677_v32 = vpop.f32.mrf.mxu1  ;;  %v2766_v34 = vpop.f32.mrf.mxu0 }
 0xd25   : > { %v2815_v35 = vmul.f32 %v2799_v23, %v5174_v37  ;;  %v2817_v20 = vmul.f32 %v2801_v25, %v5177_v17  ;;  %v5192_v26 = vadd.f32 %v2677_v32, %v5165_v59  ;;  %v5195_v28 = vadd.f32 %v2766_v34, %v5167_v30 }
 0xd26   : > { %v2800_v42 = vmul.f32 %v5184_v27, %v5184_v27  ;;  %v2802_v21 = vmul.f32 %v5187_v31, %v5187_v31  ;;  %v2679_v14 = vpop.f32.mrf.mxu1  ;;  %v2768_v38 = vpop.f32.mrf.mxu0 }
 0xd27   : > { %v2831_v33 = vmul.f32 0.044715, %v2815_v35  ;;  %v2833_v47 = vmul.f32 0.044715, %v2817_v20  ;;  %v2803_v39 = vmul.f32 %v5192_v26, %v5192_v26  ;;  %v2805_v13 = vmul.f32 %v5195_v28, %v5195_v28 }
 0xd28   : > { %v2816_v40 = vmul.f32 %v2800_v42, %v5184_v27  ;;  %v2818_v41 = vmul.f32 %v2802_v21, %v5187_v31  ;;  %v5208_v44 = vadd.f32 %v2679_v14, %v5169_v36  ;;  %v5211_v45 = vadd.f32 %v2768_v38, %v5171_v16  ;;  %v2683_v46 = vpop.f32.mrf.mxu1  ;;  %v2772_v50 = vpop.f32.mrf.mxu0 }
 0xd29   : > { %v2847_v51 = vadd.f32 %v2831_v33, %v5174_v37  ;;  %v2849_v10 = vadd.f32 %v2833_v47, %v5177_v17  ;;  %v2819_v56 = vmul.f32 %v2803_v39, %v5192_v26  ;;  %v2821_v29 = vmul.f32 %v2805_v13, %v5195_v28 }
 0xd2a   : > { %v2832_v52 = vmul.f32 0.044715, %v2816_v40  ;;  %v2834_v53 = vmul.f32 0.044715, %v2818_v41  ;;  %v2804_v22 = vmul.f32 %v5208_v44, %v5208_v44  ;;  %v2806_v54 = vmul.f32 %v5211_v45, %v5211_v45  ;;  %v2685_v55 = vpop.f32.mrf.mxu1  ;;  %v2774_v8 = vpop.f32.mrf.mxu0 }
 0xd2b   : > { %v2863_v4 = vmul.f32 0.7978846, %v2847_v51  ;;  %v5222_v60 = vadd.f32 %v2683_v46, %v5165_v59  ;;  %v2835_v61 = vmul.f32 0.044715, %v2819_v56  ;;  %v2865_v0 = vmul.f32 0.7978846, %v2849_v10 }
 0xd2c   : > { %v2820_v62 = vmul.f32 %v2804_v22, %v5208_v44  ;;  %v2848_v1 = vadd.f32 %v2832_v52, %v5184_v27  ;;  %v2822_v3 = vmul.f32 %v2806_v54, %v5211_v45  ;;  %v2850_v5 = vadd.f32 %v2834_v53, %v5187_v31  ;;  %v2689_v6 = vpop.f32.mrf.mxu1  ;;  %v2778_v7 = vpop.f32.mrf.mxu0 }
 0xd2d   : > { %v2807_v24 = vmul.f32 %v5222_v60, %v5222_v60  ;;  %4140 = vtanh.f32 %v2863_v4  ;;  %v2837_v43 = vmul.f32 0.044715, %v2821_v29  ;;  %v2851_v12 = vadd.f32 %v2835_v61, %v5192_v26 }
 0xd2e   : > { %v2836_v9 = vmul.f32 0.044715, %v2820_v62  ;;  %v2838_v58 = vmul.f32 0.044715, %v2822_v3  ;;  %v5232_v49 = vadd.f32 %v2772_v50, %v5167_v30  ;;  %v5235_v48 = vadd.f32 %v2685_v55, %v5169_v36  ;;  %v2691_v20 = vpop.f32.mrf.mxu1  ;;  %v2780_v42 = vpop.f32.mrf.mxu0 }
 0xd2f   : > { %v5238_v15 = vadd.f32 %v2774_v8, %v5171_v16  ;;  %4142 = vtanh.f32 %v2865_v0  ;;  %v2864_v18 = vmul.f32 0.7978846, %v2848_v1  ;;  %v2823_v19 = vmul.f32 %v2807_v24, %v5222_v60 }
 0xd30   : > { %v5242_v23 = vadd.f32 %v2689_v6, %v5165_v59  ;;  %v2809_v25 = vmul.f32 %v5232_v49, %v5232_v49  ;;  %v2808_v32 = vmul.f32 %v5235_v48, %v5235_v48  ;;  %v5251_v35 = vadd.f32 %v2778_v7, %v5167_v30 }
 0xd31   : > { %v2810_v34 = vmul.f32 %v5238_v15, %v5238_v15  ;;  %v2866_v21 = vmul.f32 0.7978846, %v2850_v5  ;;  %v2852_v14 = vadd.f32 %v2836_v9, %v5208_v44  ;;  %v2854_v59 = vadd.f32 %v2838_v58, %v5211_v45 }
 0xd32   : > { %v2811_v38 = vmul.f32 %v5242_v23, %v5242_v23  ;;  %v2825_v33 = vmul.f32 %v2809_v25, %v5232_v49  ;;  %v2824_v47 = vmul.f32 %v2808_v32, %v5235_v48  ;;  %v2813_v30 = vmul.f32 %v5251_v35, %v5251_v35 }
 0xd33   : > { %v2826_v39 = vmul.f32 %v2810_v34, %v5238_v15  ;;  %v2853_v13 = vadd.f32 %v2837_v43, %v5195_v28  ;;  %v2839_v40 = vmul.f32 0.044715, %v2823_v19  ;;  %v5264_v41 = vadd.f32 %v2691_v20, %v5169_v36 }
 0xd34   : > { %v5267_v46 = vadd.f32 %v2780_v42, %v5171_v16  ;;  %v2841_v50 = vmul.f32 0.044715, %v2825_v33  ;;  %v2840_v51 = vmul.f32 0.044715, %v2824_v47  ;;  %v2827_v56 = vmul.f32 %v2811_v38, %v5242_v23 }
 0xd35   : > { %v2842_v10 = vmul.f32 0.044715, %v2826_v39  ;;  %v2829_v52 = vmul.f32 %v2813_v30, %v5251_v35  ;;  %v2812_v53 = vmul.f32 %v5264_v41, %v5264_v41  ;;  %4144 = vtanh.f32 %v2864_v18 }
 0xd36   : > { %v2814_v22 = vmul.f32 %v5267_v46, %v5267_v46  ;;  %v2868_v54 = vmul.f32 0.7978846, %v2852_v14  ;;  %v2870_v36 = vmul.f32 0.7978846, %v2854_v59  ;;  %v2856_v55 = vadd.f32 %v2840_v51, %v5235_v48 }
 0xd37   : > { %v2858_v16 = vadd.f32 %v2842_v10, %v5238_v15  ;;  %v2828_v8 = vmul.f32 %v2812_v53, %v5264_v41  ;;  %4146 = vtanh.f32 %v2866_v21  ;;  %v2867_v29 = vmul.f32 0.7978846, %v2851_v12 }
 0xd38   : > { %v2830_v4 = vmul.f32 %v2814_v22, %v5267_v46  ;;  %v2855_v61 = vadd.f32 %v2839_v40, %v5222_v60  ;;  %v2843_v62 = vmul.f32 0.044715, %v2827_v56  ;;  %v2869_v0 = vmul.f32 0.7978846, %v2853_v13 }
 0xd39   : > { %v2857_v1 = vadd.f32 %v2841_v50, %v5232_v49  ;;  %v2845_v3 = vmul.f32 0.044715, %v2829_v52  ;;  %v2844_v24 = vmul.f32 0.044715, %v2828_v8  ;;  %v2872_v6 = vmul.f32 0.7978846, %v2856_v55 }
 0xd3a   : > { %v4141_v5 = vpop.eup %4140  ;;  %v2846_v7 = vmul.f32 0.044715, %v2830_v4  ;;  %4148 = vtanh.f32 %v2868_v54  ;;  %v2874_v43 = vmul.f32 0.7978846, %v2858_v16  ;;  %v2871_v18 = vmul.f32 0.7978846, %v2855_v61 }
 0xd3b   : > { %v2860_v9 = vadd.f32 %v2844_v24, %v5264_v41  ;;  %4150 = vtanh.f32 %v2870_v36  ;;  %v2859_v12 = vadd.f32 %v2843_v62, %v5242_v23  ;;  %v2873_v25 = vmul.f32 0.7978846, %v2857_v1 }
 0xd3c   : > { %v4143_v58 = vpop.eup %4142  ;;  %v2862_v19 = vadd.f32 %v2846_v7, %v5267_v46  ;;  %4152 = vtanh.f32 %v2867_v29  ;;  %v2861_v32 = vadd.f32 %v2845_v3, %v5251_v35  ;;  %v2895_v59 = vadd.f32 1.0, %v4141_v5 }
 0xd3d   : > { %4154 = vtanh.f32 %v2869_v0  ;;  %v2876_v34 = vmul.f32 0.7978846, %v2860_v9  ;;  %v2875_v42 = vmul.f32 0.7978846, %v2859_v12  ;;  %v2784_v38 = vmul.f32 0.5, %v5184_v27 }
 0xd3e   : > { %4156 = vtanh.f32 %v2872_v6  ;;  %v2878_v20 = vmul.f32 0.7978846, %v2862_v19  ;;  %v2877_v21 = vmul.f32 0.7978846, %v2861_v32  ;;  %v2783_v39 = vmul.f32 0.5, %v5174_v37 }
 0xd3f   : > { %4158 = vtanh.f32 %v2874_v43  ;;  %v2897_v30 = vadd.f32 1.0, %v4143_v58  ;;  %v2786_v40 = vmul.f32 0.5, %v5187_v31  ;;  %v2785_v10 = vmul.f32 0.5, %v5177_v17 }
 0xd40   : > { %4160 = vtanh.f32 %v2871_v18  ;;  %v2911_v51 = vmul.f32 %v2895_v59, %v2783_v39  ;;  %v2788_v22 = vmul.f32 0.5, %v5208_v44  ;;  %v2790_v36 = vmul.f32 0.5, %v5211_v45 }
 0xd41   : > { %4162 = vtanh.f32 %v2873_v25  ;;  %v2913_v27 = vmul.f32 %v2897_v30, %v2785_v10  ;;  %v2787_v8 = vmul.f32 0.5, %v5192_v26  ;;  %v2789_v61 = vmul.f32 0.5, %v5195_v28  ;;  %v3415_v30 = vld [vmem:[%s5430_s12] ss:$0 sm:$0xff] }
 0xd42   : > { %v4145_v14 = vpop.eup %4144  ;;  %4164 = vtanh.f32 %v2876_v34  ;;  %v2792_v1 = vmul.f32 0.5, %v5235_v48  ;;  %v2794_v5 = vmul.f32 0.5, %v5238_v15  ;;  %v2791_v43 = vmul.f32 0.5, %v5222_v60 }
 0xd43   : > { %v2896_v33 = vadd.f32 1.0, %v4145_v14  ;;  %4166 = vtanh.f32 %v2878_v20  ;;  %v2793_v18 = vmul.f32 0.5, %v5232_v49  ;;  %v2796_v25 = vmul.f32 0.5, %v5264_v41 }
 0xd44   : > { %v4147_v47 = vpop.eup %4146  ;;  %4168 = vtanh.f32 %v2875_v42  ;;  %v2798_v20 = vmul.f32 0.5, %v5267_v46  ;;  %v2795_v14 = vmul.f32 0.5, %v5242_v23 }
 0xd45   : > { %v2912_v13 = vmul.f32 %v2896_v33, %v2784_v38  ;;  %v2898_v50 = vadd.f32 1.0, %v4147_v47  ;;  %4170 = vtanh.f32 %v2877_v21  ;;  %v2797_v38 = vmul.f32 0.5, %v5251_v35 }
 0xd47   : > { %v4149_v56 = vpop.eup %4148  ;;  %3062 = vmatprep.mubr.f32.mxu1 %v2912_v13  ;;  %v2914_v52 = vmul.f32 %v2898_v50, %v2786_v40 }
 0xd48   : > { %v4151_v53 = vpop.eup %4150  ;;  %3063 = vmatmul.mubr.f32.vlgmr.msra.gmra.mxu1 %v2911_v51  ;;  %v2900_v54 = vadd.f32 1.0, %v4149_v56 }
 0xd49   : > { %v4153_v37 = vpop.eup %4152  ;;  %3147 = vmatprep.mubr.f32.mxu0 %v2914_v52  ;;  %v2902_v55 = vadd.f32 1.0, %v4151_v53 }
 0xd4a   : > { %v4155_v31 = vpop.eup %4154  ;;  %3148 = vmatmul.mubr.f32.vlgmr.msra.gmra.mxu0 %v2913_v27  ;;  %v2916_v16 = vmul.f32 %v2900_v54, %v2788_v22  ;;  %v2899_v17 = vadd.f32 1.0, %v4153_v37 }
 0xd4b   : > { %v4157_v4 = vpop.eup %4156  ;;  %v2918_v29 = vmul.f32 %v2902_v55, %v2790_v36  ;;  %v2901_v62 = vadd.f32 1.0, %v4155_v31 }
 0xd4c   : > { %v4159_v0 = vpop.eup %4158  ;;  %3067 = vmatprep.mubr.f32.mxu1 %v2916_v16  ;;  %v2915_v44 = vmul.f32 %v2899_v17, %v2787_v8  ;;  %v2904_v3 = vadd.f32 1.0, %v4157_v4 }
 0xd4d   : > { %v4161_v24 = vpop.eup %4160  ;;  %3152 = vmatprep.mubr.f32.mxu0 %v2918_v29  ;;  %v2917_v45 = vmul.f32 %v2901_v62, %v2789_v61  ;;  %v2906_v6 = vadd.f32 1.0, %v4159_v0 }
 0xd4e   : > { %v4163_v7 = vpop.eup %4162  ;;  %3068 = vmatmul.mubr.f32.gmra.mxu1 %v2915_v44  ;;  %v2920_v26 = vmul.f32 %v2904_v3, %v2792_v1  ;;  %v2903_v9 = vadd.f32 1.0, %v4161_v24 }
 0xd4f   : > { %v4165_v28 = vpop.eup %4164  ;;  %3153 = vmatmul.mubr.f32.gmra.mxu0 %v2917_v45  ;;  %v2922_v58 = vmul.f32 %v2906_v6, %v2794_v5  ;;  %v2905_v12 = vadd.f32 1.0, %v4163_v7 }
 0xd50   : > { %v4167_v48 = vpop.eup %4166  ;;  %3072 = vmatprep.mubr.f32.mxu1 %v2920_v26  ;;  %v2919_v19 = vmul.f32 %v2903_v9, %v2791_v43  ;;  %v2908_v32 = vadd.f32 1.0, %v4165_v28 }
 0xd51   : > { %v4169_v15 = vpop.eup %4168  ;;  %3157 = vmatprep.mubr.f32.mxu0 %v2922_v58  ;;  %v2921_v34 = vmul.f32 %v2905_v12, %v2793_v18  ;;  %v2910_v42 = vadd.f32 1.0, %v4167_v48 }
 0xd52   : > { %v4171_v60 = vpop.eup %4170  ;;  %3073 = vmatmul.mubr.f32.gmra.mxu1 %v2919_v19  ;;  %v2924_v21 = vmul.f32 %v2908_v32, %v2796_v25  ;;  %v2907_v59 = vadd.f32 1.0, %v4169_v15 }
 0xd53   : > { %3158 = vmatmul.mubr.f32.gmra.mxu0 %v2921_v34  ;;  %v2926_v49 = vmul.f32 %v2910_v42, %v2798_v20  ;;  %v2909_v33 = vadd.f32 1.0, %v4171_v60 }
 0xd54   : > { %3077 = vmatprep.mubr.f32.mxu1 %v2924_v21  ;;  %v2923_v41 = vmul.f32 %v2907_v59, %v2795_v14 }
 0xd55   : > { %3162 = vmatprep.mubr.f32.mxu0 %v2926_v49  ;;  %v2925_v47 = vmul.f32 %v2909_v33, %v2797_v38 }
 0xd56   : > { %3078 = vmatmul.mubr.f32.gmra.mxu1 %v2923_v41 }
 0xd57   : > { %3163 = vmatmul.mubr.f32.gmra.mxu0 %v2925_v47 }
 0xe08   : > { %v3599_v39 = vpop.f32.mrf.mxu1 }
 0xe0a   : > { %v3643_v46 = vpop.f32.mrf.mxu0  ;;  %v3600_v23 = vpop.f32.mrf.mxu1 }
 0xe0b   : > { %v3601_v13 = vadd.f32 %v3600_v23, %v3599_v39 }
 0xe0c   : > { %v3644_v40 = vpop.f32.mrf.mxu0 }
 0xe0d   : > { %v3065_v50 = vadd.f32 %v3601_v13, %v3415_v30  ;;  %v3645_v51 = vadd.f32 %v3644_v40, %v3643_v46 }
 0xe0e   : > { %v3602_v35 = vpop.f32.mrf.mxu1 }
 0xe0f   : > { %v3150_v10 = vadd.f32 %v3645_v51, %v3065_v50  ;;  %v3646_v56 = vpop.f32.mrf.mxu0 }
 0xe10   : > { %v3603_v52 = vpop.f32.mrf.mxu1 }
 0xe11   : > { %v3168_v53 = vadd.f32 %v3150_v10, %v5120_v2  ;;  %v3604_v27 = vadd.f32 %v3603_v52, %v3602_v35  ;;  %v3647_v22 = vpop.f32.mrf.mxu0 }
 0xe12   : > { %v3605_v54 = vpop.f32.mrf.mxu1  ;;  %v3648_v36 = vadd.f32 %v3647_v22, %v3646_v56 }
 0xe13   : > { %3172 = vst [vmem:[%s667_s19] sm:$0xff] %v3168_v53  ;;  %v3070_v37 = vadd.f32 %v3604_v27, %v3415_v30  ;;  %v3649_v55 = vpop.f32.mrf.mxu0 }
 0xe14   : > { %v3606_v31 = vpop.f32.mrf.mxu1 }
 0xe15   : > { %v3155_v16 = vadd.f32 %v3648_v36, %v3070_v37  ;;  %v3607_v8 = vadd.f32 %v3606_v31, %v3605_v54  ;;  %v3650_v17 = vpop.f32.mrf.mxu0 }
 0xe16   : > { %v3608_v4 = vpop.f32.mrf.mxu1  ;;  %v3651_v62 = vadd.f32 %v3650_v17, %v3649_v55 }
 0xe17   : > { %v3169_v29 = vadd.f32 %v3155_v16, %v5117_v63  ;;  %v3075_v61 = vadd.f32 %v3607_v8, %v3415_v30  ;;  %v3652_v2 = vpop.f32.mrf.mxu0 }
 0xe18   : > { %v3609_v0 = vpop.f32.mrf.mxu1 }
 0xe19   : > { %3173 = vst [vmem:[%s667_s19 + $0x8] sm:$0xff] %v3169_v29  ;;  %v3160_v44 = vadd.f32 %v3651_v62, %v3075_v61  ;;  %v3610_v1 = vadd.f32 %v3609_v0, %v3608_v4  ;;  %v3653_v3 = vpop.f32.mrf.mxu0 }
 0xe1a   : > { %v3654_v5 = vadd.f32 %v3653_v3, %v3652_v2 }
 0xe1b   : > { %v3170_v24 = vadd.f32 %v3160_v44, %v5125_v57  ;;  %v3080_v45 = vadd.f32 %v3610_v1, %v3415_v30 }
 0xe1d   : > { %3174 = vst [vmem:[%s667_s19 + $0x10] sm:$0xff] %v3170_v24  ;;  %v3165_v63 = vadd.f32 %v3654_v5, %v3080_v45 }
 0xe1f   : > { %v3171_v6 = vadd.f32 %v3165_v63, %v5129_v11 }
 0xe21   : > { %3175 = vst [vmem:[%s667_s19 + $0x18] sm:$0xff] %v3171_v6 }
 0xe22   : > { %4373 = shalt.err (!%p4370_p13)
}
 0xe23   : > { %s4374_s18 = scalar_lea.hbm %s5315_s5, 512  ;;  %s4378_s20 = scalar_lea.hbm %s5432_s14, 1024 }
 0xe24   : > { %p4375_p2 = scmp.ne.s32.totalorder %s5315_s5, %s4374_s18  ;;  %p4379_p8 = scmp.lt.s32.totalorder %s5315_s5, %s5432_s14 }
 0xe25   : > { %p4380_p12 = scmp.lt.s32.totalorder %s4378_s20, %s4374_s18 }
 0xe26   : > { %p4376_p9 = pnand %p4375_p2, %p4701_p11 }
 0xe27   : > { %p4381_p4 = por %p4380_p12, %p4379_p8 }
 0xe28   : > { %p4377_p6 = pneg %p4376_p9 }
 0xe2a   : > { %p4382_p1 = pnand %p4381_p4, %p4377_p6 }
 0xe2c   : > { %4385 = shalt.err (!%p4382_p1)
}
 0xe2d   : > { %s4470_s19 = smov 128   ;;  %s4471_s23 = smov 8  }
 0xe2e   : > { %3945 = dma.vmem_to_hbm [thread:$0]  (%p4701_p11), %s5310_s9, 512, %s5315_s5, %s3177_s15, %s4470_s19, %s4470_s19, %s4471_s23  }
 0xe2f PF: > { %s5433_s27 = sld [smem:[#allocation23_spill]]  ;;  %p5434_p3 = scmp.ne.s32.totalorder %s5424_s0, 0 }
 0xe30   : > { %p5435_p5 = scmp.ge.s32.totalorder %s4452_s29, 2 }
 0xe32   : > { %p3971_p10 = pnand %p5435_p5, %p5434_p3 }
 0xe34   : > { %p3972_p0 = pneg %p3971_p10 }
 0xe35   : > { %s3207_s3 = sand.u32 1, %s5433_s27  }
 0xe36   : > { %s3208_s17 = scalar_lea.sflag [#allocation7], %s3207_s3 }
 0xe37   : > { %4427 = dma.done.wait (%p3972_p0), %s3208_s17, 512  }
 0xe38   : > { %4429 = vsyncadd (%p3972_p0), %s3208_s17, 4294966784  ;;  %s36_s29 = sadd.s32 1, %s4452_s29   ;;  %s5436_s22 = sld [smem:[#allocation27_spill]] }
 0xe39   : > { %p33_p7 = scmp.ge.s32.totalorder %s36_s29, 4   ;;  %s5437_s27 = sld [smem:[#allocation25_spill]] }
 0xe3a   : > { %s5438_s28 = sld [smem:[#allocation26_spill]]  ;;  %s5439_s24 = smov %s4436_s25 }
 0xe3b   : > { %s5440_s25 = smov %s4440_s26  ;;  %35 = sbr.rel (!%p33_p7) target bundleno = 22 (0x16), region = 162 }
 0xe3e   : > { %s5441_s26 = smov %s5436_s22 }
 0xe40   :  { %3213 = vsyncpa [#allocation6], 1 }
 0xe41   :  { %3215 = vsyncpa [#allocation6 + $0x1], 1 }
 0xe42   :  { %3216 = vsyncpa [#allocation9], 1 }
 0xe43   :  { %3217 = vsyncpa [#allocation12], 1 }
 0xe44   :  { %3218 = vsyncpa [#allocation15], 1 }
 0xe45   :  { %3219 = vsyncpa [#allocation7], 1 }
 0xe46   :  { %3221 = vsyncpa [#allocation7 + $0x1], 1 }

</bundles_post_ra>
